<compile_context>
chip_gen: v5e
topology: v5e:2x2
jax: 0.10.0
libtpu: 0.0.40
codegen_flags: <defaults>
</compile_context>

<pallas_src>
import jax
import jax.numpy as jnp
from jax.experimental import pallas as pl
from jax.experimental.pallas import tpu as pltpu


# ---------------------------------------------------------------------------
# Fused Pallas kernel
# ---------------------------------------------------------------------------
def _prelu(y, a):
    # PReLU with per-channel slope `a` (shape (1, C)) broadcast over batch.
    return jnp.where(y >= 0, y, a * y)


def fused_model_kernel(*refs):
    """refs = [x_ref (bf16),
               (w1,b1,a1,w2,b2,a2,w3,b3,a3) x 3 basic blocks  (w* bf16, b*/a* f32),
               w_out (bf16), b_out (f32),
               o_ref (f32)]"""
    x_ref = refs[0]
    o_ref = refs[-1]
    p = refs[1:-1]

    h = x_ref[...]                              # already bf16
    idx = 0
    for _ in range(3):                          # unrolled at trace time
        w1, b1, a1, w2, b2, a2, w3, b3, a3 = p[idx:idx + 9]
        idx += 9
        x1 = _prelu(jnp.dot(h, w1[...],
                            preferred_element_type=jnp.float32) + b1[...],
                    a1[...])                    # dropout == identity (eval)
        x2 = _prelu(jnp.dot(x1.astype(jnp.bfloat16), w2[...],
                            preferred_element_type=jnp.float32) + b2[...],
                    a2[...])
        x3 = _prelu(jnp.dot(x2.astype(jnp.bfloat16), w3[...],
                            preferred_element_type=jnp.float32) + b3[...],
                    a3[...])
        h = (x3 + x1).astype(jnp.bfloat16)      # residual add (f32) -> bf16

    w_out, b_out = p[idx], p[idx + 1]
    o_ref[...] = (jnp.dot(h, w_out[...],
                          preferred_element_type=jnp.float32) + b_out[...])


# ---------------------------------------------------------------------------
# Wrapper helpers
# ---------------------------------------------------------------------------
def _round_up(x, m):
    return ((x + m - 1) // m) * m


def _pad2(a, rows, cols):
    r, c = a.shape
    return jnp.pad(a, ((0, rows - r), (0, cols - c)))


def _num_tensorcores():
    """Best-effort TensorCore count (v7x has 2 per chip). Defaults to 1."""
    try:
        info = pltpu.get_tpu_info()
        for name in ("num_cores", "num_tensorcores", "tensorcore_count",
                     "core_count"):
            v = getattr(info, name, None)
            if isinstance(v, int) and v > 0:
                return max(1, min(int(v), 8))
    except Exception:
        pass
    try:
        v = getattr(jax.devices()[0], "num_cores", None)
        if isinstance(v, int) and v > 0:
            return max(1, min(int(v), 8))
    except Exception:
        pass
    return 1


# ---------------------------------------------------------------------------
# Wrapper
# ---------------------------------------------------------------------------
@jax.jit
def model_forward(x, params):
    """x: (B, in_feature) f32.  params: dict produced by init_model()."""
    B, in_f = x.shape
    bf16, f32 = jnp.bfloat16, jnp.float32

    # --- batch tiling: large tiles, core-count aware ------------------------
    B16 = max(_round_up(B, 16), 16)             # bf16 sublane granularity
    n_cores = _num_tensorcores()
    min_steps = n_cores if B16 >= 16 * n_cores else 1
    tile_b = min(1024, _round_up(-(-B16 // min_steps), 16))
    B_pad = _round_up(B16, tile_b)

    # --- lane padding: every feature dim -> multiple of 128, input in bf16 --
    p_in = _round_up(in_f, 128)
    x_p = jnp.pad(x, ((0, B_pad - B), (0, p_in - in_f))).astype(bf16)

    operands = [x_p]
    in_specs = [pl.BlockSpec((tile_b, p_in), lambda i: (i, 0))]

    def full_spec(arr):
        # grid-invariant full-array block (kept resident in VMEM)
        return pl.BlockSpec(arr.shape, lambda i: (0, 0))

    def add(arr):
        operands.append(arr)
        in_specs.append(full_spec(arr))

    widths = [p_in]
    cur_in = p_in
    for blk in ("b1", "b2", "b3"):
        p = params[blk]
        out_f = p["w1"].shape[1]
        hid_f = p["w2"].shape[1]
        p_out = _round_up(out_f, 128)
        p_hid = _round_up(hid_f, 128)
        add(_pad2(p["w1"], cur_in, p_out).astype(bf16))
        add(_pad2(p["b1"], 1, p_out).astype(f32))
        add(_pad2(p["a1"], 1, p_out).astype(f32))
        add(_pad2(p["w2"], p_out, p_hid).astype(bf16))
        add(_pad2(p["b2"], 1, p_hid).astype(f32))
        add(_pad2(p["a2"], 1, p_hid).astype(f32))
        add(_pad2(p["w3"], p_hid, p_out).astype(bf16))
        add(_pad2(p["b3"], 1, p_out).astype(f32))
        add(_pad2(p["a3"], 1, p_out).astype(f32))
        widths += [p_out, p_hid]
        cur_in = p_out

    w_out, b_out = params["out"]
    class_num = w_out.shape[1]
    p_cls = _round_up(class_num, 128)
    add(_pad2(w_out, cur_in, p_cls).astype(bf16))
    add(_pad2(b_out, 1, p_cls).astype(f32))
    widths.append(p_cls)

    # --- computed VMEM budget (params x2 buffers + tiles x2 + working set) --
    param_bytes = sum(int(a.size) * a.dtype.itemsize for a in operands[1:])
    in_tile_bytes = tile_b * p_in * 2           # bf16 input tile
    out_tile_bytes = tile_b * p_cls * 4         # f32 output tile
    wmax = max(widths)
    act_bytes = tile_b * wmax * 4 * 6           # generous f32 working set
    vmem_budget = int(1.5 * (2 * param_bytes + 2 * in_tile_bytes
                             + 2 * out_tile_bytes + act_bytes)) + (4 << 20)
    vmem_budget = min(max(vmem_budget, 16 << 20), 40 << 20)

    out = pl.pallas_call(
        fused_model_kernel,
        out_shape=jax.ShapeDtypeStruct((B_pad, p_cls), jnp.float32),
        grid_spec=pltpu.PrefetchScalarGridSpec(
            num_scalar_prefetch=0,
            grid=(B_pad // tile_b,),
            in_specs=in_specs,
            out_specs=pl.BlockSpec((tile_b, p_cls), lambda i: (i, 0)),
        ),
        compiler_params=pltpu.CompilerParams(
            dimension_semantics=("parallel",),
            vmem_limit_bytes=vmem_budget,
        ),
    )(*operands)

    # slice away batch / lane padding; x.view(x.size(0), -1) is a no-op for 2-D
    return out[:B, :class_num]


# ---------------------------------------------------------------------------
# Parameter construction (deterministic, PyTorch-like init, f32 master copy)
# ---------------------------------------------------------------------------
def _init_linear(key, fan_in, fan_out):
    """nn.Linear default init: U(-1/sqrt(fan_in), 1/sqrt(fan_in)).
    W stored transposed to (in, out) so the kernel does x @ W."""
    k_w, k_b = jax.random.split(key)
    bound = 1.0 / jnp.sqrt(jnp.float32(fan_in))
    w = jax.random.uniform(k_w, (fan_in, fan_out), jnp.float32, -bound, bound)
    b = jax.random.uniform(k_b, (1, fan_out), jnp.float32, -bound, bound)
    return w, b


def _init_basic_block(key, in_f, hidden, out_f):
    k1, k2, k3 = jax.random.split(key, 3)
    w1, b1 = _init_linear(k1, in_f, out_f)
    w2, b2 = _init_linear(k2, out_f, hidden)
    w3, b3 = _init_linear(k3, hidden, out_f)
    # nn.PReLU(C) default: per-channel slope 0.25
    return dict(
        w1=w1, b1=b1, a1=jnp.full((1, out_f), 0.25, jnp.float32),
        w2=w2, b2=b2, a2=jnp.full((1, hidden), 0.25, jnp.float32),
        w3=w3, b3=b3, a3=jnp.full((1, out_f), 0.25, jnp.float32),
    )


def init_model(key, in_feature, class_num):
    k1, k2, k3, k4 = jax.random.split(key, 4)
    return dict(
        b1=_init_basic_block(k1, in_feature, 128, 512),
        b2=_init_basic_block(k2, 512, 128, 64),
        b3=_init_basic_block(k3, 64, 128, 32),
        out=_init_linear(k4, 32, class_num),
    )


# ---------------------------------------------------------------------------
# Pure-JAX reference (mirrors the kernel's bf16-matmul / f32-accumulate math)
# ---------------------------------------------------------------------------
def ref_forward(x, params):
    def prelu(y, a):
        return jnp.where(y >= 0, y, a * y)

    def bdot(h, w):
        return jnp.dot(h.astype(jnp.bfloat16), w.astype(jnp.bfloat16),
                       preferred_element_type=jnp.float32)

    h = x
    for blk in ("b1", "b2", "b3"):
        p = params[blk]
        x1 = prelu(bdot(h, p["w1"]) + p["b1"], p["a1"])
        x2 = prelu(bdot(x1, p["w2"]) + p["b2"], p["a2"])
        x3 = prelu(bdot(x2, p["w3"]) + p["b3"], p["a3"])
        h = x3 + x1
    w, b = params["out"]
    return bdot(h, w) + b


# ---------------------------------------------------------------------------
if __name__ == "__main__":
    # Small, TPU-friendly shapes consistent with the module:
    # Model(in_feature=256, class_num=12), batch of 64.
    BATCH, IN_FEATURE, CLASS_NUM = 64, 256, 12

    key = jax.random.PRNGKey(0)
    k_params, k_x = jax.random.split(key)

    params = init_model(k_params, IN_FEATURE, CLASS_NUM)
    x = jax.random.normal(k_x, (BATCH, IN_FEATURE), jnp.float32)

    out = model_forward(x, params)
    out = jax.block_until_ready(out)

    ref = ref_forward(x, params)
    assert out.shape == (BATCH, CLASS_NUM), out.shape
    # bf16 matmuls with f32 accumulation -> loose-ish tolerance
    assert jnp.allclose(out, ref, atol=1e-2, rtol=1e-2), "mismatch vs reference"

    print("KERNEL_OK")
</pallas_src>

<mosaic_0001>
module attributes {stable_mosaic.version = 11 : i64} {
  func.func @fused_model_kernel(%arg0: i32, %arg1: memref<64x256xbf16, #tpu.memory_space<vmem>>, %arg2: memref<256x512xbf16, #tpu.memory_space<vmem>>, %arg3: memref<1x512xf32, #tpu.memory_space<vmem>>, %arg4: memref<1x512xf32, #tpu.memory_space<vmem>>, %arg5: memref<512x128xbf16, #tpu.memory_space<vmem>>, %arg6: memref<1x128xf32, #tpu.memory_space<vmem>>, %arg7: memref<1x128xf32, #tpu.memory_space<vmem>>, %arg8: memref<128x512xbf16, #tpu.memory_space<vmem>>, %arg9: memref<1x512xf32, #tpu.memory_space<vmem>>, %arg10: memref<1x512xf32, #tpu.memory_space<vmem>>, %arg11: memref<512x128xbf16, #tpu.memory_space<vmem>>, %arg12: memref<1x128xf32, #tpu.memory_space<vmem>>, %arg13: memref<1x128xf32, #tpu.memory_space<vmem>>, %arg14: memref<128x128xbf16, #tpu.memory_space<vmem>>, %arg15: memref<1x128xf32, #tpu.memory_space<vmem>>, %arg16: memref<1x128xf32, #tpu.memory_space<vmem>>, %arg17: memref<128x128xbf16, #tpu.memory_space<vmem>>, %arg18: memref<1x128xf32, #tpu.memory_space<vmem>>, %arg19: memref<1x128xf32, #tpu.memory_space<vmem>>, %arg20: memref<128x128xbf16, #tpu.memory_space<vmem>>, %arg21: memref<1x128xf32, #tpu.memory_space<vmem>>, %arg22: memref<1x128xf32, #tpu.memory_space<vmem>>, %arg23: memref<128x128xbf16, #tpu.memory_space<vmem>>, %arg24: memref<1x128xf32, #tpu.memory_space<vmem>>, %arg25: memref<1x128xf32, #tpu.memory_space<vmem>>, %arg26: memref<128x128xbf16, #tpu.memory_space<vmem>>, %arg27: memref<1x128xf32, #tpu.memory_space<vmem>>, %arg28: memref<1x128xf32, #tpu.memory_space<vmem>>, %arg29: memref<128x128xbf16, #tpu.memory_space<vmem>>, %arg30: memref<1x128xf32, #tpu.memory_space<vmem>>, %arg31: memref<64x128xf32, #tpu.memory_space<vmem>>) attributes {dimension_semantics = [#tpu.dimension_semantics<parallel>], iteration_bounds = array<i64: 1>, scalar_prefetch = 0 : i64, scratch_operands = 0 : i64, tpu.core_type = #tpu.core_type<tc>, window_params = [{transform_indices = @transform_0, window_bounds = array<i64: 64, 256>}, {pipeline_mode = #tpu.pipeline_mode<synchronous>, transform_indices = @transform_1, window_bounds = array<i64: 256, 512>}, {pipeline_mode = #tpu.pipeline_mode<synchronous>, transform_indices = @transform_2, window_bounds = array<i64: 1, 512>}, {pipeline_mode = #tpu.pipeline_mode<synchronous>, transform_indices = @transform_3, window_bounds = array<i64: 1, 512>}, {pipeline_mode = #tpu.pipeline_mode<synchronous>, transform_indices = @transform_4, window_bounds = array<i64: 512, 128>}, {pipeline_mode = #tpu.pipeline_mode<synchronous>, transform_indices = @transform_5, window_bounds = array<i64: 1, 128>}, {pipeline_mode = #tpu.pipeline_mode<synchronous>, transform_indices = @transform_6, window_bounds = array<i64: 1, 128>}, {pipeline_mode = #tpu.pipeline_mode<synchronous>, transform_indices = @transform_7, window_bounds = array<i64: 128, 512>}, {pipeline_mode = #tpu.pipeline_mode<synchronous>, transform_indices = @transform_8, window_bounds = array<i64: 1, 512>}, {pipeline_mode = #tpu.pipeline_mode<synchronous>, transform_indices = @transform_9, window_bounds = array<i64: 1, 512>}, {pipeline_mode = #tpu.pipeline_mode<synchronous>, transform_indices = @transform_10, window_bounds = array<i64: 512, 128>}, {pipeline_mode = #tpu.pipeline_mode<synchronous>, transform_indices = @transform_11, window_bounds = array<i64: 1, 128>}, {pipeline_mode = #tpu.pipeline_mode<synchronous>, transform_indices = @transform_12, window_bounds = array<i64: 1, 128>}, {pipeline_mode = #tpu.pipeline_mode<synchronous>, transform_indices = @transform_13, window_bounds = array<i64: 128, 128>}, {pipeline_mode = #tpu.pipeline_mode<synchronous>, transform_indices = @transform_14, window_bounds = array<i64: 1, 128>}, {pipeline_mode = #tpu.pipeline_mode<synchronous>, transform_indices = @transform_15, window_bounds = array<i64: 1, 128>}, {pipeline_mode = #tpu.pipeline_mode<synchronous>, transform_indices = @transform_16, window_bounds = array<i64: 128, 128>}, {pipeline_mode = #tpu.pipeline_mode<synchronous>, transform_indices = @transform_17, window_bounds = array<i64: 1, 128>}, {pipeline_mode = #tpu.pipeline_mode<synchronous>, transform_indices = @transform_18, window_bounds = array<i64: 1, 128>}, {pipeline_mode = #tpu.pipeline_mode<synchronous>, transform_indices = @transform_19, window_bounds = array<i64: 128, 128>}, {pipeline_mode = #tpu.pipeline_mode<synchronous>, transform_indices = @transform_20, window_bounds = array<i64: 1, 128>}, {pipeline_mode = #tpu.pipeline_mode<synchronous>, transform_indices = @transform_21, window_bounds = array<i64: 1, 128>}, {pipeline_mode = #tpu.pipeline_mode<synchronous>, transform_indices = @transform_22, window_bounds = array<i64: 128, 128>}, {pipeline_mode = #tpu.pipeline_mode<synchronous>, transform_indices = @transform_23, window_bounds = array<i64: 1, 128>}, {pipeline_mode = #tpu.pipeline_mode<synchronous>, transform_indices = @transform_24, window_bounds = array<i64: 1, 128>}, {pipeline_mode = #tpu.pipeline_mode<synchronous>, transform_indices = @transform_25, window_bounds = array<i64: 128, 128>}, {pipeline_mode = #tpu.pipeline_mode<synchronous>, transform_indices = @transform_26, window_bounds = array<i64: 1, 128>}, {pipeline_mode = #tpu.pipeline_mode<synchronous>, transform_indices = @transform_27, window_bounds = array<i64: 1, 128>}, {pipeline_mode = #tpu.pipeline_mode<synchronous>, transform_indices = @transform_28, window_bounds = array<i64: 128, 128>}, {pipeline_mode = #tpu.pipeline_mode<synchronous>, transform_indices = @transform_29, window_bounds = array<i64: 1, 128>}, {transform_indices = @transform_30, window_bounds = array<i64: 64, 128>}]} {
    %c0 = arith.constant 0 : index
    %c0_0 = arith.constant 0 : index
    %0 = vector.load %arg1[%c0, %c0_0] : memref<64x256xbf16, #tpu.memory_space<vmem>>, vector<64x256xbf16>
    %c0_1 = arith.constant 0 : index
    %c0_2 = arith.constant 0 : index
    %1 = vector.load %arg2[%c0_1, %c0_2] : memref<256x512xbf16, #tpu.memory_space<vmem>>, vector<256x512xbf16>
    %cst = arith.constant dense<0.000000e+00> : vector<64x512xf32>
    %2 = tpu.matmul %0, %1, %cst {dimension_numbers = #tpu.dot_dimension_numbers<[1], [0], [0], [1], [0, 0, 1, 1], [], []>} : vector<64x256xbf16>, vector<256x512xbf16>, vector<64x512xf32> -> vector<64x512xf32>
    %c0_3 = arith.constant 0 : index
    %c0_4 = arith.constant 0 : index
    %3 = vector.load %arg3[%c0_3, %c0_4] : memref<1x512xf32, #tpu.memory_space<vmem>>, vector<1x512xf32>
    %4 = vector.broadcast %3 : vector<1x512xf32> to vector<64x512xf32>
    %5 = arith.addf %2, %4 : vector<64x512xf32>
    %c0_5 = arith.constant 0 : index
    %c0_6 = arith.constant 0 : index
    %6 = vector.load %arg4[%c0_5, %c0_6] : memref<1x512xf32, #tpu.memory_space<vmem>>, vector<1x512xf32>
    %cst_7 = arith.constant 0.000000e+00 : f32
    %7 = vector.broadcast %cst_7 : f32 to vector<64x512xf32>
    %8 = arith.cmpf oge, %5, %7 : vector<64x512xf32>
    %9 = vector.broadcast %6 : vector<1x512xf32> to vector<64x512xf32>
    %10 = arith.mulf %9, %5 : vector<64x512xf32>
    %11 = arith.select %8, %5, %10 : vector<64x512xi1>, vector<64x512xf32>
    %12 = arith.truncf %11 : vector<64x512xf32> to vector<64x512xbf16>
    %c0_8 = arith.constant 0 : index
    %c0_9 = arith.constant 0 : index
    %13 = vector.load %arg5[%c0_8, %c0_9] : memref<512x128xbf16, #tpu.memory_space<vmem>>, vector<512x128xbf16>
    %cst_10 = arith.constant dense<0.000000e+00> : vector<64x128xf32>
    %14 = tpu.matmul %12, %13, %cst_10 {dimension_numbers = #tpu.dot_dimension_numbers<[1], [0], [0], [1], [0, 0, 1, 1], [], []>} : vector<64x512xbf16>, vector<512x128xbf16>, vector<64x128xf32> -> vector<64x128xf32>
    %c0_11 = arith.constant 0 : index
    %c0_12 = arith.constant 0 : index
    %15 = vector.load %arg6[%c0_11, %c0_12] : memref<1x128xf32, #tpu.memory_space<vmem>>, vector<1x128xf32>
    %16 = vector.broadcast %15 : vector<1x128xf32> to vector<64x128xf32>
    %17 = arith.addf %14, %16 : vector<64x128xf32>
    %c0_13 = arith.constant 0 : index
    %c0_14 = arith.constant 0 : index
    %18 = vector.load %arg7[%c0_13, %c0_14] : memref<1x128xf32, #tpu.memory_space<vmem>>, vector<1x128xf32>
    %cst_15 = arith.constant 0.000000e+00 : f32
    %19 = vector.broadcast %cst_15 : f32 to vector<64x128xf32>
    %20 = arith.cmpf oge, %17, %19 : vector<64x128xf32>
    %21 = vector.broadcast %18 : vector<1x128xf32> to vector<64x128xf32>
    %22 = arith.mulf %21, %17 : vector<64x128xf32>
    %23 = arith.select %20, %17, %22 : vector<64x128xi1>, vector<64x128xf32>
    %24 = arith.truncf %23 : vector<64x128xf32> to vector<64x128xbf16>
    %c0_16 = arith.constant 0 : index
    %c0_17 = arith.constant 0 : index
    %25 = vector.load %arg8[%c0_16, %c0_17] : memref<128x512xbf16, #tpu.memory_space<vmem>>, vector<128x512xbf16>
    %cst_18 = arith.constant dense<0.000000e+00> : vector<64x512xf32>
    %26 = tpu.matmul %24, %25, %cst_18 {dimension_numbers = #tpu.dot_dimension_numbers<[1], [0], [0], [1], [0, 0, 1, 1], [], []>} : vector<64x128xbf16>, vector<128x512xbf16>, vector<64x512xf32> -> vector<64x512xf32>
    %c0_19 = arith.constant 0 : index
    %c0_20 = arith.constant 0 : index
    %27 = vector.load %arg9[%c0_19, %c0_20] : memref<1x512xf32, #tpu.memory_space<vmem>>, vector<1x512xf32>
    %28 = vector.broadcast %27 : vector<1x512xf32> to vector<64x512xf32>
    %29 = arith.addf %26, %28 : vector<64x512xf32>
    %c0_21 = arith.constant 0 : index
    %c0_22 = arith.constant 0 : index
    %30 = vector.load %arg10[%c0_21, %c0_22] : memref<1x512xf32, #tpu.memory_space<vmem>>, vector<1x512xf32>
    %cst_23 = arith.constant 0.000000e+00 : f32
    %31 = vector.broadcast %cst_23 : f32 to vector<64x512xf32>
    %32 = arith.cmpf oge, %29, %31 : vector<64x512xf32>
    %33 = vector.broadcast %30 : vector<1x512xf32> to vector<64x512xf32>
    %34 = arith.mulf %33, %29 : vector<64x512xf32>
    %35 = arith.select %32, %29, %34 : vector<64x512xi1>, vector<64x512xf32>
    %36 = arith.addf %35, %11 : vector<64x512xf32>
    %37 = arith.truncf %36 : vector<64x512xf32> to vector<64x512xbf16>
    %c0_24 = arith.constant 0 : index
    %c0_25 = arith.constant 0 : index
    %38 = vector.load %arg11[%c0_24, %c0_25] : memref<512x128xbf16, #tpu.memory_space<vmem>>, vector<512x128xbf16>
    %cst_26 = arith.constant dense<0.000000e+00> : vector<64x128xf32>
    %39 = tpu.matmul %37, %38, %cst_26 {dimension_numbers = #tpu.dot_dimension_numbers<[1], [0], [0], [1], [0, 0, 1, 1], [], []>} : vector<64x512xbf16>, vector<512x128xbf16>, vector<64x128xf32> -> vector<64x128xf32>
    %c0_27 = arith.constant 0 : index
    %c0_28 = arith.constant 0 : index
    %40 = vector.load %arg12[%c0_27, %c0_28] : memref<1x128xf32, #tpu.memory_space<vmem>>, vector<1x128xf32>
    %41 = vector.broadcast %40 : vector<1x128xf32> to vector<64x128xf32>
    %42 = arith.addf %39, %41 : vector<64x128xf32>
    %c0_29 = arith.constant 0 : index
    %c0_30 = arith.constant 0 : index
    %43 = vector.load %arg13[%c0_29, %c0_30] : memref<1x128xf32, #tpu.memory_space<vmem>>, vector<1x128xf32>
    %cst_31 = arith.constant 0.000000e+00 : f32
    %44 = vector.broadcast %cst_31 : f32 to vector<64x128xf32>
    %45 = arith.cmpf oge, %42, %44 : vector<64x128xf32>
    %46 = vector.broadcast %43 : vector<1x128xf32> to vector<64x128xf32>
    %47 = arith.mulf %46, %42 : vector<64x128xf32>
    %48 = arith.select %45, %42, %47 : vector<64x128xi1>, vector<64x128xf32>
    %49 = arith.truncf %48 : vector<64x128xf32> to vector<64x128xbf16>
    %c0_32 = arith.constant 0 : index
    %c0_33 = arith.constant 0 : index
    %50 = vector.load %arg14[%c0_32, %c0_33] : memref<128x128xbf16, #tpu.memory_space<vmem>>, vector<128x128xbf16>
    %cst_34 = arith.constant dense<0.000000e+00> : vector<64x128xf32>
    %51 = tpu.matmul %49, %50, %cst_34 {dimension_numbers = #tpu.dot_dimension_numbers<[1], [0], [0], [1], [0, 0, 1, 1], [], []>} : vector<64x128xbf16>, vector<128x128xbf16>, vector<64x128xf32> -> vector<64x128xf32>
    %c0_35 = arith.constant 0 : index
    %c0_36 = arith.constant 0 : index
    %52 = vector.load %arg15[%c0_35, %c0_36] : memref<1x128xf32, #tpu.memory_space<vmem>>, vector<1x128xf32>
    %53 = vector.broadcast %52 : vector<1x128xf32> to vector<64x128xf32>
    %54 = arith.addf %51, %53 : vector<64x128xf32>
    %c0_37 = arith.constant 0 : index
    %c0_38 = arith.constant 0 : index
    %55 = vector.load %arg16[%c0_37, %c0_38] : memref<1x128xf32, #tpu.memory_space<vmem>>, vector<1x128xf32>
    %cst_39 = arith.constant 0.000000e+00 : f32
    %56 = vector.broadcast %cst_39 : f32 to vector<64x128xf32>
    %57 = arith.cmpf oge, %54, %56 : vector<64x128xf32>
    %58 = vector.broadcast %55 : vector<1x128xf32> to vector<64x128xf32>
    %59 = arith.mulf %58, %54 : vector<64x128xf32>
    %60 = arith.select %57, %54, %59 : vector<64x128xi1>, vector<64x128xf32>
    %61 = arith.truncf %60 : vector<64x128xf32> to vector<64x128xbf16>
    %c0_40 = arith.constant 0 : index
    %c0_41 = arith.constant 0 : index
    %62 = vector.load %arg17[%c0_40, %c0_41] : memref<128x128xbf16, #tpu.memory_space<vmem>>, vector<128x128xbf16>
    %cst_42 = arith.constant dense<0.000000e+00> : vector<64x128xf32>
    %63 = tpu.matmul %61, %62, %cst_42 {dimension_numbers = #tpu.dot_dimension_numbers<[1], [0], [0], [1], [0, 0, 1, 1], [], []>} : vector<64x128xbf16>, vector<128x128xbf16>, vector<64x128xf32> -> vector<64x128xf32>
    %c0_43 = arith.constant 0 : index
    %c0_44 = arith.constant 0 : index
    %64 = vector.load %arg18[%c0_43, %c0_44] : memref<1x128xf32, #tpu.memory_space<vmem>>, vector<1x128xf32>
    %65 = vector.broadcast %64 : vector<1x128xf32> to vector<64x128xf32>
    %66 = arith.addf %63, %65 : vector<64x128xf32>
    %c0_45 = arith.constant 0 : index
    %c0_46 = arith.constant 0 : index
    %67 = vector.load %arg19[%c0_45, %c0_46] : memref<1x128xf32, #tpu.memory_space<vmem>>, vector<1x128xf32>
    %cst_47 = arith.constant 0.000000e+00 : f32
    %68 = vector.broadcast %cst_47 : f32 to vector<64x128xf32>
    %69 = arith.cmpf oge, %66, %68 : vector<64x128xf32>
    %70 = vector.broadcast %67 : vector<1x128xf32> to vector<64x128xf32>
    %71 = arith.mulf %70, %66 : vector<64x128xf32>
    %72 = arith.select %69, %66, %71 : vector<64x128xi1>, vector<64x128xf32>
    %73 = arith.addf %72, %48 : vector<64x128xf32>
    %74 = arith.truncf %73 : vector<64x128xf32> to vector<64x128xbf16>
    %c0_48 = arith.constant 0 : index
    %c0_49 = arith.constant 0 : index
    %75 = vector.load %arg20[%c0_48, %c0_49] : memref<128x128xbf16, #tpu.memory_space<vmem>>, vector<128x128xbf16>
    %cst_50 = arith.constant dense<0.000000e+00> : vector<64x128xf32>
    %76 = tpu.matmul %74, %75, %cst_50 {dimension_numbers = #tpu.dot_dimension_numbers<[1], [0], [0], [1], [0, 0, 1, 1], [], []>} : vector<64x128xbf16>, vector<128x128xbf16>, vector<64x128xf32> -> vector<64x128xf32>
    %c0_51 = arith.constant 0 : index
    %c0_52 = arith.constant 0 : index
    %77 = vector.load %arg21[%c0_51, %c0_52] : memref<1x128xf32, #tpu.memory_space<vmem>>, vector<1x128xf32>
    %78 = vector.broadcast %77 : vector<1x128xf32> to vector<64x128xf32>
    %79 = arith.addf %76, %78 : vector<64x128xf32>
    %c0_53 = arith.constant 0 : index
    %c0_54 = arith.constant 0 : index
    %80 = vector.load %arg22[%c0_53, %c0_54] : memref<1x128xf32, #tpu.memory_space<vmem>>, vector<1x128xf32>
    %cst_55 = arith.constant 0.000000e+00 : f32
    %81 = vector.broadcast %cst_55 : f32 to vector<64x128xf32>
    %82 = arith.cmpf oge, %79, %81 : vector<64x128xf32>
    %83 = vector.broadcast %80 : vector<1x128xf32> to vector<64x128xf32>
    %84 = arith.mulf %83, %79 : vector<64x128xf32>
    %85 = arith.select %82, %79, %84 : vector<64x128xi1>, vector<64x128xf32>
    %86 = arith.truncf %85 : vector<64x128xf32> to vector<64x128xbf16>
    %c0_56 = arith.constant 0 : index
    %c0_57 = arith.constant 0 : index
    %87 = vector.load %arg23[%c0_56, %c0_57] : memref<128x128xbf16, #tpu.memory_space<vmem>>, vector<128x128xbf16>
    %cst_58 = arith.constant dense<0.000000e+00> : vector<64x128xf32>
    %88 = tpu.matmul %86, %87, %cst_58 {dimension_numbers = #tpu.dot_dimension_numbers<[1], [0], [0], [1], [0, 0, 1, 1], [], []>} : vector<64x128xbf16>, vector<128x128xbf16>, vector<64x128xf32> -> vector<64x128xf32>
    %c0_59 = arith.constant 0 : index
    %c0_60 = arith.constant 0 : index
    %89 = vector.load %arg24[%c0_59, %c0_60] : memref<1x128xf32, #tpu.memory_space<vmem>>, vector<1x128xf32>
    %90 = vector.broadcast %89 : vector<1x128xf32> to vector<64x128xf32>
    %91 = arith.addf %88, %90 : vector<64x128xf32>
    %c0_61 = arith.constant 0 : index
    %c0_62 = arith.constant 0 : index
    %92 = vector.load %arg25[%c0_61, %c0_62] : memref<1x128xf32, #tpu.memory_space<vmem>>, vector<1x128xf32>
    %cst_63 = arith.constant 0.000000e+00 : f32
    %93 = vector.broadcast %cst_63 : f32 to vector<64x128xf32>
    %94 = arith.cmpf oge, %91, %93 : vector<64x128xf32>
    %95 = vector.broadcast %92 : vector<1x128xf32> to vector<64x128xf32>
    %96 = arith.mulf %95, %91 : vector<64x128xf32>
    %97 = arith.select %94, %91, %96 : vector<64x128xi1>, vector<64x128xf32>
    %98 = arith.truncf %97 : vector<64x128xf32> to vector<64x128xbf16>
    %c0_64 = arith.constant 0 : index
    %c0_65 = arith.constant 0 : index
    %99 = vector.load %arg26[%c0_64, %c0_65] : memref<128x128xbf16, #tpu.memory_space<vmem>>, vector<128x128xbf16>
    %cst_66 = arith.constant dense<0.000000e+00> : vector<64x128xf32>
    %100 = tpu.matmul %98, %99, %cst_66 {dimension_numbers = #tpu.dot_dimension_numbers<[1], [0], [0], [1], [0, 0, 1, 1], [], []>} : vector<64x128xbf16>, vector<128x128xbf16>, vector<64x128xf32> -> vector<64x128xf32>
    %c0_67 = arith.constant 0 : index
    %c0_68 = arith.constant 0 : index
    %101 = vector.load %arg27[%c0_67, %c0_68] : memref<1x128xf32, #tpu.memory_space<vmem>>, vector<1x128xf32>
    %102 = vector.broadcast %101 : vector<1x128xf32> to vector<64x128xf32>
    %103 = arith.addf %100, %102 : vector<64x128xf32>
    %c0_69 = arith.constant 0 : index
    %c0_70 = arith.constant 0 : index
    %104 = vector.load %arg28[%c0_69, %c0_70] : memref<1x128xf32, #tpu.memory_space<vmem>>, vector<1x128xf32>
    %cst_71 = arith.constant 0.000000e+00 : f32
    %105 = vector.broadcast %cst_71 : f32 to vector<64x128xf32>
    %106 = arith.cmpf oge, %103, %105 : vector<64x128xf32>
    %107 = vector.broadcast %104 : vector<1x128xf32> to vector<64x128xf32>
    %108 = arith.mulf %107, %103 : vector<64x128xf32>
    %109 = arith.select %106, %103, %108 : vector<64x128xi1>, vector<64x128xf32>
    %110 = arith.addf %109, %85 : vector<64x128xf32>
    %111 = arith.truncf %110 : vector<64x128xf32> to vector<64x128xbf16>
    %c0_72 = arith.constant 0 : index
    %c0_73 = arith.constant 0 : index
    %112 = vector.load %arg29[%c0_72, %c0_73] : memref<128x128xbf16, #tpu.memory_space<vmem>>, vector<128x128xbf16>
    %cst_74 = arith.constant dense<0.000000e+00> : vector<64x128xf32>
    %113 = tpu.matmul %111, %112, %cst_74 {dimension_numbers = #tpu.dot_dimension_numbers<[1], [0], [0], [1], [0, 0, 1, 1], [], []>} : vector<64x128xbf16>, vector<128x128xbf16>, vector<64x128xf32> -> vector<64x128xf32>
    %c0_75 = arith.constant 0 : index
    %c0_76 = arith.constant 0 : index
    %114 = vector.load %arg30[%c0_75, %c0_76] : memref<1x128xf32, #tpu.memory_space<vmem>>, vector<1x128xf32>
    %115 = vector.broadcast %114 : vector<1x128xf32> to vector<64x128xf32>
    %116 = arith.addf %113, %115 : vector<64x128xf32>
    %c0_77 = arith.constant 0 : index
    %c0_78 = arith.constant 0 : index
    %117 = vector.load %arg31[%c0_77, %c0_78] : memref<64x128xf32, #tpu.memory_space<vmem>>, vector<64x128xf32>
    tpu.vector_store %arg31[%c0_77, %c0_78], %116 {strides = array<i32>} : memref<64x128xf32, #tpu.memory_space<vmem>>, vector<64x128xf32>,
    return
  }
  func.func @transform_0(%arg0: i32) -> (i32, i32) {
    %c0_i32 = arith.constant 0 : i32
    %c0_i32_0 = arith.constant 0 : i32
    return %arg0, %c0_i32 : i32, i32
  }
  func.func @transform_1(%arg0: i32) -> (i32, i32) {
    %c0_i32 = arith.constant 0 : i32
    %c0_i32_0 = arith.constant 0 : i32
    %c0_i32_1 = arith.constant 0 : i32
    return %c0_i32, %c0_i32_0 : i32, i32
  }
  func.func @transform_2(%arg0: i32) -> (i32, i32) {
    %c0_i32 = arith.constant 0 : i32
    %c0_i32_0 = arith.constant 0 : i32
    %c0_i32_1 = arith.constant 0 : i32
    return %c0_i32, %c0_i32_0 : i32, i32
  }
  func.func @transform_3(%arg0: i32) -> (i32, i32) {
    %c0_i32 = arith.constant 0 : i32
    %c0_i32_0 = arith.constant 0 : i32
    %c0_i32_1 = arith.constant 0 : i32
    return %c0_i32, %c0_i32_0 : i32, i32
  }
  func.func @transform_4(%arg0: i32) -> (i32, i32) {
    %c0_i32 = arith.constant 0 : i32
    %c0_i32_0 = arith.constant 0 : i32
    %c0_i32_1 = arith.constant 0 : i32
    return %c0_i32, %c0_i32_0 : i32, i32
  }
  func.func @transform_5(%arg0: i32) -> (i32, i32) {
    %c0_i32 = arith.constant 0 : i32
    %c0_i32_0 = arith.constant 0 : i32
    %c0_i32_1 = arith.constant 0 : i32
    return %c0_i32, %c0_i32_0 : i32, i32
  }
  func.func @transform_6(%arg0: i32) -> (i32, i32) {
    %c0_i32 = arith.constant 0 : i32
    %c0_i32_0 = arith.constant 0 : i32
    %c0_i32_1 = arith.constant 0 : i32
    return %c0_i32, %c0_i32_0 : i32, i32
  }
  func.func @transform_7(%arg0: i32) -> (i32, i32) {
    %c0_i32 = arith.constant 0 : i32
    %c0_i32_0 = arith.constant 0 : i32
    %c0_i32_1 = arith.constant 0 : i32
    return %c0_i32, %c0_i32_0 : i32, i32
  }
  func.func @transform_8(%arg0: i32) -> (i32, i32) {
    %c0_i32 = arith.constant 0 : i32
    %c0_i32_0 = arith.constant 0 : i32
    %c0_i32_1 = arith.constant 0 : i32
    return %c0_i32, %c0_i32_0 : i32, i32
  }
  func.func @transform_9(%arg0: i32) -> (i32, i32) {
    %c0_i32 = arith.constant 0 : i32
    %c0_i32_0 = arith.constant 0 : i32
    %c0_i32_1 = arith.constant 0 : i32
    return %c0_i32, %c0_i32_0 : i32, i32
  }
  func.func @transform_10(%arg0: i32) -> (i32, i32) {
    %c0_i32 = arith.constant 0 : i32
    %c0_i32_0 = arith.constant 0 : i32
    %c0_i32_1 = arith.constant 0 : i32
    return %c0_i32, %c0_i32_0 : i32, i32
  }
  func.func @transform_11(%arg0: i32) -> (i32, i32) {
    %c0_i32 = arith.constant 0 : i32
    %c0_i32_0 = arith.constant 0 : i32
    %c0_i32_1 = arith.constant 0 : i32
    return %c0_i32, %c0_i32_0 : i32, i32
  }
  func.func @transform_12(%arg0: i32) -> (i32, i32) {
    %c0_i32 = arith.constant 0 : i32
    %c0_i32_0 = arith.constant 0 : i32
    %c0_i32_1 = arith.constant 0 : i32
    return %c0_i32, %c0_i32_0 : i32, i32
  }
  func.func @transform_13(%arg0: i32) -> (i32, i32) {
    %c0_i32 = arith.constant 0 : i32
    %c0_i32_0 = arith.constant 0 : i32
    %c0_i32_1 = arith.constant 0 : i32
    return %c0_i32, %c0_i32_0 : i32, i32
  }
  func.func @transform_14(%arg0: i32) -> (i32, i32) {
    %c0_i32 = arith.constant 0 : i32
    %c0_i32_0 = arith.constant 0 : i32
    %c0_i32_1 = arith.constant 0 : i32
    return %c0_i32, %c0_i32_0 : i32, i32
  }
  func.func @transform_15(%arg0: i32) -> (i32, i32) {
    %c0_i32 = arith.constant 0 : i32
    %c0_i32_0 = arith.constant 0 : i32
    %c0_i32_1 = arith.constant 0 : i32
    return %c0_i32, %c0_i32_0 : i32, i32
  }
  func.func @transform_16(%arg0: i32) -> (i32, i32) {
    %c0_i32 = arith.constant 0 : i32
    %c0_i32_0 = arith.constant 0 : i32
    %c0_i32_1 = arith.constant 0 : i32
    return %c0_i32, %c0_i32_0 : i32, i32
  }
  func.func @transform_17(%arg0: i32) -> (i32, i32) {
    %c0_i32 = arith.constant 0 : i32
    %c0_i32_0 = arith.constant 0 : i32
    %c0_i32_1 = arith.constant 0 : i32
    return %c0_i32, %c0_i32_0 : i32, i32
  }
  func.func @transform_18(%arg0: i32) -> (i32, i32) {
    %c0_i32 = arith.constant 0 : i32
    %c0_i32_0 = arith.constant 0 : i32
    %c0_i32_1 = arith.constant 0 : i32
    return %c0_i32, %c0_i32_0 : i32, i32
  }
  func.func @transform_19(%arg0: i32) -> (i32, i32) {
    %c0_i32 = arith.constant 0 : i32
    %c0_i32_0 = arith.constant 0 : i32
    %c0_i32_1 = arith.constant 0 : i32
    return %c0_i32, %c0_i32_0 : i32, i32
  }
  func.func @transform_20(%arg0: i32) -> (i32, i32) {
    %c0_i32 = arith.constant 0 : i32
    %c0_i32_0 = arith.constant 0 : i32
    %c0_i32_1 = arith.constant 0 : i32
    return %c0_i32, %c0_i32_0 : i32, i32
  }
  func.func @transform_21(%arg0: i32) -> (i32, i32) {
    %c0_i32 = arith.constant 0 : i32
    %c0_i32_0 = arith.constant 0 : i32
    %c0_i32_1 = arith.constant 0 : i32
    return %c0_i32, %c0_i32_0 : i32, i32
  }
  func.func @transform_22(%arg0: i32) -> (i32, i32) {
    %c0_i32 = arith.constant 0 : i32
    %c0_i32_0 = arith.constant 0 : i32
    %c0_i32_1 = arith.constant 0 : i32
    return %c0_i32, %c0_i32_0 : i32, i32
  }
  func.func @transform_23(%arg0: i32) -> (i32, i32) {
    %c0_i32 = arith.constant 0 : i32
    %c0_i32_0 = arith.constant 0 : i32
    %c0_i32_1 = arith.constant 0 : i32
    return %c0_i32, %c0_i32_0 : i32, i32
  }
  func.func @transform_24(%arg0: i32) -> (i32, i32) {
    %c0_i32 = arith.constant 0 : i32
    %c0_i32_0 = arith.constant 0 : i32
    %c0_i32_1 = arith.constant 0 : i32
    return %c0_i32, %c0_i32_0 : i32, i32
  }
  func.func @transform_25(%arg0: i32) -> (i32, i32) {
    %c0_i32 = arith.constant 0 : i32
    %c0_i32_0 = arith.constant 0 : i32
    %c0_i32_1 = arith.constant 0 : i32
    return %c0_i32, %c0_i32_0 : i32, i32
  }
  func.func @transform_26(%arg0: i32) -> (i32, i32) {
    %c0_i32 = arith.constant 0 : i32
    %c0_i32_0 = arith.constant 0 : i32
    %c0_i32_1 = arith.constant 0 : i32
    return %c0_i32, %c0_i32_0 : i32, i32
  }
  func.func @transform_27(%arg0: i32) -> (i32, i32) {
    %c0_i32 = arith.constant 0 : i32
    %c0_i32_0 = arith.constant 0 : i32
    %c0_i32_1 = arith.constant 0 : i32
    return %c0_i32, %c0_i32_0 : i32, i32
  }
  func.func @transform_28(%arg0: i32) -> (i32, i32) {
    %c0_i32 = arith.constant 0 : i32
    %c0_i32_0 = arith.constant 0 : i32
    %c0_i32_1 = arith.constant 0 : i32
    return %c0_i32, %c0_i32_0 : i32, i32
  }
  func.func @transform_29(%arg0: i32) -> (i32, i32) {
    %c0_i32 = arith.constant 0 : i32
    %c0_i32_0 = arith.constant 0 : i32
    %c0_i32_1 = arith.constant 0 : i32
    return %c0_i32, %c0_i32_0 : i32, i32
  }
  func.func @transform_30(%arg0: i32) -> (i32, i32) {
    %c0_i32 = arith.constant 0 : i32
    %c0_i32_0 = arith.constant 0 : i32
    return %arg0, %c0_i32 : i32, i32
  }
}

</mosaic_0001>

<bundles_post_ra>
// kernel: model_forward.1
= control target key start
LH: loop header
LB: loop body
LE: loop exit
PB: predicated region body
PF: predicated region fallthrough
CT: control target
= control target key end

     0   :  { %s4151_s3 = smov 1   ;;  %s4152_s10 = smov 4   ;;  %s5130_s0 = inlined_call_operand.smem [shape: u32[31], index: -1, kind: input, shape index: {}] }
   0x1   :  { %s4189_s6 = sld [smem:[%s5130_s0 + %s4151_s3]]   ;;  %s4153_s14 = smov 2  }
   0x2   :  { %s4218_s9 = sld [smem:[%s5130_s0]]   ;;  %s4154_s18 = smov 3  }
   0x3   :  { %s4379_s13 = sld [smem:[%s5130_s0 + %s4152_s10]]   ;;  %s4155_s22 = smov 5  }
   0x4   :  { %s2981_s17 = sld [smem:[%s5130_s0 + %s4153_s14]]   ;;  %s4156_s26 = smov 6  }
   0x5   :  { %s2982_s21 = sld [smem:[%s5130_s0 + %s4154_s18]]   ;;  %s4157_s30 = smov 7  }
   0x6   :  { %s4451_s25 = sld [smem:[%s5130_s0 + %s4155_s22]]   ;;  %s4158_s4 = smov 10  }
   0x7   :  { %v3156_v0 = vld [vmem:[%s4189_s6 + $0xe0] sm:$0xf]  ;;  %v3912_v1 = vld [vmem:[%s4189_s6 + $0xec] sm:$0xf0]  ;;  %v3910_v50 = vld [vmem:[%s4189_s6 + $0xe4] sm:$0xf]  ;;  %s4595_s29 = sld [smem:[%s5130_s0 + %s4156_s26]]  }
   0x8   :  { %v3284_v2 = vld [vmem:[%s4189_s6 + $0x1e0] sm:$0xf]  ;;  %v3157_v3 = vor.u32 %v3912_v1, %v3156_v0  ;;  %v3944_v4 = vld [vmem:[%s4189_s6 + $0x1ec] sm:$0xf0]  ;;  %v3875_v47 = vld [vmem:[%s4218_s9 + $0x4] sm:$0xf0]  ;;  %s4618_s3 = sld [smem:[%s5130_s0 + %s4157_s30]]  }
   0x9   :  { %v3140_v5 = vld [vmem:[%s4189_s6 + $0xc0] sm:$0xf]  ;;  %v3908_v6 = vld [vmem:[%s4189_s6 + $0xcc] sm:$0xf0]  ;;  %v3285_v7 = vor.u32 %v3944_v4, %v3284_v2  ;;  %v3879_v49 = vld [vmem:[%s4218_s9 + $0x24] sm:$0xf0]  ;;  %s4706_s7 = sld [smem:[%s5130_s0 + %s4158_s4]]  }
   0xa   :  { %v3268_v8 = vld [vmem:[%s4189_s6 + $0x1c0] sm:$0xf]  ;;  %v3940_v9 = vld [vmem:[%s4189_s6 + $0x1cc] sm:$0xf0]  ;;  %568 = vmatpush.bf16.msra.mxu0 %v3157_v3  ;;  %4090 = vmatpush.bf16.msra.mxu2 %v3157_v3  ;;  %v3141_v10 = vor.u32 %v3908_v6, %v3140_v5  ;;  %v3158_v51 = vld [vmem:[%s4189_s6 + $0xf0] sm:$0xf0] }
   0xb   :  { %4098 = vmatpush.bf16.msra.mxu3 %v3285_v7  ;;  %597 = vmatpush.bf16.msra.mxu1 %v3285_v7  ;;  %v3269_v11 = vor.u32 %v3940_v9, %v3268_v8  ;;  %v3124_v12 = vld [vmem:[%s4189_s6 + $0xa0] sm:$0xf]  ;;  %v3904_v13 = vld [vmem:[%s4189_s6 + $0xac] sm:$0xf0]  ;;  %v3942_v52 = vld [vmem:[%s4189_s6 + $0x1e4] sm:$0xf]  ;;  %v3161_v62 = vor.u32 %v3910_v50, %v3158_v51 }
   0xc   :  { %v3252_v14 = vld [vmem:[%s4189_s6 + $0x1a0] sm:$0xf]  ;;  %v3936_v15 = vld [vmem:[%s4189_s6 + $0x1ac] sm:$0xf0]  ;;  %v3125_v16 = vor.u32 %v3904_v13, %v3124_v12  ;;  %v3286_v53 = vld [vmem:[%s4189_s6 + $0x1f0] sm:$0xf0] }
   0xd   :  { %v3253_v17 = vor.u32 %v3936_v15, %v3252_v14  ;;  %v3108_v18 = vld [vmem:[%s4189_s6 + $0x80] sm:$0xf]  ;;  %v3900_v19 = vld [vmem:[%s4189_s6 + $0x8c] sm:$0xf0]  ;;  %v3878_v55 = vld [vmem:[%s4218_s9 + $0x24] sm:$0xf]  ;;  %v3289_v63 = vor.u32 %v3942_v52, %v3286_v53 }
   0xe   :  { %569 = vmatpush.bf16.msra.mxu0 %v3141_v10  ;;  %4091 = vmatpush.bf16.msra.mxu2 %v3141_v10  ;;  %v3236_v20 = vld [vmem:[%s4189_s6 + $0x180] sm:$0xf]  ;;  %v3932_v21 = vld [vmem:[%s4189_s6 + $0x18c] sm:$0xf0]  ;;  %v3109_v22 = vor.u32 %v3900_v19, %v3108_v18  ;;  %v3030_v56 = vld [vmem:[%s4218_s9 + $0x28] sm:$0xf0] }
   0xf   :  { %4099 = vmatpush.bf16.msra.mxu3 %v3269_v11  ;;  %598 = vmatpush.bf16.msra.mxu1 %v3269_v11  ;;  %v3237_v23 = vor.u32 %v3932_v21, %v3236_v20  ;;  %v3092_v24 = vld [vmem:[%s4189_s6 + $0x60] sm:$0xf]  ;;  %v3896_v25 = vld [vmem:[%s4189_s6 + $0x6c] sm:$0xf0]  ;;  %v3874_v57 = vld [vmem:[%s4218_s9 + $0x4] sm:$0xf]  ;;  %v4252_v8 = vor.u32 %v3878_v55, %v3030_v56 }
  0x10   :  { %v3220_v26 = vld [vmem:[%s4189_s6 + $0x160] sm:$0xf]  ;;  %v3928_v27 = vld [vmem:[%s4189_s6 + $0x16c] sm:$0xf0]  ;;  %v3093_v28 = vor.u32 %v3896_v25, %v3092_v24  ;;  %v3014_v59 = vld [vmem:[%s4218_s9 + $0x8] sm:$0xf0] }
  0x11   :  { %v3221_v29 = vor.u32 %v3928_v27, %v3220_v26  ;;  %v3076_v30 = vld [vmem:[%s4189_s6 + $0x40] sm:$0xf]  ;;  %v3892_v31 = vld [vmem:[%s4189_s6 + $0x4c] sm:$0xf0]  ;;  %v3164_v60 = vld [vmem:[%s4189_s6 + $0xe8] sm:$0xf]  ;;  %v4254_v9 = vor.u32 %v3874_v57, %v3014_v59 }
  0x12   :  { %570 = vmatpush.bf16.msra.mxu0 %v3125_v16  ;;  %4092 = vmatpush.bf16.msra.mxu2 %v3125_v16  ;;  %v3204_v32 = vld [vmem:[%s4189_s6 + $0x140] sm:$0xf]  ;;  %v3924_v33 = vld [vmem:[%s4189_s6 + $0x14c] sm:$0xf0]  ;;  %v3077_v34 = vor.u32 %v3892_v31, %v3076_v30  ;;  %v3913_v61 = vld [vmem:[%s4189_s6 + $0xf4] sm:$0xf0] }
  0x13   :  { %4100 = vmatpush.bf16.msra.mxu3 %v3253_v17  ;;  %599 = vmatpush.bf16.msra.mxu1 %v3253_v17  ;;  %v3205_v35 = vor.u32 %v3924_v33, %v3204_v32  ;;  %v3060_v36 = vld [vmem:[%s4189_s6 + $0x20] sm:$0xf]  ;;  %v3888_v37 = vld [vmem:[%s4189_s6 + $0x2c] sm:$0xf0]  ;;  %v3906_v0 = vld [vmem:[%s4189_s6 + $0xc4] sm:$0xf]  ;;  %v3165_v10 = vor.u32 %v3913_v61, %v3164_v60 }
  0x14   :  { %v3188_v38 = vld [vmem:[%s4189_s6 + $0x120] sm:$0xf]  ;;  %v3920_v39 = vld [vmem:[%s4189_s6 + $0x12c] sm:$0xf0]  ;;  %v3061_v40 = vor.u32 %v3888_v37, %v3060_v36  ;;  %v3292_v1 = vld [vmem:[%s4189_s6 + $0x1e8] sm:$0xf] }
  0x15   :  { %v3044_v41 = vld [vmem:[%s4189_s6] sm:$0xf]  ;;  %v3189_v42 = vor.u32 %v3920_v39, %v3188_v38  ;;  %v3884_v43 = vld [vmem:[%s4189_s6 + $0xc] sm:$0xf0]  ;;  %v3945_v2 = vld [vmem:[%s4189_s6 + $0x1f4] sm:$0xf0] }
  0x16   :  { %571 = vmatpush.bf16.msra.mxu0 %v3109_v22  ;;  %4093 = vmatpush.bf16.msra.mxu2 %v3109_v22  ;;  %v3172_v44 = vld [vmem:[%s4189_s6 + $0x100] sm:$0xf]  ;;  %v3916_v45 = vld [vmem:[%s4189_s6 + $0x10c] sm:$0xf0]  ;;  %v3045_v54 = vor.u32 %v3884_v43, %v3044_v41  ;;  %v3142_v5 = vld [vmem:[%s4189_s6 + $0xd0] sm:$0xf0]  ;;  %v3293_v11 = vor.u32 %v3945_v2, %v3292_v1 }
  0x17   :  { %4101 = vmatpush.bf16.msra.mxu3 %v3237_v23  ;;  %600 = vmatpush.bf16.msra.mxu1 %v3237_v23  ;;  %v3012_v46 = vld [vmem:[%s4218_s9] sm:$0xf]  ;;  %v3173_v58 = vor.u32 %v3916_v45, %v3172_v44  ;;  %v3938_v6 = vld [vmem:[%s4189_s6 + $0x1c4] sm:$0xf]  ;;  %v3270_v7 = vld [vmem:[%s4189_s6 + $0x1d0] sm:$0xf0]  ;;  %v3145_v14 = vor.u32 %v3906_v0, %v3142_v5 }
  0x18   :  { %v3028_v48 = vld [vmem:[%s4218_s9 + $0x20] sm:$0xf]  ;;  %v4245_v3 = vor.u32 %v3875_v47, %v3012_v46  ;;  %v3148_v12 = vld [vmem:[%s4189_s6 + $0xc8] sm:$0xf]  ;;  %v3909_v13 = vld [vmem:[%s4189_s6 + $0xd4] sm:$0xf0]  ;;  %v3273_v15 = vor.u32 %v3938_v6, %v3270_v7 }
  0x19   :  { %v4247_v4 = vor.u32 %v3879_v49, %v3028_v48  ;;  %v3902_v16 = vld [vmem:[%s4189_s6 + $0xa4] sm:$0xf]  ;;  %v3276_v17 = vld [vmem:[%s4189_s6 + $0x1c8] sm:$0xf]  ;;  %v3941_v18 = vld [vmem:[%s4189_s6 + $0x1d4] sm:$0xf0]  ;;  %v3149_v22 = vor.u32 %v3909_v13, %v3148_v12 }
  0x1a   :  { %572 = vmatpush.bf16.msra.mxu0 %v3093_v28  ;;  %4094 = vmatpush.bf16.msra.mxu2 %v3093_v28  ;;  %v3126_v19 = vld [vmem:[%s4189_s6 + $0xb0] sm:$0xf0]  ;;  %v3934_v20 = vld [vmem:[%s4189_s6 + $0x1a4] sm:$0xf]  ;;  %v3277_v23 = vor.u32 %v3941_v18, %v3276_v17  ;;  %v3132_v24 = vld [vmem:[%s4189_s6 + $0xa8] sm:$0xf] }
  0x1b   :  { %4102 = vmatpush.bf16.msra.mxu3 %v3221_v29  ;;  %601 = vmatpush.bf16.msra.mxu1 %v3221_v29  ;;  %v3254_v21 = vld [vmem:[%s4189_s6 + $0x1b0] sm:$0xf0]  ;;  %v3905_v25 = vld [vmem:[%s4189_s6 + $0xb4] sm:$0xf0]  ;;  %v3129_v26 = vor.u32 %v3902_v16, %v3126_v19  ;;  %v3898_v28 = vld [vmem:[%s4189_s6 + $0x84] sm:$0xf] }
  0x1c   :  { %v3257_v27 = vor.u32 %v3934_v20, %v3254_v21  ;;  %v3260_v29 = vld [vmem:[%s4189_s6 + $0x1a8] sm:$0xf]  ;;  %v3937_v30 = vld [vmem:[%s4189_s6 + $0x1b4] sm:$0xf0]  ;;  %v3110_v31 = vld [vmem:[%s4189_s6 + $0x90] sm:$0xf0] }
  0x1d   :  { %v3930_v32 = vld [vmem:[%s4189_s6 + $0x184] sm:$0xf]  ;;  %v3238_v33 = vld [vmem:[%s4189_s6 + $0x190] sm:$0xf0]  ;;  %v3116_v36 = vld [vmem:[%s4189_s6 + $0x88] sm:$0xf]  ;;  %v3113_v38 = vor.u32 %v3898_v28, %v3110_v31 }
  0x1e   :  { %573 = vmatpush.bf16.msra.mxu0 %v3077_v34  ;;  %4095 = vmatpush.bf16.msra.mxu2 %v3077_v34  ;;  %v3133_v34 = vor.u32 %v3905_v25, %v3132_v24  ;;  %v3901_v37 = vld [vmem:[%s4189_s6 + $0x94] sm:$0xf0]  ;;  %v3241_v39 = vor.u32 %v3930_v32, %v3238_v33  ;;  %v3894_v44 = vld [vmem:[%s4189_s6 + $0x64] sm:$0xf]  ;;  %v3244_v45 = vld [vmem:[%s4189_s6 + $0x188] sm:$0xf] }
  0x1f   :  { %4103 = vmatpush.bf16.msra.mxu3 %v3205_v35  ;;  %602 = vmatpush.bf16.msra.mxu1 %v3205_v35  ;;  %v3261_v35 = vor.u32 %v3937_v30, %v3260_v29  ;;  %v3877_v41 = vld [vmem:[%s4218_s9 + $0x14] sm:$0xf0]  ;;  %v3094_v47 = vld [vmem:[%s4189_s6 + $0x70] sm:$0xf0]  ;;  %v3926_v48 = vld [vmem:[%s4189_s6 + $0x164] sm:$0xf]  ;;  %v3117_v53 = vor.u32 %v3901_v37, %v3116_v36 }
  0x20   :  { %v3881_v43 = vld [vmem:[%s4218_s9 + $0x34] sm:$0xf0]  ;;  %v3222_v49 = vld [vmem:[%s4189_s6 + $0x170] sm:$0xf0]  ;;  %v3038_v51 = vld [vmem:[%s4218_s9 + $0x38] sm:$0xf0] }
  0x21   :  { %v3933_v46 = vld [vmem:[%s4189_s6 + $0x194] sm:$0xf0]  ;;  %v3880_v50 = vld [vmem:[%s4218_s9 + $0x34] sm:$0xf]  ;;  %v3022_v55 = vld [vmem:[%s4218_s9 + $0x18] sm:$0xf0]  ;;  %v3225_v59 = vor.u32 %v3926_v48, %v3222_v49 }
  0x22   :  { %574 = vmatpush.bf16.msra.mxu0 %v3061_v40  ;;  %4096 = vmatpush.bf16.msra.mxu2 %v3061_v40  ;;  %v3020_v40 = vld [vmem:[%s4218_s9 + $0x10] sm:$0xf]  ;;  %v3876_v52 = vld [vmem:[%s4218_s9 + $0x14] sm:$0xf]  ;;  %v3100_v56 = vld [vmem:[%s4189_s6 + $0x68] sm:$0xf]  ;;  %v4304_v6 = vor.u32 %v3880_v50, %v3038_v51 }
  0x23   :  { %4104 = vmatpush.bf16.msra.mxu3 %v3189_v42  ;;  %603 = vmatpush.bf16.msra.mxu1 %v3189_v42  ;;  %v3036_v42 = vld [vmem:[%s4218_s9 + $0x30] sm:$0xf]  ;;  %v3897_v57 = vld [vmem:[%s4189_s6 + $0x74] sm:$0xf0]  ;;  %v3890_v60 = vld [vmem:[%s4189_s6 + $0x44] sm:$0xf]  ;;  %v4306_v7 = vor.u32 %v3876_v52, %v3022_v55 }
  0x24   :  { %v3228_v61 = vld [vmem:[%s4189_s6 + $0x168] sm:$0xf]  ;;  %v4299_v0 = vor.u32 %v3881_v43, %v3036_v42  ;;  %v3078_v1 = vld [vmem:[%s4189_s6 + $0x50] sm:$0xf0]  ;;  %v3922_v2 = vld [vmem:[%s4189_s6 + $0x144] sm:$0xf] }
  0x25   :  { %v3206_v5 = vld [vmem:[%s4189_s6 + $0x150] sm:$0xf0]  ;;  %v3084_v12 = vld [vmem:[%s4189_s6 + $0x48] sm:$0xf]  ;;  %v3893_v13 = vld [vmem:[%s4189_s6 + $0x54] sm:$0xf0] }
  0x26   :  { %575 = vmatpush.bf16.msra.mxu0 %v3045_v54  ;;  %4097 = vmatpush.bf16.msra.mxu2 %v3045_v54  ;;  %v3245_v54 = vor.u32 %v3933_v46, %v3244_v45  ;;  %v3886_v16 = vld [vmem:[%s4189_s6 + $0x24] sm:$0xf]  ;;  %v3212_v17 = vld [vmem:[%s4189_s6 + $0x148] sm:$0xf]  ;;  %v3925_v18 = vld [vmem:[%s4189_s6 + $0x154] sm:$0xf0] }
  0x27   :  { %4105 = vmatpush.bf16.msra.mxu3 %v3173_v58  ;;  %604 = vmatpush.bf16.msra.mxu1 %v3173_v58  ;;  %v3097_v58 = vor.u32 %v3894_v44, %v3094_v47  ;;  %v3062_v19 = vld [vmem:[%s4189_s6 + $0x30] sm:$0xf0]  ;;  %v3918_v20 = vld [vmem:[%s4189_s6 + $0x124] sm:$0xf]  ;;  %v3068_v24 = vld [vmem:[%s4189_s6 + $0x28] sm:$0xf] }
  0x28   :  { %v3190_v21 = vld [vmem:[%s4189_s6 + $0x130] sm:$0xf0]  ;;  %v3889_v25 = vld [vmem:[%s4189_s6 + $0x34] sm:$0xf0]  ;;  %v3196_v30 = vld [vmem:[%s4189_s6 + $0x128] sm:$0xf] }
  0x29   :  { %576 = vmatmul.bf16.vlgmr.msra.gmra.mxu0 %v4245_v3  ;;  %586 = vmatmul.bf16.vlgmr.msra.gmra.mxu2 %v4247_v4  ;;  %v3193_v28 = vor.u32 %v3918_v20, %v3190_v21  ;;  %v3046_v29 = vld [vmem:[%s4189_s6 + $0x10] sm:$0xf0]  ;;  %v3921_v31 = vld [vmem:[%s4189_s6 + $0x134] sm:$0xf0]  ;;  %v3914_v32 = vld [vmem:[%s4189_s6 + $0x104] sm:$0xf] }
  0x2a   :  { %626 = vmatpush.bf16.msrb.mxu2 %v3161_v62  ;;  %615 = vmatmul.bf16.vlgmr.msra.gmra.mxu3 %v4252_v8  ;;  %v3929_v62 = vld [vmem:[%s4189_s6 + $0x174] sm:$0xf0]  ;;  %v3174_v33 = vld [vmem:[%s4189_s6 + $0x110] sm:$0xf0]  ;;  %v3943_v36 = vld [vmem:[%s4189_s6 + $0x1ec] sm:$0xf] }
  0x2b   :  { %655 = vmatpush.bf16.msrb.mxu3 %v3289_v63  ;;  %605 = vmatmul.bf16.vlgmr.msra.gmra.mxu1 %v4254_v9  ;;  %v4297_v63 = vor.u32 %v3877_v41, %v3020_v40  ;;  %v3294_v37 = vld [vmem:[%s4189_s6 + $0x1f8] sm:$0xf0]  ;;  %v3052_v40 = vld [vmem:[%s4189_s6 + $0x8] sm:$0xf]  ;;  %v3177_v42 = vor.u32 %v3914_v32, %v3174_v33  ;;  %v3885_v43 = vld [vmem:[%s4189_s6 + $0x14] sm:$0xf0] }
  0x2c   :  { %684 = vmatpush.bf16.msrb.mxu0 %v3165_v10  ;;  %713 = vmatpush.bf16.msrb.mxu1 %v3293_v11  ;;  %v3101_v10 = vor.u32 %v3897_v57, %v3100_v56  ;;  %v3229_v11 = vor.u32 %v3929_v62, %v3228_v61  ;;  %v3180_v44 = vld [vmem:[%s4189_s6 + $0x108] sm:$0xf]  ;;  %v3917_v45 = vld [vmem:[%s4189_s6 + $0x114] sm:$0xf0]  ;;  %v3297_v47 = vor.u32 %v3943_v36, %v3294_v37  ;;  %v3939_v48 = vld [vmem:[%s4189_s6 + $0x1cc] sm:$0xf] }
  0x2d   :  { %v3278_v49 = vld [vmem:[%s4189_s6 + $0x1d8] sm:$0xf0]  ;;  %v3053_v50 = vor.u32 %v3885_v43, %v3052_v40  ;;  %v3181_v51 = vor.u32 %v3917_v45, %v3180_v44  ;;  %v3907_v52 = vld [vmem:[%s4189_s6 + $0xcc] sm:$0xf]  ;;  %v3952_v37 = vld [vmem:[%s4379_s13 + $0x30] sm:$0xff]  ;;  %s4159_s8 = smov 11  }
  0x2e   :  { %627 = vmatpush.bf16.msrb.mxu2 %v3145_v14  ;;  %v3081_v14 = vor.u32 %v3890_v60, %v3078_v1  ;;  %v3935_v55 = vld [vmem:[%s4189_s6 + $0x1ac] sm:$0xf]  ;;  %v3262_v56 = vld [vmem:[%s4189_s6 + $0x1b8] sm:$0xf0]  ;;  %v3946_v43 = vld [vmem:[%s4379_s13] sm:$0xff]  ;;  %s4740_s11 = sld [smem:[%s5130_s0 + %s4159_s8]]   ;;  %s4160_s12 = smov 8  }
  0x2f   :  { %656 = vmatpush.bf16.msrb.mxu3 %v3273_v15  ;;  %v3209_v15 = vor.u32 %v3922_v2, %v3206_v5  ;;  %v3265_v60 = vor.u32 %v3935_v55, %v3262_v56  ;;  %v3931_v61 = vld [vmem:[%s4189_s6 + $0x18c] sm:$0xf]  ;;  %v3246_v62 = vld [vmem:[%s4189_s6 + $0x198] sm:$0xf0]  ;;  %v3968_v44 = vld [vmem:[%s4379_s13 + $0xb0] sm:$0xff]  ;;  %s2987_s15 = sld [smem:[%s5130_s0 + %s4160_s12]]   ;;  %s4161_s16 = smov 9  }
  0x30   :  { %685 = vmatpush.bf16.msrb.mxu0 %v3149_v22  ;;  %714 = vmatpush.bf16.msrb.mxu1 %v3277_v23  ;;  %v3085_v22 = vor.u32 %v3893_v13, %v3084_v12  ;;  %v3213_v23 = vor.u32 %v3925_v18, %v3212_v17  ;;  %v3899_v2 = vld [vmem:[%s4189_s6 + $0x8c] sm:$0xf]  ;;  %v3118_v5 = vld [vmem:[%s4189_s6 + $0x98] sm:$0xf0]  ;;  %v4403_v45 = vld [vmem:[%s2981_s17] sm:$0xf]  ;;  %s2988_s19 = sld [smem:[%s5130_s0 + %s4161_s16]]  }
  0x31   :  { %v3230_v12 = vld [vmem:[%s4189_s6 + $0x178] sm:$0xf0]  ;;  %v3121_v13 = vor.u32 %v3899_v2, %v3118_v5  ;;  %v3923_v17 = vld [vmem:[%s4189_s6 + $0x14c] sm:$0xf]  ;;  %v3956_v2 = vld [vmem:[%s4379_s13 + $0x50] sm:$0xff]  ;;  %s4162_s20 = smov 12  }
  0x32   :  { %628 = vmatpush.bf16.msrb.mxu2 %v3129_v26  ;;  %v3882_v26 = vld [vmem:[%s4189_s6 + $0x4] sm:$0xf]  ;;  %v3214_v18 = vld [vmem:[%s4189_s6 + $0x158] sm:$0xf0]  ;;  %v3891_v20 = vld [vmem:[%s4189_s6 + $0x4c] sm:$0xf]  ;;  %s4811_s23 = sld [smem:[%s5130_s0 + %s4162_s20]]  }
  0x33   :  { %657 = vmatpush.bf16.msrb.mxu3 %v3257_v27  ;;  %v3065_v27 = vor.u32 %v3886_v16, %v3062_v19  ;;  %v3049_v41 = vor.u32 %v3882_v26, %v3046_v29  ;;  %v3086_v21 = vld [vmem:[%s4189_s6 + $0x58] sm:$0xf0]  ;;  %v3919_v26 = vld [vmem:[%s4189_s6 + $0x12c] sm:$0xf]  ;;  %s4163_s24 = smov 13   ;;  %s4164_s28 = smov 14  }
  0x34   :  { %686 = vmatpush.bf16.msrb.mxu0 %v3133_v34  ;;  %715 = vmatpush.bf16.msrb.mxu1 %v3261_v35  ;;  %v3911_v34 = vld [vmem:[%s4189_s6 + $0xec] sm:$0xf]  ;;  %v3166_v35 = vld [vmem:[%s4189_s6 + $0xf8] sm:$0xf0]  ;;  %s4828_s27 = sld [smem:[%s5130_s0 + %s4163_s24]]   ;;  %s4165_s2 = smov 15  }
  0x35   :  { %v3169_v46 = vor.u32 %v3911_v34, %v3166_v35  ;;  %v3883_v29 = vld [vmem:[%s4189_s6 + $0xc] sm:$0xf]  ;;  %v3182_v33 = vld [vmem:[%s4189_s6 + $0x118] sm:$0xf0]  ;;  %s4890_s1 = sld [smem:[%s5130_s0 + %s4164_s28]]   ;;  %s4167_s10 = smov 17  }
  0x36   :  { %629 = vmatpush.bf16.msrb.mxu2 %v3113_v38  ;;  %v3069_v38 = vor.u32 %v3889_v25, %v3068_v24  ;;  %v3887_v24 = vld [vmem:[%s4189_s6 + $0x2c] sm:$0xf]  ;;  %v3070_v25 = vld [vmem:[%s4189_s6 + $0x38] sm:$0xf0]  ;;  %s4895_s5 = sld [smem:[%s5130_s0 + %s4165_s2]]   ;;  %s4168_s14 = smov 18  }
  0x37   :  { %658 = vmatpush.bf16.msrb.mxu3 %v3241_v39  ;;  %v3197_v39 = vor.u32 %v3921_v31, %v3196_v30  ;;  %v3054_v31 = vld [vmem:[%s4189_s6 + $0x18] sm:$0xf0]  ;;  %v3915_v32 = vld [vmem:[%s4189_s6 + $0x10c] sm:$0xf]  ;;  %s4965_s17 = sld [smem:[%s5130_s0 + %s4168_s14]]   ;;  %s4169_s18 = smov 19  }
  0x38   :  { %687 = vmatpush.bf16.msrb.mxu0 %v3117_v53  ;;  %716 = vmatpush.bf16.msrb.mxu1 %v3245_v54  ;;  %v3150_v53 = vld [vmem:[%s4189_s6 + $0xd8] sm:$0xf0]  ;;  %v3281_v54 = vor.u32 %v3939_v48, %v3278_v49  ;;  %v3185_v34 = vor.u32 %v3915_v32, %v3182_v33  ;;  %v3057_v35 = vor.u32 %v3883_v29, %v3054_v31  ;;  %v3959_v48 = vld [vmem:[%s4379_s13 + $0x68] sm:$0xff]  ;;  %v3966_v49 = vld [vmem:[%s4379_s13 + $0xa0] sm:$0xff]  ;;  %v4464_v32 = vperm.slane %v4403_v45, 2  ;;  %s4170_s22 = smov 20  }
  0x39   :  { %581 = vmatmul.bf16.gmra.mxu0 %v4297_v63  ;;  %591 = vmatmul.bf16.gmra.mxu2 %v4299_v0  ;;  %v3153_v57 = vor.u32 %v3907_v52, %v3150_v53  ;;  %v3953_v36 = vld [vmem:[%s4379_s13 + $0x38] sm:$0xff]  ;;  %v4417_v52 = vld [vmem:[%s2982_s21] sm:$0xf]  ;;  %v3963_v5 = vld [vmem:[%s4379_s13 + $0x88] sm:$0xff]  ;;  %s4974_s21 = sld [smem:[%s5130_s0 + %s4169_s18]]   ;;  %s4171_s26 = smov 21  }
  0x3a   :  { %630 = vmatpush.bf16.msrb.mxu2 %v3097_v58  ;;  %620 = vmatmul.bf16.gmra.mxu3 %v4304_v6  ;;  %v3903_v58 = vld [vmem:[%s4189_s6 + $0xac] sm:$0xf]  ;;  %v3949_v40 = vld [vmem:[%s4379_s13 + $0x18] sm:$0xff]  ;;  %v3958_v53 = vld [vmem:[%s4379_s13 + $0x60] sm:$0xff]  ;;  %s4172_s30 = smov 22   ;;  %s4173_s4 = smov 23  }
  0x3b   :  { %659 = vmatpush.bf16.msrb.mxu3 %v3225_v59  ;;  %610 = vmatmul.bf16.gmra.mxu1 %v4306_v7  ;;  %v3134_v59 = vld [vmem:[%s4189_s6 + $0xb8] sm:$0xf0]  ;;  %s4174_s8 = smov 24   ;;  %s4175_s12 = smov 25  }
  0x3c   :  { %688 = vmatpush.bf16.msrb.mxu0 %v3101_v10  ;;  %717 = vmatpush.bf16.msrb.mxu1 %v3229_v11  ;;  %v3137_v1 = vor.u32 %v3903_v58, %v3134_v59  ;;  %v3249_v10 = vor.u32 %v3931_v61, %v3246_v62  ;;  %v3927_v11 = vld [vmem:[%s4189_s6 + $0x16c] sm:$0xf]  ;;  %s4176_s16 = smov 26   ;;  %s4177_s20 = smov 27  }
  0x3d   :  { %v3233_v16 = vor.u32 %v3927_v11, %v3230_v12  ;;  %s4178_s24 = smov 28   ;;  %s4179_s28 = smov 29  }
  0x3e   :  { %631 = vmatpush.bf16.msrb.mxu2 %v3081_v14  ;;  %v3895_v14 = vld [vmem:[%s4189_s6 + $0x6c] sm:$0xf]  ;;  %s4180_s2 = smov 30  }
  0x3f   :  { %660 = vmatpush.bf16.msrb.mxu3 %v3209_v15  ;;  %v3102_v15 = vld [vmem:[%s4189_s6 + $0x78] sm:$0xf0] }
  0x40   :  { %689 = vmatpush.bf16.msrb.mxu0 %v3085_v22  ;;  %718 = vmatpush.bf16.msrb.mxu1 %v3213_v23  ;;  %v3105_v19 = vor.u32 %v3895_v14, %v3102_v15  ;;  %v3217_v22 = vor.u32 %v3923_v17, %v3214_v18  ;;  %v3089_v23 = vor.u32 %v3891_v20, %v3086_v21  ;;  %v3955_v17 = vld [vmem:[%s4379_s13 + $0x48] sm:$0xff]  ;;  %v3962_v18 = vld [vmem:[%s4379_s13 + $0x80] sm:$0xff] }
  0x41   :  { %v3954_v21 = vld [vmem:[%s4379_s13 + $0x40] sm:$0xff] }
  0x42   :  { %632 = vmatpush.bf16.msrb.mxu2 %v3065_v27  ;;  %v3073_v27 = vor.u32 %v3887_v24, %v3070_v25 }
  0x43   :  { %661 = vmatpush.bf16.msrb.mxu3 %v3193_v28  ;;  %v3198_v28 = vld [vmem:[%s4189_s6 + $0x138] sm:$0xf0]  ;;  %s4166_s6 = smov 16  }
  0x44   :  { %690 = vmatpush.bf16.msrb.mxu0 %v3069_v38  ;;  %719 = vmatpush.bf16.msrb.mxu1 %v3197_v39  ;;  %v3201_v30 = vor.u32 %v3919_v26, %v3198_v28  ;;  %v3951_v38 = vld [vmem:[%s4379_s13 + $0x28] sm:$0xff]  ;;  %v3950_v39 = vld [vmem:[%s4379_s13 + $0x20] sm:$0xff]  ;;  %v3977_v28 = vld [vmem:[%s4379_s13 + $0xf8] sm:$0xff]  ;;  %s4921_s9 = sld [smem:[%s5130_s0 + %s4166_s6]]  }
  0x46   :  { %633 = vmatpush.bf16.msrb.mxu2 %v3049_v41  ;;  %v3948_v41 = vld [vmem:[%s4379_s13 + $0x10] sm:$0xff] }
  0x47   :  { %662 = vmatpush.bf16.msrb.mxu3 %v3177_v42  ;;  %v3947_v42 = vld [vmem:[%s4379_s13 + $0x8] sm:$0xff] }
  0x48   :  { %691 = vmatpush.bf16.msrb.mxu0 %v3053_v50  ;;  %720 = vmatpush.bf16.msrb.mxu1 %v3181_v51 }
  0x49   :  { %634 = vmatmul.bf16.vlgmr.msrb.gmra.mxu2 %v4245_v3 }
  0x4a   :  { %742 = vmatpush.bf16.msra.mxu2 %v3169_v46  ;;  %663 = vmatmul.bf16.vlgmr.msrb.gmra.mxu3 %v4254_v9  ;;  %v4411_v46 = vperm.slane %v4403_v45, 0 }
  0x4b   :  { %771 = vmatpush.bf16.msra.mxu3 %v3297_v47  ;;  %692 = vmatmul.bf16.vlgmr.msrb.gmra.mxu0 %v4245_v3 }
  0x4c   :  { %721 = vmatmul.bf16.vlgmr.msrb.gmra.mxu1 %v4254_v9  ;;  %1182 = vmatpush.bf16.msra.mxu0 %v3953_v36 }
  0x4e   :  { %743 = vmatpush.bf16.msra.mxu2 %v3153_v57  ;;  %v4425_v57 = vperm.slane %v4417_v52, 0 }
  0x4f   :  { %772 = vmatpush.bf16.msra.mxu3 %v3281_v54  ;;  %v3965_v54 = vld [vmem:[%s4379_s13 + $0x98] sm:$0xff] }
  0x50   :  { %1183 = vmatpush.bf16.msra.mxu0 %v3952_v37 }
  0x52   :  { %744 = vmatpush.bf16.msra.mxu2 %v3137_v1 }
  0x53   :  { %773 = vmatpush.bf16.msra.mxu3 %v3265_v60  ;;  %v3964_v60 = vld [vmem:[%s4379_s13 + $0x90] sm:$0xff] }
  0x54   :  { %1184 = vmatpush.bf16.msra.mxu0 %v3951_v38 }
  0x56   :  { %745 = vmatpush.bf16.msra.mxu2 %v3121_v13 }
  0x57   :  { %774 = vmatpush.bf16.msra.mxu3 %v3249_v10 }
  0x58   :  { %1185 = vmatpush.bf16.msra.mxu0 %v3950_v39 }
  0x59   :  { %639 = vmatmul.bf16.gmra.mxu2 %v4297_v63 }
  0x5a   :  { %746 = vmatpush.bf16.msra.mxu2 %v3105_v19  ;;  %668 = vmatmul.bf16.gmra.mxu3 %v4306_v7 }
  0x5b   :  { %775 = vmatpush.bf16.msra.mxu3 %v3233_v16  ;;  %697 = vmatmul.bf16.gmra.mxu0 %v4297_v63 }
  0x5c   :  { %726 = vmatmul.bf16.gmra.mxu1 %v4306_v7  ;;  %1186 = vmatpush.bf16.msra.mxu0 %v3949_v40 }
  0x5e   :  { %747 = vmatpush.bf16.msra.mxu2 %v3089_v23 }
  0x5f   :  { %776 = vmatpush.bf16.msra.mxu3 %v3217_v22 }
  0x60   :  { %1187 = vmatpush.bf16.msra.mxu0 %v3948_v41  ;;  %v3976_v41 = vld [vmem:[%s4379_s13 + $0xf0] sm:$0xff] }
  0x62   :  { %748 = vmatpush.bf16.msra.mxu2 %v3073_v27 }
  0x63   :  { %777 = vmatpush.bf16.msra.mxu3 %v3201_v30 }
  0x64   :  { %1188 = vmatpush.bf16.msra.mxu0 %v3947_v42 }
  0x66   :  { %749 = vmatpush.bf16.msra.mxu2 %v3057_v35 }
  0x67   :  { %778 = vmatpush.bf16.msra.mxu3 %v3185_v34 }
  0x68   :  { %1189 = vmatpush.bf16.msra.mxu0 %v3946_v43  ;;  %v4476_v43 = vperm.slane %v4403_v45, 1 }
  0x69   :  { %644 = vmatmul.bf16.gmra.mxu2 %v4247_v4 }
  0x6a   :  { %673 = vmatmul.bf16.gmra.mxu3 %v4252_v8 }
  0x6b   :  { %702 = vmatmul.bf16.gmra.mxu0 %v4247_v4  ;;  %1269 = vmatpush.bf16.msrb.mxu3 %v3977_v28 }
  0x6c   :  { %731 = vmatmul.bf16.gmra.mxu1 %v4252_v8 }
  0x6f   :  { %1270 = vmatpush.bf16.msrb.mxu3 %v3976_v41 }
  0x79   :  { %649 = vmatmul.bf16.gmra.mxu2 %v4299_v0 }
  0x7a   :  { %678 = vmatmul.bf16.gmra.mxu3 %v4304_v6 }
  0x7b   :  { %707 = vmatmul.bf16.gmra.mxu0 %v4299_v0 }
  0x7c   :  { %736 = vmatmul.bf16.gmra.mxu1 %v4304_v6 }
  0x89   :  { %750 = vmatmul.bf16.vlgmr.msra.gmra.mxu2 %v4245_v3  ;;  %v3969_v3 = vld [vmem:[%s4379_s13 + $0xb8] sm:$0xff] }
  0x8a   :  { %779 = vmatmul.bf16.vlgmr.msra.gmra.mxu3 %v4254_v9  ;;  %1240 = vmatpush.bf16.msrb.mxu2 %v3969_v3  ;;  %v3961_v9 = vld [vmem:[%s4379_s13 + $0x78] sm:$0xff] }
  0x8b   :  { %1211 = vmatpush.bf16.msra.mxu1 %v3961_v9  ;;  %v4479_v9 = vperm.slane %v4417_v52, 2 }
  0x8e   :  { %1241 = vmatpush.bf16.msrb.mxu2 %v3968_v44 }
  0x99   :  { %755 = vmatmul.bf16.gmra.mxu2 %v4297_v63  ;;  %v3960_v63 = vld [vmem:[%s4379_s13 + $0x70] sm:$0xff] }
  0x9a   :  { %784 = vmatmul.bf16.gmra.mxu3 %v4306_v7  ;;  %v3967_v7 = vld [vmem:[%s4379_s13 + $0xa8] sm:$0xff]  ;;  %1212 = vmatpush.bf16.msra.mxu1 %v3960_v63 }
  0x9b   :  { %1242 = vmatpush.bf16.msrb.mxu2 %v3967_v7 }
  0x9e   :  { %1213 = vmatpush.bf16.msra.mxu1 %v3959_v48 }
  0x9f   :  { %1243 = vmatpush.bf16.msrb.mxu2 %v3966_v49 }
  0xa2   :  { %1214 = vmatpush.bf16.msra.mxu1 %v3958_v53 }
  0xa3   :  { %1244 = vmatpush.bf16.msrb.mxu2 %v3965_v54 }
  0xa6   :  { %v577_v47 = vpop.f32.mrf.mxu0 }
  0xa7   :  { %v578_v50 = vadd.f32 %v577_v47, %v4411_v46  ;;  %1245 = vmatpush.bf16.msrb.mxu2 %v3964_v60 }
  0xa8   :  { %v606_v51 = vpop.f32.mrf.mxu1 }
  0xa9   :  { %760 = vmatmul.bf16.gmra.mxu2 %v4247_v4  ;;  %v607_v55 = vadd.f32 %v606_v51, %v578_v50  ;;  %v3957_v4 = vld [vmem:[%s4379_s13 + $0x58] sm:$0xff] }
  0xaa   :  { %789 = vmatmul.bf16.gmra.mxu3 %v4252_v8  ;;  %1215 = vmatpush.bf16.msra.mxu1 %v3957_v4 }
  0xab   :  { %v842_v61 = vmul.f32 %v4425_v57, %v607_v55  ;;  %vm801_vm0 = vcmp.ge.f32.partialorder %v607_v55, 0.0  ;;  %1246 = vmatpush.bf16.msrb.mxu2 %v3963_v5 }
  0xac   :  { %v4422_v56 = vpop.f32.mrf.mxu2 }
  0xad   :  { %v4427_v58 = vpop.f32.mrf.mxu3  ;;  %v4435_v10 = vsel %vm801_vm0, %v607_v55, %v842_v61  ;;  %v588_v40 = vadd.f32 %v4422_v56, %v4411_v46  ;;  %v3975_v55 = vld [vmem:[%s4379_s13 + $0xe8] sm:$0xff] }
  0xae   :  { %v579_v59 = vpop.f32.mrf.mxu0  ;;  %1216 = vmatpush.bf16.msra.mxu1 %v3956_v2  ;;  %1271 = vmatpush.bf16.msrb.mxu3 %v3975_v55 }
  0xaf   :  { %v580_v8 = vadd.f32 %v579_v59, %v4411_v46  ;;  %1247 = vmatpush.bf16.msrb.mxu2 %v3962_v18  ;;  %v617_v63 = vadd.f32 %v4427_v58, %v588_v40  ;;  %v4489_v58 = vperm.slane %v4417_v52, 1 }
  0xb0   :  { %v608_v62 = vpop.f32.mrf.mxu1 }
  0xb1   :  { %v609_v1 = vadd.f32 %v608_v62, %v580_v8  ;;  %v858_v54 = vmul.f32 %v4425_v57, %v617_v63  ;;  %vm817_vm6 = vcmp.ge.f32.partialorder %v617_v63, 0.0 }
  0xb2   :  { %1217 = vmatpush.bf16.msra.mxu1 %v3955_v17 }
  0xb3   :  { %vm805_vm1 = vcmp.ge.f32.partialorder %v609_v1, 0.0  ;;  %v846_v11 = vmul.f32 %v4425_v57, %v609_v1  ;;  %v4497_v2 = vsel %vm817_vm6, %v617_v63, %v858_v54 }
  0xb4   :  { %v589_v12 = vpop.f32.mrf.mxu2 }
  0xb5   :  { %v4438_v13 = vsel %vm805_vm1, %v609_v1, %v846_v11  ;;  %v618_v14 = vpop.f32.mrf.mxu3  ;;  %v590_v36 = vadd.f32 %v589_v12, %v4411_v46 }
  0xb6   :  { %v906_v15 = vpack.c.bf16 %v4438_v13, %v4435_v10  ;;  %v582_v16 = vpop.f32.mrf.mxu0  ;;  %1218 = vmatpush.bf16.msra.mxu1 %v3954_v21 }
  0xb7   :  { %v583_v19 = vadd.f32 %v582_v16, %v4411_v46  ;;  %v619_v42 = vadd.f32 %v618_v14, %v590_v36 }
  0xb8   :  { %v611_v20 = vpop.f32.mrf.mxu1  ;;  %1190 = vmatmul.bf16.vlgmr.msra.gmra.mxu0 %v906_v15 }
  0xb9   :  { %765 = vmatmul.bf16.gmra.mxu2 %v4299_v0  ;;  %v612_v22 = vadd.f32 %v611_v20, %v583_v19  ;;  %v862_v47 = vmul.f32 %v4425_v57, %v619_v42  ;;  %vm821_vm4 = vcmp.ge.f32.partialorder %v619_v42, 0.0 }
  0xba   :  { %794 = vmatmul.bf16.gmra.mxu3 %v4304_v6 }
  0xbb   :  { %v850_v0 = vmul.f32 %v4425_v57, %v612_v22  ;;  %vm809_vm2 = vcmp.ge.f32.partialorder %v612_v22, 0.0  ;;  %v4491_v4 = vsel %vm821_vm4, %v619_v42, %v862_v47 }
  0xbc   :  { %v4453_v23 = vpop.f32.mrf.mxu2  ;;  %v914_v11 = vpack.c.bf16 %v4491_v4, %v4497_v2 }
  0xbd   :  { %v4455_v24 = vpop.f32.mrf.mxu3  ;;  %v4461_v30 = vsel %vm809_vm2, %v612_v22, %v850_v0  ;;  %v593_v20 = vadd.f32 %v4453_v23, %v4411_v46  ;;  %v3974_v22 = vld [vmem:[%s4379_s13 + $0xe0] sm:$0xff] }
  0xbe   :  { %v584_v25 = vpop.f32.mrf.mxu0  ;;  %1272 = vmatpush.bf16.msrb.mxu3 %v3974_v22 }
  0xbf   :  { %v585_v26 = vadd.f32 %v584_v25, %v4411_v46 }
  0xc0   :  { %v613_v6 = vpop.f32.mrf.mxu1 }
  0xc1   :  { %v614_v27 = vadd.f32 %v613_v6, %v585_v26 }
  0xc3   :  { %v854_v29 = vmul.f32 %v4425_v57, %v614_v27  ;;  %vm813_vm3 = vcmp.ge.f32.partialorder %v614_v27, 0.0 }
  0xc4   :  { %v594_v31 = vpop.f32.mrf.mxu2 }
  0xc5   :  { %v623_v33 = vpop.f32.mrf.mxu3  ;;  %v4466_v34 = vsel %vm813_vm3, %v614_v27, %v854_v29  ;;  %v595_v12 = vadd.f32 %v594_v31, %v4411_v46  ;;  %v622_v29 = vadd.f32 %v4455_v24, %v593_v20 }
  0xc6   :  { %v910_v35 = vpack.c.bf16 %v4466_v34, %v4461_v30 }
  0xc7   :  { %v624_v25 = vadd.f32 %v623_v33, %v595_v12  ;;  %vm825_vm12 = vcmp.ge.f32.partialorder %v622_v29, 0.0 }
  0xc8   :  { %v693_v37 = vpop.f32.mrf.mxu0  ;;  %1195 = vmatmul.bf16.gmra.mxu0 %v910_v35 }
  0xc9   :  { %v694_v38 = vadd.f32 %v693_v37, %v4464_v32  ;;  %v722_v39 = vpop.f32.mrf.mxu1  ;;  %v870_v23 = vmul.f32 %v4425_v57, %v624_v25  ;;  %vm829_vm10 = vcmp.ge.f32.partialorder %v624_v25, 0.0 }
  0xcb   :  { %v723_v3 = vadd.f32 %v722_v39, %v694_v38  ;;  %v866_v38 = vmul.f32 %v4425_v57, %v622_v29  ;;  %v3973_v39 = vld [vmem:[%s4379_s13 + $0xd8] sm:$0xff]  ;;  %v4525_v41 = vsel %vm829_vm10, %v624_v25, %v870_v23 }
  0xcc   :  { %v635_v44 = vpop.f32.mrf.mxu2  ;;  %1273 = vmatpush.bf16.msrb.mxu3 %v3973_v39 }
  0xcd   :  { %v664_v7 = vpop.f32.mrf.mxu3  ;;  %v636_v48 = vadd.f32 %v635_v44, %v4476_v43  ;;  %v844_v50 = vmul.f32 %v4479_v9, %v723_v3  ;;  %vm803_vm5 = vcmp.ge.f32.partialorder %v723_v3, 0.0  ;;  %v4531_v47 = vsel %vm825_vm12, %v622_v29, %v866_v38  ;;  %v3970_v38 = vld [vmem:[%s4379_s13 + $0xc0] sm:$0xff] }
  0xce   :  { %v918_v57 = vpack.c.bf16 %v4525_v41, %v4531_v47 }
  0xcf   :  { %v665_v59 = vadd.f32 %v664_v7, %v636_v48  ;;  %v4493_v60 = vsel %vm803_vm5, %v723_v3, %v844_v50 }
  0xd0   :  { %v695_v49 = vpop.f32.mrf.mxu0 }
  0xd1   :  { %v696_v51 = vadd.f32 %v695_v49, %v4464_v32  ;;  %v724_v53 = vpop.f32.mrf.mxu1  ;;  %v843_v14 = vmul.f32 %v4489_v58, %v665_v59  ;;  %vm802_vm8 = vcmp.ge.f32.partialorder %v665_v59, 0.0 }
  0xd3   :  { %v725_v56 = vadd.f32 %v724_v53, %v696_v51  ;;  %v4512_v0 = vsel %vm802_vm8, %v665_v59, %v843_v14  ;;  %v3972_v59 = vld [vmem:[%s4379_s13 + $0xd0] sm:$0xff] }
  0xd4   :  { %v637_v8 = vpop.f32.mrf.mxu2  ;;  %1274 = vmatpush.bf16.msrb.mxu3 %v3972_v59 }
  0xd5   :  { %vm807_vm7 = vcmp.ge.f32.partialorder %v725_v56, 0.0  ;;  %v848_v61 = vmul.f32 %v4479_v9, %v725_v56  ;;  %v638_v62 = vadd.f32 %v637_v8, %v4476_v43  ;;  %v666_v1 = vpop.f32.mrf.mxu3 }
  0xd7   :  { %v4499_v5 = vsel %vm807_vm7, %v725_v56, %v848_v61  ;;  %v667_v16 = vadd.f32 %v666_v1, %v638_v62 }
  0xd8   :  { %v908_v15 = vpack.c.bf16 %v4499_v5, %v4493_v60  ;;  %v698_v17 = vpop.f32.mrf.mxu0  ;;  %1200 = vmatmul.bf16.gmra.mxu0 %v914_v11 }
  0xd9   :  { %v699_v18 = vadd.f32 %v698_v17, %v4464_v32  ;;  %v727_v19 = vpop.f32.mrf.mxu1  ;;  %vm806_vm9 = vcmp.ge.f32.partialorder %v667_v16, 0.0  ;;  %v847_v21 = vmul.f32 %v4489_v58, %v667_v16 }
  0xda   :  { %1248 = vmatmul.bf16.vlgmr.msrb.gmra.mxu2 %v908_v15 }
  0xdb   :  { %v4514_v26 = vsel %vm806_vm9, %v667_v16, %v847_v21  ;;  %v728_v27 = vadd.f32 %v727_v19, %v699_v18  ;;  %v3971_v21 = vld [vmem:[%s4379_s13 + $0xc8] sm:$0xff]  ;;  %s4960_s13 = sld [smem:[%s5130_s0 + %s4167_s10]]  }
  0xdc   :  { %v907_v6 = vpack.c.bf16 %v4514_v26, %v4512_v0  ;;  %v640_v28 = vpop.f32.mrf.mxu2  ;;  %1275 = vmatpush.bf16.msrb.mxu3 %v3971_v21 }
  0xdd   :  { %v669_v46 = vpop.f32.mrf.mxu3  ;;  %v641_v31 = vadd.f32 %v640_v28, %v4476_v43  ;;  %v852_v35 = vmul.f32 %v4479_v9, %v728_v27  ;;  %vm811_vm11 = vcmp.ge.f32.partialorder %v728_v27, 0.0 }
  0xde   :  { %1219 = vmatmul.bf16.vlgmr.msra.gmra.mxu1 %v907_v6 }
  0xdf   :  { %v670_v24 = vadd.f32 %v669_v46, %v641_v31  ;;  %v4528_v44 = vsel %vm811_vm11, %v728_v27, %v852_v35 }
  0xe0   :  { %v700_v33 = vpop.f32.mrf.mxu0  ;;  %1276 = vmatpush.bf16.msrb.mxu3 %v3970_v38 }
  0xe1   :  { %v701_v36 = vadd.f32 %v700_v33, %v4464_v32  ;;  %v729_v37 = vpop.f32.mrf.mxu1  ;;  %v851_v49 = vmul.f32 %v4489_v58, %v670_v24  ;;  %vm810_vm14 = vcmp.ge.f32.partialorder %v670_v24, 0.0 }
  0xe3   :  { %v730_v40 = vadd.f32 %v729_v37, %v701_v36  ;;  %v4543_v61 = vsel %vm810_vm14, %v670_v24, %v851_v49 }
  0xe4   :  { %v642_v3 = vpop.f32.mrf.mxu2 }
  0xe5   :  { %v856_v42 = vmul.f32 %v4479_v9, %v730_v40  ;;  %vm815_vm13 = vcmp.ge.f32.partialorder %v730_v40, 0.0  ;;  %v643_v63 = vadd.f32 %v642_v3, %v4476_v43  ;;  %v671_v7 = vpop.f32.mrf.mxu3 }
  0xe7   :  { %v4535_v48 = vsel %vm815_vm13, %v730_v40, %v856_v42  ;;  %v672_v50 = vadd.f32 %v671_v7, %v643_v63 }
  0xe8   :  { %v703_v51 = vpop.f32.mrf.mxu0  ;;  %v912_v53 = vpack.c.bf16 %v4535_v48, %v4528_v44  ;;  %1205 = vmatmul.bf16.gmra.mxu0 %v918_v57 }
  0xe9   :  { %v704_v54 = vadd.f32 %v703_v51, %v4464_v32  ;;  %v732_v55 = vpop.f32.mrf.mxu1  ;;  %v855_v56 = vmul.f32 %v4489_v58, %v672_v50  ;;  %vm814_vm15 = vcmp.ge.f32.partialorder %v672_v50, 0.0 }
  0xea   :  { %1253 = vmatmul.bf16.gmra.mxu2 %v912_v53 }
  0xeb   :  { %v4545_v8 = vsel %vm814_vm15, %v672_v50, %v855_v56  ;;  %v733_v62 = vadd.f32 %v732_v55, %v704_v54 }
  0xec   :  { %v645_v1 = vpop.f32.mrf.mxu2  ;;  %v911_v11 = vpack.c.bf16 %v4545_v8, %v4543_v61 }
  0xed   :  { %v674_v12 = vpop.f32.mrf.mxu3  ;;  %v646_v14 = vadd.f32 %v645_v1, %v4476_v43  ;;  %v860_v16 = vmul.f32 %v4479_v9, %v733_v62  ;;  %vm819_vm0 = vcmp.ge.f32.partialorder %v733_v62, 0.0 }
  0xee   :  { %1224 = vmatmul.bf16.gmra.mxu1 %v911_v11 }
  0xef   :  { %v675_v20 = vadd.f32 %v674_v12, %v646_v14  ;;  %v4554_v6 = vsel %vm819_vm0, %v733_v62, %v860_v16 }
  0xf0   :  { %v705_v15 = vpop.f32.mrf.mxu0 }
  0xf1   :  { %v706_v17 = vadd.f32 %v705_v15, %v4464_v32  ;;  %v734_v18 = vpop.f32.mrf.mxu1  ;;  %v859_v46 = vmul.f32 %v4489_v58, %v675_v20  ;;  %vm818_vm2 = vcmp.ge.f32.partialorder %v675_v20, 0.0 }
  0xf3   :  { %v735_v19 = vadd.f32 %v734_v18, %v706_v17  ;;  %v4565_v39 = vsel %vm818_vm2, %v675_v20, %v859_v46 }
  0xf4   :  { %v647_v25 = vpop.f32.mrf.mxu2 }
  0xf5   :  { %vm823_vm1 = vcmp.ge.f32.partialorder %v735_v19, 0.0  ;;  %v864_v22 = vmul.f32 %v4479_v9, %v735_v19  ;;  %v648_v27 = vadd.f32 %v647_v25, %v4476_v43  ;;  %v676_v28 = vpop.f32.mrf.mxu3 }
  0xf7   :  { %v4557_v29 = vsel %vm823_vm1, %v735_v19, %v864_v22  ;;  %v677_v23 = vadd.f32 %v676_v28, %v648_v27  ;;  %v837_v22 = vperm.slane %v4417_v52, 3 }
  0xf8   :  { %v708_v31 = vpop.f32.mrf.mxu0  ;;  %v916_v33 = vpack.c.bf16 %v4557_v29, %v4554_v6 }
  0xf9   :  { %v709_v35 = vadd.f32 %v708_v31, %v4464_v32  ;;  %v737_v36 = vpop.f32.mrf.mxu1  ;;  %v863_v37 = vmul.f32 %v4489_v58, %v677_v23  ;;  %vm822_vm3 = vcmp.ge.f32.partialorder %v677_v23, 0.0 }
  0xfa   :  { %1258 = vmatmul.bf16.gmra.mxu2 %v916_v33 }
  0xfb   :  { %v4567_v40 = vsel %vm822_vm3, %v677_v23, %v863_v37  ;;  %v738_v24 = vadd.f32 %v737_v36, %v709_v35 }
  0xfc   :  { %v650_v42 = vpop.f32.mrf.mxu2  ;;  %v915_v3 = vpack.c.bf16 %v4567_v40, %v4565_v39 }
  0xfd   :  { %v679_v63 = vpop.f32.mrf.mxu3  ;;  %v651_v7 = vadd.f32 %v650_v42, %v4476_v43  ;;  %v868_v49 = vmul.f32 %v4479_v9, %v738_v24  ;;  %vm827_vm4 = vcmp.ge.f32.partialorder %v738_v24, 0.0 }
  0xfe   :  { %1229 = vmatmul.bf16.gmra.mxu1 %v915_v3 }
  0xff   :  { %v680_v54 = vadd.f32 %v679_v63, %v651_v7  ;;  %v4575_v59 = vsel %vm827_vm4, %v738_v24, %v868_v49 }
 0x100   :  { %v710_v57 = vpop.f32.mrf.mxu0 }
 0x101   :  { %v711_v50 = vadd.f32 %v710_v57, %v4464_v32  ;;  %v739_v51 = vpop.f32.mrf.mxu1  ;;  %v867_v12 = vmul.f32 %v4489_v58, %v680_v54  ;;  %vm826_vm6 = vcmp.ge.f32.partialorder %v680_v54, 0.0 }
 0x103   :  { %v740_v53 = vadd.f32 %v739_v51, %v711_v50  ;;  %v4585_v16 = vsel %vm826_vm6, %v680_v54, %v867_v12 }
 0x104   :  { %v652_v56 = vpop.f32.mrf.mxu2 }
 0x105   :  { %vm831_vm5 = vcmp.ge.f32.partialorder %v740_v53, 0.0  ;;  %v872_v55 = vmul.f32 %v4479_v9, %v740_v53  ;;  %v653_v62 = vadd.f32 %v652_v56, %v4476_v43  ;;  %v681_v1 = vpop.f32.mrf.mxu3  ;;  %v203_v9 = vperm.slane %v4403_v45, 3 }
 0x107   :  { %v4578_v11 = vsel %vm831_vm5, %v740_v53, %v872_v55  ;;  %v682_v14 = vadd.f32 %v681_v1, %v653_v62 }
 0x108   :  { %v920_v32 = vpack.c.bf16 %v4578_v11, %v4575_v59 }
 0x109   :  { %v871_v15 = vmul.f32 %v4489_v58, %v682_v14  ;;  %vm830_vm7 = vcmp.ge.f32.partialorder %v682_v14, 0.0 }
 0x10a   :  { %1263 = vmatmul.bf16.gmra.mxu2 %v920_v32 }
 0x10b   :  { %v4587_v17 = vsel %vm830_vm7, %v682_v14, %v871_v15 }
 0x10c   :  { %v751_v43 = vpop.f32.mrf.mxu2  ;;  %v919_v18 = vpack.c.bf16 %v4587_v17, %v4585_v16 }
 0x10d   :  { %v780_v19 = vpop.f32.mrf.mxu3  ;;  %v752_v20 = vadd.f32 %v751_v43, %v203_v9 }
 0x10e   :  { %1234 = vmatmul.bf16.gmra.mxu1 %v919_v18 }
 0x10f   :  { %v781_v21 = vadd.f32 %v780_v19, %v752_v20 }
 0x111   :  { %v845_v28 = vmul.f32 %v837_v22, %v781_v21  ;;  %vm804_vm8 = vcmp.ge.f32.partialorder %v781_v21, 0.0 }
 0x113   :  { %v4597_v23 = vsel %vm804_vm8, %v781_v21, %v845_v28 }
 0x114   :  { %v753_v25 = vpop.f32.mrf.mxu2 }
 0x115   :  { %v754_v58 = vadd.f32 %v753_v25, %v203_v9  ;;  %v782_v27 = vpop.f32.mrf.mxu3 }
 0x117   :  { %v783_v46 = vadd.f32 %v782_v27, %v754_v58 }
 0x119   :  { %vm808_vm9 = vcmp.ge.f32.partialorder %v783_v46, 0.0  ;;  %v849_v45 = vmul.f32 %v837_v22, %v783_v46 }
 0x11b   :  { %v4599_v31 = vsel %vm808_vm9, %v783_v46, %v849_v45 }
 0x11c   :  { %v909_v52 = vpack.c.bf16 %v4599_v31, %v4597_v23  ;;  %v756_v33 = vpop.f32.mrf.mxu2 }
 0x11d   :  { %v785_v35 = vpop.f32.mrf.mxu3  ;;  %v757_v36 = vadd.f32 %v756_v33, %v203_v9 }
 0x11e   :  { %1277 = vmatmul.bf16.vlgmr.msrb.gmra.mxu3 %v909_v52 }
 0x11f   :  { %v786_v37 = vadd.f32 %v785_v35, %v757_v36  ;;  %v3548_v36 = vld [vmem:[%s4618_s3 + $0xe8] sm:$0xf] }
 0x121   :  { %v853_v3 = vmul.f32 %v837_v22, %v786_v37  ;;  %vm812_vm10 = vcmp.ge.f32.partialorder %v786_v37, 0.0 }
 0x123   :  { %v4603_v57 = vsel %vm812_vm10, %v786_v37, %v853_v3  ;;  %v4009_v37 = vld [vmem:[%s4618_s3 + $0xf4] sm:$0xf0]  ;;  %v3540_v3 = vld [vmem:[%s4618_s3 + $0xe0] sm:$0xf] }
 0x124   :  { %v758_v38 = vpop.f32.mrf.mxu2 }
 0x125   :  { %v759_v24 = vadd.f32 %v758_v38, %v203_v9  ;;  %v787_v42 = vpop.f32.mrf.mxu3  ;;  %v3549_v38 = vor.u32 %v4009_v37, %v3548_v36  ;;  %v3500_v36 = vld [vmem:[%s4618_s3 + $0x88] sm:$0xf] }
 0x127   :  { %v788_v63 = vadd.f32 %v787_v42, %v759_v24  ;;  %1590 = vmatpush.bf16.msra.mxu2 %v3549_v38  ;;  %v4007_v24 = vld [vmem:[%s4618_s3 + $0xec] sm:$0xf]  ;;  %v3550_v42 = vld [vmem:[%s4618_s3 + $0xf8] sm:$0xf0]  ;;  %v3997_v38 = vld [vmem:[%s4618_s3 + $0x94] sm:$0xf0] }
 0x129   :  { %v857_v7 = vmul.f32 %v837_v22, %v788_v63  ;;  %vm816_vm11 = vcmp.ge.f32.partialorder %v788_v63, 0.0 }
 0x12b   :  { %v4605_v49 = vsel %vm816_vm11, %v788_v63, %v857_v7  ;;  %v4008_v63 = vld [vmem:[%s4618_s3 + $0xec] sm:$0xf0]  ;;  %v3532_v7 = vld [vmem:[%s4618_s3 + $0xc8] sm:$0xf] }
 0x12c   :  { %v761_v50 = vpop.f32.mrf.mxu2  ;;  %v913_v51 = vpack.c.bf16 %v4605_v49, %v4603_v57 }
 0x12d   :  { %v790_v53 = vpop.f32.mrf.mxu3  ;;  %v762_v54 = vadd.f32 %v761_v50, %v203_v9  ;;  %v3541_v50 = vor.u32 %v4008_v63, %v3540_v3  ;;  %v3995_v3 = vld [vmem:[%s4618_s3 + $0x8c] sm:$0xf] }
 0x12e   :  { %1282 = vmatmul.bf16.gmra.mxu3 %v913_v51  ;;  %v4005_v51 = vld [vmem:[%s4618_s3 + $0xd4] sm:$0xf0] }
 0x12f   :  { %v791_v55 = vadd.f32 %v790_v53, %v762_v54  ;;  %v3533_v53 = vor.u32 %v4005_v51, %v3532_v7  ;;  %1532 = vmatpush.bf16.msrb.mxu0 %v3541_v50  ;;  %v4006_v54 = vld [vmem:[%s4618_s3 + $0xe4] sm:$0xf]  ;;  %v3502_v7 = vld [vmem:[%s4618_s3 + $0x98] sm:$0xf0]  ;;  %v3492_v51 = vld [vmem:[%s4618_s3 + $0x80] sm:$0xf] }
 0x130   :  { %v3505_v50 = vor.u32 %v3995_v3, %v3502_v7  ;;  %v3462_v3 = vld [vmem:[%s4618_s3 + $0x50] sm:$0xf0]  ;;  %v3985_v7 = vld [vmem:[%s4618_s3 + $0x34] sm:$0xf0] }
 0x131   :  { %v861_v12 = vmul.f32 %v837_v22, %v791_v55  ;;  %vm820_vm12 = vcmp.ge.f32.partialorder %v791_v55, 0.0  ;;  %1591 = vmatpush.bf16.msra.mxu2 %v3533_v53  ;;  %v3996_v53 = vld [vmem:[%s4618_s3 + $0x8c] sm:$0xf0] }
 0x133   :  { %v4609_v15 = vsel %vm820_vm12, %v791_v55, %v861_v12  ;;  %v3542_v55 = vld [vmem:[%s4618_s3 + $0xf0] sm:$0xf0] }
 0x134   :  { %v763_v56 = vpop.f32.mrf.mxu2 }
 0x135   :  { %v764_v62 = vadd.f32 %v763_v56, %v203_v9  ;;  %v792_v1 = vpop.f32.mrf.mxu3  ;;  %v4003_v56 = vld [vmem:[%s4618_s3 + $0xcc] sm:$0xf] }
 0x137   :  { %v793_v14 = vadd.f32 %v792_v1, %v764_v62  ;;  %v3545_v62 = vor.u32 %v4006_v54, %v3542_v55  ;;  %v3534_v1 = vld [vmem:[%s4618_s3 + $0xd8] sm:$0xf0]  ;;  %v3484_v54 = vld [vmem:[%s4618_s3 + $0x68] sm:$0xf]  ;;  %v3493_v55 = vor.u32 %v3996_v53, %v3492_v51  ;;  %v3983_v51 = vld [vmem:[%s4618_s3 + $0x2c] sm:$0xf] }
 0x138   :  { %v3537_v12 = vor.u32 %v4003_v56, %v3534_v1  ;;  %v3993_v56 = vld [vmem:[%s4618_s3 + $0x74] sm:$0xf0]  ;;  %v3994_v1 = vld [vmem:[%s4618_s3 + $0x84] sm:$0xf] }
 0x139   :  { %vm824_vm13 = vcmp.ge.f32.partialorder %v793_v14, 0.0  ;;  %v865_v32 = vmul.f32 %v837_v22, %v793_v14  ;;  %1561 = vmatpush.bf16.msrb.mxu1 %v3545_v62  ;;  %v3485_v62 = vor.u32 %v3993_v56, %v3484_v54  ;;  %v3454_v54 = vld [vmem:[%s4618_s3 + $0x38] sm:$0xf0]  ;;  %v3444_v56 = vld [vmem:[%s4618_s3 + $0x20] sm:$0xf] }
 0x13b   :  { %v4611_v43 = vsel %vm824_vm13, %v793_v14, %v865_v32  ;;  %v3524_v14 = vld [vmem:[%s4618_s3 + $0xc0] sm:$0xf]  ;;  %v4004_v32 = vld [vmem:[%s4618_s3 + $0xcc] sm:$0xf0] }
 0x13c   :  { %v766_v18 = vpop.f32.mrf.mxu2  ;;  %v917_v19 = vpack.c.bf16 %v4611_v43, %v4609_v15 }
 0x13d   :  { %v795_v20 = vpop.f32.mrf.mxu3  ;;  %v767_v21 = vadd.f32 %v766_v18, %v203_v9  ;;  %v3516_v18 = vld [vmem:[%s4618_s3 + $0xa8] sm:$0xf] }
 0x13e   :  { %1287 = vmatmul.bf16.gmra.mxu3 %v917_v19  ;;  %v3525_v19 = vor.u32 %v4004_v32, %v3524_v14  ;;  %v3991_v14 = vld [vmem:[%s4618_s3 + $0x6c] sm:$0xf] }
 0x13f   :  { %v796_v25 = vadd.f32 %v795_v20, %v767_v21  ;;  %v4001_v20 = vld [vmem:[%s4618_s3 + $0xb4] sm:$0xf0] }
 0x140   :  { %v3517_v21 = vor.u32 %v4001_v20, %v3516_v18  ;;  %1533 = vmatpush.bf16.msrb.mxu0 %v3525_v19  ;;  %v3486_v18 = vld [vmem:[%s4618_s3 + $0x78] sm:$0xf0]  ;;  %v3476_v20 = vld [vmem:[%s4618_s3 + $0x60] sm:$0xf] }
 0x141   :  { %v869_v46 = vmul.f32 %v837_v22, %v796_v25  ;;  %vm828_vm14 = vcmp.ge.f32.partialorder %v796_v25, 0.0  ;;  %v3489_v19 = vor.u32 %v3991_v14, %v3486_v18 }
 0x142   :  { %1592 = vmatpush.bf16.msra.mxu2 %v3517_v21  ;;  %v3992_v21 = vld [vmem:[%s4618_s3 + $0x6c] sm:$0xf0] }
 0x144   :  { %v768_v58 = vpop.f32.mrf.mxu2 }
 0x145   :  { %v769_v27 = vadd.f32 %v768_v58, %v203_v9  ;;  %v797_v28 = vpop.f32.mrf.mxu3  ;;  %v4620_v9 = vsel %vm828_vm14, %v796_v25, %v869_v46  ;;  %v4002_v25 = vld [vmem:[%s4618_s3 + $0xc4] sm:$0xf]  ;;  %v3526_v58 = vld [vmem:[%s4618_s3 + $0xd0] sm:$0xf0]  ;;  %v3518_v46 = vld [vmem:[%s4618_s3 + $0xb8] sm:$0xf0] }
 0x147   :  { %v798_v45 = vadd.f32 %v797_v28, %v769_v27  ;;  %v3999_v27 = vld [vmem:[%s4618_s3 + $0xac] sm:$0xf]  ;;  %v3529_v28 = vor.u32 %v4002_v25, %v3526_v58  ;;  %v3468_v25 = vld [vmem:[%s4618_s3 + $0x48] sm:$0xf]  ;;  %v3477_v58 = vor.u32 %v3992_v21, %v3476_v20  ;;  %v3981_v21 = vld [vmem:[%s4618_s3 + $0x14] sm:$0xf0] }
 0x148   :  { %v3436_v20 = vld [vmem:[%s4618_s3 + $0x8] sm:$0xf] }
 0x149   :  { %vm832_vm15 = vcmp.ge.f32.partialorder %v798_v45, 0.0  ;;  %v873_v52 = vmul.f32 %v837_v22, %v798_v45  ;;  %v3553_v22 = vor.u32 %v4007_v24, %v3550_v42  ;;  %1562 = vmatpush.bf16.msrb.mxu1 %v3529_v28  ;;  %v3501_v24 = vor.u32 %v3997_v38, %v3500_v36  ;;  %v3998_v42 = vld [vmem:[%s4618_s3 + $0xa4] sm:$0xf]  ;;  %v3470_v36 = vld [vmem:[%s4618_s3 + $0x58] sm:$0xf0] }
 0x14a   :  { %v3990_v28 = vld [vmem:[%s4618_s3 + $0x64] sm:$0xf]  ;;  %v3460_v38 = vld [vmem:[%s4618_s3 + $0x40] sm:$0xf] }
 0x14b   :  { %v4622_v33 = vsel %vm832_vm15, %v798_v45, %v873_v52  ;;  %1619 = vmatpush.bf16.msra.mxu3 %v3553_v22  ;;  %v3521_v45 = vor.u32 %v3999_v27, %v3518_v46  ;;  %v3508_v52 = vld [vmem:[%s4618_s3 + $0xa0] sm:$0xf]  ;;  %1593 = vmatpush.bf16.msra.mxu2 %v3501_v24  ;;  %v3510_v22 = vld [vmem:[%s4618_s3 + $0xb0] sm:$0xf0]  ;;  %v3989_v27 = vld [vmem:[%s4618_s3 + $0x54] sm:$0xf0] }
 0x14c   :  { %v921_v35 = vpack.c.bf16 %v4622_v33, %v4620_v9  ;;  %v3513_v63 = vor.u32 %v3998_v42, %v3510_v22  ;;  %v3478_v46 = vld [vmem:[%s4618_s3 + $0x70] sm:$0xf0]  ;;  %v3988_v24 = vld [vmem:[%s4618_s3 + $0x4c] sm:$0xf0]  ;;  %v3986_v42 = vld [vmem:[%s4618_s3 + $0x44] sm:$0xf] }
 0x14d   :  { %v3461_v22 = vor.u32 %v3988_v24, %v3460_v38 }
 0x14e   :  { %1292 = vmatmul.bf16.gmra.mxu3 %v921_v35  ;;  %v4000_v35 = vld [vmem:[%s4618_s3 + $0xac] sm:$0xf0]  ;;  %1563 = vmatpush.bf16.msrb.mxu1 %v3513_v63  ;;  %v3452_v63 = vld [vmem:[%s4618_s3 + $0x28] sm:$0xf] }
 0x14f   :  { %1620 = vmatpush.bf16.msra.mxu3 %v3537_v12  ;;  %v3509_v37 = vor.u32 %v4000_v35, %v3508_v52  ;;  %1594 = vmatpush.bf16.msra.mxu2 %v3485_v62  ;;  %v3494_v12 = vld [vmem:[%s4618_s3 + $0x90] sm:$0xf0]  ;;  %v3481_v52 = vor.u32 %v3990_v28, %v3478_v46  ;;  %v3987_v35 = vld [vmem:[%s4618_s3 + $0x4c] sm:$0xf]  ;;  %v3453_v53 = vor.u32 %v3985_v7, %v3452_v63  ;;  %v3984_v62 = vld [vmem:[%s4618_s3 + $0x2c] sm:$0xf0] }
 0x150   :  { %v3497_v32 = vor.u32 %v3994_v1, %v3494_v12  ;;  %v3982_v1 = vld [vmem:[%s4618_s3 + $0x24] sm:$0xf]  ;;  %v1191_v12 = vpop.f32.mrf.mxu0  ;;  %v3445_v14 = vor.u32 %v3984_v62, %v3444_v56  ;;  %v3428_v28 = vld [vmem:[%s4618_s3] sm:$0xf]  ;;  %v3980_v46 = vld [vmem:[%s4618_s3 + $0xc] sm:$0xf0] }
 0x151   :  { %1534 = vmatpush.bf16.msrb.mxu0 %v3509_v37  ;;  %v3473_v37 = vor.u32 %v3987_v35, %v3470_v36  ;;  %v3978_v35 = vld [vmem:[%s4618_s3 + $0x4] sm:$0xf]  ;;  %v3430_v36 = vld [vmem:[%s4618_s3 + $0x10] sm:$0xf0] }
 0x152   :  { %1564 = vmatpush.bf16.msrb.mxu1 %v3497_v32  ;;  %v3446_v32 = vld [vmem:[%s4618_s3 + $0x30] sm:$0xf0]  ;;  %v3433_v38 = vor.u32 %v3978_v35, %v3430_v36 }
 0x153   :  { %1621 = vmatpush.bf16.msra.mxu3 %v3521_v45  ;;  %v3469_v45 = vor.u32 %v3989_v27, %v3468_v25  ;;  %v3449_v18 = vor.u32 %v3982_v1, %v3446_v32  ;;  %v3979_v25 = vld [vmem:[%s4618_s3 + $0xc] sm:$0xf]  ;;  %v3438_v27 = vld [vmem:[%s4618_s3 + $0x18] sm:$0xf0]  ;;  %s5012_s3 = sld [smem:[%s5130_s0 + %s4172_s30]]  }
 0x155   :  { %1535 = vmatpush.bf16.msrb.mxu0 %v3493_v55  ;;  %1595 = vmatpush.bf16.msra.mxu2 %v3469_v45  ;;  %v3457_v55 = vor.u32 %v3983_v51, %v3454_v54  ;;  %v3441_v45 = vor.u32 %v3979_v25, %v3438_v27 }
 0x156   :  { %1565 = vmatpush.bf16.msrb.mxu1 %v3481_v52  ;;  %v3429_v52 = vor.u32 %v3980_v46, %v3428_v28 }
 0x157   :  { %1622 = vmatpush.bf16.msra.mxu3 %v3505_v50  ;;  %v3465_v50 = vor.u32 %v3986_v42, %v3462_v3  ;;  %v4691_v3 = vld [vmem:[%s4451_s25] ss:$0 sm:$0xff]  ;;  %s4985_s25 = sld [smem:[%s5130_s0 + %s4170_s22]]  }
 0x158   :  { %v1193_v24 = vpop.f32.mrf.mxu0  ;;  %v1192_v63 = vadd.f32 %v4691_v3, %v1191_v12 }
 0x159   :  { %1536 = vmatpush.bf16.msrb.mxu0 %v3477_v58  ;;  %1596 = vmatpush.bf16.msra.mxu2 %v3453_v53  ;;  %v3437_v58 = vor.u32 %v3981_v21, %v3436_v20  ;;  %v1194_v51 = vadd.f32 %v4691_v3, %v1193_v24 }
 0x15a   :  { %1566 = vmatpush.bf16.msrb.mxu1 %v3465_v50 }
 0x15b   :  { %1623 = vmatpush.bf16.msra.mxu3 %v3489_v19  ;;  %v1220_v19 = vpop.f32.mrf.mxu1 }
 0x15c   :  { %v1221_v53 = vadd.f32 %v1220_v19, %v1192_v63 }
 0x15d   :  { %1537 = vmatpush.bf16.msrb.mxu0 %v3461_v22  ;;  %1597 = vmatpush.bf16.msra.mxu2 %v3437_v58 }
 0x15e   :  { %1567 = vmatpush.bf16.msrb.mxu1 %v3449_v18 }
 0x15f   :  { %1624 = vmatpush.bf16.msra.mxu3 %v3473_v37  ;;  %v1249_v37 = vpop.f32.mrf.mxu2 }
 0x160   :  { %v1196_v7 = vpop.f32.mrf.mxu0  ;;  %v1250_v56 = vadd.f32 %v1249_v37, %v1221_v53 }
 0x161   :  { %1538 = vmatpush.bf16.msrb.mxu0 %v3445_v14  ;;  %v4696_v14 = vld [vmem:[%s4595_s29] ss:$0 sm:$0xff]  ;;  %v1197_v12 = vadd.f32 %v4691_v3, %v1196_v7  ;;  %s4990_s29 = sld [smem:[%s5130_s0 + %s4171_s26]]  }
 0x162   :  { %1568 = vmatpush.bf16.msrb.mxu1 %v3433_v38 }
 0x163   :  { %1625 = vmatpush.bf16.msra.mxu3 %v3457_v55  ;;  %v1222_v42 = vpop.f32.mrf.mxu1 }
 0x164   :  { %v1223_v62 = vadd.f32 %v1222_v42, %v1194_v51 }
 0x165   :  { %1539 = vmatpush.bf16.msrb.mxu0 %v3429_v52 }
 0x167   :  { %1626 = vmatpush.bf16.msra.mxu3 %v3441_v45  ;;  %v1251_v22 = vpop.f32.mrf.mxu2 }
 0x168   :  { %v1198_v32 = vpop.f32.mrf.mxu0  ;;  %v1252_v18 = vadd.f32 %v1251_v22, %v1223_v62 }
 0x169   :  { %v1199_v52 = vadd.f32 %v4691_v3, %v1198_v32 }
 0x16b   :  { %v1225_v50 = vpop.f32.mrf.mxu1 }
 0x16c   :  { %v1226_v35 = vadd.f32 %v1225_v50, %v1197_v12  ;;  %v4033_v12 = vld [vmem:[%s4706_s7 + $0xb8] sm:$0xff] }
 0x16d   :  { %2120 = vmatpush.bf16.msrb.mxu2 %v4033_v12  ;;  %v4038_v12 = vld [vmem:[%s4706_s7 + $0xe0] sm:$0xff] }
 0x16f   :  { %v1254_v55 = vpop.f32.mrf.mxu2 }
 0x170   :  { %v1201_v36 = vpop.f32.mrf.mxu0  ;;  %v1255_v24 = vadd.f32 %v1254_v55, %v1226_v35  ;;  %v4016_v35 = vld [vmem:[%s4706_s7 + $0x30] sm:$0xff] }
 0x171   :  { %v1202_v62 = vadd.f32 %v4691_v3, %v1201_v36 }
 0x173   :  { %v1227_v20 = vpop.f32.mrf.mxu1 }
 0x174   :  { %v1228_v42 = vadd.f32 %v1227_v20, %v1199_v52  ;;  %v4032_v52 = vld [vmem:[%s4706_s7 + $0xb0] sm:$0xff] }
 0x175   :  { %2121 = vmatpush.bf16.msrb.mxu2 %v4032_v52 }
 0x177   :  { %v1256_v27 = vpop.f32.mrf.mxu2 }
 0x178   :  { %v1257_v7 = vadd.f32 %v1256_v27, %v1228_v42  ;;  %v1203_v50 = vpop.f32.mrf.mxu0  ;;  %v4041_v27 = vld [vmem:[%s4706_s7 + $0xf8] sm:$0xff] }
 0x179   :  { %2149 = vmatpush.bf16.msrb.mxu3 %v4041_v27 }
 0x17b   :  { %v1230_v38 = vpop.f32.mrf.mxu1 }
 0x17c   :  { %v1231_v20 = vadd.f32 %v1230_v38, %v1202_v62  ;;  %v4024_v38 = vld [vmem:[%s4706_s7 + $0x70] sm:$0xff] }
 0x17f   :  { %v1259_v63 = vpop.f32.mrf.mxu2 }
 0x180   :  { %v1206_v36 = vpop.f32.mrf.mxu0 }
 0x1a1   :  { %v1278_v54 = vpop.f32.mrf.mxu3 }
 0x1a2   :  { %v1279_v1 = vadd.f32 %v1278_v54, %v1250_v56  ;;  %v1232_v56 = vpop.f32.mrf.mxu1 }
 0x1a4   :  { %v1310_v25 = vmul.f32 %v4696_v14, %v1279_v1  ;;  %vm1299_vm0 = vcmp.ge.f32.partialorder %v1279_v1, 0.0 }
 0x1a6   :  { %v1318_v28 = vsel %vm1299_vm0, %v1279_v1, %v1310_v25 }
 0x1a9   :  { %v1280_v21 = vpop.f32.mrf.mxu3 }
 0x1aa   :  { %v1281_v58 = vadd.f32 %v1280_v21, %v1252_v18  ;;  %v1261_v21 = vpop.f32.mrf.mxu2  ;;  %v1235_v42 = vpop.f32.mrf.mxu1 }
 0x1ac   :  { %vm1300_vm1 = vcmp.ge.f32.partialorder %v1281_v58, 0.0  ;;  %v1311_v19 = vmul.f32 %v4696_v14, %v1281_v58 }
 0x1ae   :  { %v1319_v46 = vsel %vm1300_vm1, %v1281_v58, %v1311_v19  ;;  %v1204_v58 = vadd.f32 %v4691_v3, %v1203_v50  ;;  %v4017_v19 = vld [vmem:[%s4706_s7 + $0x38] sm:$0xff] }
 0x1af   :  { %v1326_v45 = vpack.c.bf16 %v1319_v46, %v1318_v28  ;;  %v4025_v28 = vld [vmem:[%s4706_s7 + $0x78] sm:$0xff]  ;;  %v1260_v46 = vadd.f32 %v1259_v63, %v1231_v20  ;;  %2062 = vmatpush.bf16.msra.mxu0 %v4017_v19  ;;  %v4031_v63 = vld [vmem:[%s4706_s7 + $0xa8] sm:$0xff]  ;;  %v4022_v19 = vld [vmem:[%s4706_s7 + $0x60] sm:$0xff] }
 0x1b0   :  { %2091 = vmatpush.bf16.msra.mxu1 %v4025_v28  ;;  %2122 = vmatpush.bf16.msrb.mxu2 %v4031_v63  ;;  %v4029_v28 = vld [vmem:[%s4706_s7 + $0x98] sm:$0xff] }
 0x1b1   :  { %v1283_v37 = vpop.f32.mrf.mxu3  ;;  %1540 = vmatmul.bf16.vlgmr.msrb.gmra.mxu0 %v1326_v45  ;;  %1569 = vmatmul.bf16.vlgmr.msrb.gmra.mxu1 %v1326_v45 }
 0x1b2   :  { %1598 = vmatmul.bf16.vlgmr.msra.gmra.mxu2 %v1326_v45  ;;  %1627 = vmatmul.bf16.vlgmr.msra.gmra.mxu3 %v1326_v45  ;;  %v1284_v22 = vadd.f32 %v1283_v37, %v1255_v24  ;;  %v1233_v45 = vadd.f32 %v1232_v56, %v1204_v58  ;;  %v4040_v37 = vld [vmem:[%s4706_s7 + $0xf0] sm:$0xff]  ;;  %v1264_v56 = vpop.f32.mrf.mxu2 }
 0x1b3   :  { %2063 = vmatpush.bf16.msra.mxu0 %v4016_v35  ;;  %2150 = vmatpush.bf16.msrb.mxu3 %v4040_v37  ;;  %v4021_v37 = vld [vmem:[%s4706_s7 + $0x58] sm:$0xff] }
 0x1b4   :  { %v1312_v53 = vmul.f32 %v4696_v14, %v1284_v22  ;;  %vm1301_vm2 = vcmp.ge.f32.partialorder %v1284_v22, 0.0  ;;  %2092 = vmatpush.bf16.msra.mxu1 %v4024_v38 }
 0x1b6   :  { %v1320_v1 = vsel %vm1301_vm2, %v1284_v22, %v1312_v53  ;;  %v1262_v22 = vadd.f32 %v1261_v21, %v1233_v45  ;;  %v4039_v53 = vld [vmem:[%s4706_s7 + $0xe8] sm:$0xff]  ;;  %v1237_v45 = vpop.f32.mrf.mxu1 }
 0x1b7   :  { %2151 = vmatpush.bf16.msrb.mxu3 %v4039_v53 }
 0x1b9   :  { %v1285_v51 = vpop.f32.mrf.mxu3 }
 0x1ba   :  { %v1286_v54 = vadd.f32 %v1285_v51, %v1257_v7  ;;  %v4015_v7 = vld [vmem:[%s4706_s7 + $0x28] sm:$0xff] }
 0x1bb   :  { %2064 = vmatpush.bf16.msra.mxu0 %v4015_v7  ;;  %2152 = vmatpush.bf16.msrb.mxu3 %v4038_v12  ;;  %v4026_v12 = vld [vmem:[%s4706_s7 + $0x80] sm:$0xff] }
 0x1bc   :  { %vm1302_vm3 = vcmp.ge.f32.partialorder %v1286_v54, 0.0  ;;  %v1313_v55 = vmul.f32 %v4696_v14, %v1286_v54 }
 0x1be   :  { %v1321_v32 = vsel %vm1302_vm3, %v1286_v54, %v1313_v55  ;;  %v4023_v54 = vld [vmem:[%s4706_s7 + $0x68] sm:$0xff] }
 0x1bf   :  { %v1327_v18 = vpack.c.bf16 %v1321_v32, %v1320_v1  ;;  %v4030_v1 = vld [vmem:[%s4706_s7 + $0xa0] sm:$0xff]  ;;  %2093 = vmatpush.bf16.msra.mxu1 %v4023_v54 }
 0x1c0   :  { %v4014_v32 = vld [vmem:[%s4706_s7 + $0x20] sm:$0xff]  ;;  %2123 = vmatpush.bf16.msrb.mxu2 %v4030_v1  ;;  %v4020_v1 = vld [vmem:[%s4706_s7 + $0x50] sm:$0xff] }
 0x1c1   :  { %v1288_v25 = vpop.f32.mrf.mxu3  ;;  %1545 = vmatmul.bf16.gmra.mxu0 %v1327_v18  ;;  %1574 = vmatmul.bf16.gmra.mxu1 %v1327_v18 }
 0x1c2   :  { %1603 = vmatmul.bf16.gmra.mxu2 %v1327_v18  ;;  %1632 = vmatmul.bf16.gmra.mxu3 %v1327_v18  ;;  %v1289_v24 = vadd.f32 %v1288_v25, %v1260_v46  ;;  %v1207_v18 = vadd.f32 %v4691_v3, %v1206_v36  ;;  %v1208_v25 = vpop.f32.mrf.mxu0  ;;  %v4013_v46 = vld [vmem:[%s4706_s7 + $0x18] sm:$0xff] }
 0x1c3   :  { %2065 = vmatpush.bf16.msra.mxu0 %v4014_v32  ;;  %v1209_v35 = vadd.f32 %v4691_v3, %v1208_v25  ;;  %2094 = vmatpush.bf16.msra.mxu1 %v4022_v19  ;;  %v4037_v36 = vld [vmem:[%s4706_s7 + $0xd8] sm:$0xff]  ;;  %v4011_v32 = vld [vmem:[%s4706_s7 + $0x8] sm:$0xff]  ;;  %v4034_v19 = vld [vmem:[%s4706_s7 + $0xc0] sm:$0xff] }
 0x1c4   :  { %v1314_v50 = vmul.f32 %v4696_v14, %v1289_v24  ;;  %vm1303_vm4 = vcmp.ge.f32.partialorder %v1289_v24, 0.0  ;;  %v1236_v27 = vadd.f32 %v1235_v42, %v1207_v18  ;;  %2124 = vmatpush.bf16.msrb.mxu2 %v4029_v28  ;;  %v1266_v42 = vpop.f32.mrf.mxu2  ;;  %2153 = vmatpush.bf16.msrb.mxu3 %v4037_v36  ;;  %v4019_v18 = vld [vmem:[%s4706_s7 + $0x48] sm:$0xff] }
 0x1c5   :  { %v4027_v25 = vld [vmem:[%s4706_s7 + $0x88] sm:$0xff] }
 0x1c6   :  { %v1322_v20 = vsel %vm1303_vm4, %v1289_v24, %v1314_v50  ;;  %v1265_v38 = vadd.f32 %v1264_v56, %v1236_v27  ;;  %v1238_v24 = vadd.f32 %v1237_v45, %v1209_v35  ;;  %v4012_v56 = vld [vmem:[%s4706_s7 + $0x10] sm:$0xff]  ;;  %v1362_v27 = vld [vmem:[%s2987_s15] sm:$0xf]  ;;  %s5058_s15 = sld [smem:[%s5130_s0 + %s4175_s12]]  }
 0x1c7   :  { %2066 = vmatpush.bf16.msra.mxu0 %v4013_v46  ;;  %2095 = vmatpush.bf16.msra.mxu1 %v4021_v37  ;;  %v4760_v28 = vperm.slane %v1362_v27, 0  ;;  %v4762_v46 = vperm.slane %v1362_v27, 1  ;;  %v1648_v45 = vld [vmem:[%s2988_s19] sm:$0xf]  ;;  %s5087_s19 = sld [smem:[%s5130_s0 + %s4176_s16]]  }
 0x1c8   :  { %v1267_v63 = vadd.f32 %v1266_v42, %v1238_v24  ;;  %v4765_v37 = vperm.slane %v1648_v45, 0  ;;  %v4768_v24 = vperm.slane %v1648_v45, 1  ;;  %v4770_v42 = vperm.slane %v1362_v27, 2 }
 0x1c9   :  { %v1290_v51 = vpop.f32.mrf.mxu3 }
 0x1ca   :  { %v1291_v55 = vadd.f32 %v1290_v51, %v1262_v22 }
 0x1cb   :  { %2067 = vmatpush.bf16.msra.mxu0 %v4012_v56  ;;  %2096 = vmatpush.bf16.msra.mxu1 %v4020_v1 }
 0x1cc   :  { %vm1304_vm5 = vcmp.ge.f32.partialorder %v1291_v55, 0.0  ;;  %v1315_v62 = vmul.f32 %v4696_v14, %v1291_v55 }
 0x1ce   :  { %v1323_v21 = vsel %vm1304_vm5, %v1291_v55, %v1315_v62  ;;  %v4036_v62 = vld [vmem:[%s4706_s7 + $0xd0] sm:$0xff] }
 0x1cf   :  { %v1328_v58 = vpack.c.bf16 %v1323_v21, %v1322_v20  ;;  %2154 = vmatpush.bf16.msrb.mxu3 %v4036_v62  ;;  %2068 = vmatpush.bf16.msra.mxu0 %v4011_v32  ;;  %v4010_v20 = vld [vmem:[%s4706_s7] sm:$0xff] }
 0x1d0   :  { %2097 = vmatpush.bf16.msra.mxu1 %v4019_v18  ;;  %v4018_v21 = vld [vmem:[%s4706_s7 + $0x40] sm:$0xff] }
 0x1d1   :  { %v1293_v52 = vpop.f32.mrf.mxu3  ;;  %1550 = vmatmul.bf16.gmra.mxu0 %v1328_v58  ;;  %1579 = vmatmul.bf16.gmra.mxu1 %v1328_v58 }
 0x1d2   :  { %1608 = vmatmul.bf16.gmra.mxu2 %v1328_v58  ;;  %1637 = vmatmul.bf16.gmra.mxu3 %v1328_v58  ;;  %v1294_v22 = vadd.f32 %v1293_v52, %v1265_v38  ;;  %v4035_v58 = vld [vmem:[%s4706_s7 + $0xc8] sm:$0xff] }
 0x1d3   :  { %2069 = vmatpush.bf16.msra.mxu0 %v4010_v20  ;;  %2155 = vmatpush.bf16.msrb.mxu3 %v4035_v58 }
 0x1d4   :  { %v1316_v3 = vmul.f32 %v4696_v14, %v1294_v22  ;;  %vm1305_vm6 = vcmp.ge.f32.partialorder %v1294_v22, 0.0  ;;  %2098 = vmatpush.bf16.msra.mxu1 %v4018_v21 }
 0x1d6   :  { %v1324_v54 = vsel %vm1305_vm6, %v1294_v22, %v1316_v3  ;;  %v4772_v22 = vperm.slane %v1362_v27, 3  ;;  %v4776_v3 = vperm.slane %v1648_v45, 2 }
 0x1d7   :  { %2156 = vmatpush.bf16.msrb.mxu3 %v4034_v19 }
 0x1d9   :  { %v1295_v7 = vpop.f32.mrf.mxu3 }
 0x1da   :  { %v1296_v51 = vadd.f32 %v1295_v7, %v1267_v63 }
 0x1dc   :  { %vm1306_vm7 = vcmp.ge.f32.partialorder %v1296_v51, 0.0  ;;  %v1317_v53 = vmul.f32 %v4696_v14, %v1296_v51  ;;  %v4028_v14 = vld [vmem:[%s4706_s7 + $0x90] sm:$0xff]  ;;  %s5038_s7 = sld [smem:[%s5130_s0 + %s4173_s4]]  }
 0x1dd   :  { %2125 = vmatpush.bf16.msrb.mxu2 %v4028_v14 }
 0x1de   :  { %v1325_v50 = vsel %vm1306_vm7, %v1296_v51, %v1317_v53  ;;  %v4778_v51 = vperm.slane %v1648_v45, 3 }
 0x1df   :  { %v1329_v55 = vpack.c.bf16 %v1325_v50, %v1324_v54 }
 0x1e1   :  { %1555 = vmatmul.bf16.gmra.mxu0 %v1329_v55  ;;  %1584 = vmatmul.bf16.gmra.mxu1 %v1329_v55 }
 0x1e2   :  { %1613 = vmatmul.bf16.gmra.mxu2 %v1329_v55  ;;  %1642 = vmatmul.bf16.gmra.mxu3 %v1329_v55 }
 0x1e3   :  { %2126 = vmatpush.bf16.msrb.mxu2 %v4027_v25 }
 0x1e7   :  { %2127 = vmatpush.bf16.msrb.mxu2 %v4026_v12 }
 0x22e   :  { %v1541_v52 = vpop.f32.mrf.mxu0  ;;  %v1570_v35 = vpop.f32.mrf.mxu1 }
 0x22f   :  { %v1542_v36 = vadd.f32 %v1541_v52, %v4760_v28  ;;  %v1571_v38 = vadd.f32 %v1570_v35, %v4762_v46 }
 0x231   :  { %v1690_v63 = vmul.f32 %v4765_v37, %v1542_v36  ;;  %v1691_v7 = vmul.f32 %v4768_v24, %v1571_v38  ;;  %vm1649_vm8 = vcmp.ge.f32.partialorder %v1542_v36, 0.0  ;;  %vm1650_vm9 = vcmp.ge.f32.partialorder %v1571_v38, 0.0 }
 0x233   :  { %v1722_v32 = vsel %vm1649_vm8, %v1542_v36, %v1690_v63  ;;  %v1723_v18 = vsel %vm1650_vm9, %v1571_v38, %v1691_v7 }
 0x234   :  { %v1754_v27 = vadd.f32 %v1722_v32, %v4435_v10  ;;  %v1755_v45 = vadd.f32 %v1723_v18, %v4512_v0 }
 0x235   :  { %v1599_v53 = vpop.f32.mrf.mxu2  ;;  %v1628_v54 = vpop.f32.mrf.mxu3 }
 0x236   :  { %v1600_v50 = vadd.f32 %v1599_v53, %v4770_v42  ;;  %v1629_v55 = vadd.f32 %v1628_v54, %v4772_v22  ;;  %v1543_v14 = vpop.f32.mrf.mxu0  ;;  %v1572_v56 = vpop.f32.mrf.mxu1 }
 0x237   :  { %v1544_v62 = vadd.f32 %v1543_v14, %v4760_v28  ;;  %v1573_v1 = vadd.f32 %v1572_v56, %v4762_v46 }
 0x238   :  { %v1692_v20 = vmul.f32 %v4776_v3, %v1600_v50  ;;  %v1693_v21 = vmul.f32 %v4778_v51, %v1629_v55  ;;  %vm1651_vm12 = vcmp.ge.f32.partialorder %v1600_v50, 0.0  ;;  %vm1652_vm13 = vcmp.ge.f32.partialorder %v1629_v55, 0.0 }
 0x239   :  { %vm1653_vm10 = vcmp.ge.f32.partialorder %v1544_v62, 0.0  ;;  %v1694_v25 = vmul.f32 %v4765_v37, %v1544_v62  ;;  %vm1654_vm11 = vcmp.ge.f32.partialorder %v1573_v1, 0.0  ;;  %v1695_v58 = vmul.f32 %v4768_v24, %v1573_v1 }
 0x23a   :  { %v1724_v36 = vsel %vm1651_vm12, %v1600_v50, %v1692_v20  ;;  %v1725_v38 = vsel %vm1652_vm13, %v1629_v55, %v1693_v21 }
 0x23b   :  { %v1726_v12 = vsel %vm1653_vm10, %v1544_v62, %v1694_v25  ;;  %v1727_v19 = vsel %vm1654_vm11, %v1573_v1, %v1695_v58  ;;  %v1756_v50 = vadd.f32 %v1724_v36, %v4493_v60  ;;  %v1757_v55 = vadd.f32 %v1725_v38, %v4597_v23 }
 0x23c   :  { %v1758_v52 = vadd.f32 %v1726_v12, %v4438_v13  ;;  %v1759_v35 = vadd.f32 %v1727_v19, %v4514_v26 }
 0x23d   :  { %v1601_v63 = vpop.f32.mrf.mxu2  ;;  %v1630_v7 = vpop.f32.mrf.mxu3 }
 0x23e   :  { %v1786_v53 = vpack.c.bf16 %v1758_v52, %v1754_v27  ;;  %v1787_v54 = vpack.c.bf16 %v1759_v35, %v1755_v45  ;;  %v1602_v14 = vadd.f32 %v1601_v63, %v4770_v42  ;;  %v1631_v56 = vadd.f32 %v1630_v7, %v4772_v22  ;;  %v1546_v62 = vpop.f32.mrf.mxu0  ;;  %v1575_v1 = vpop.f32.mrf.mxu1 }
 0x23f   :  { %v1547_v10 = vadd.f32 %v1546_v62, %v4760_v28  ;;  %v1576_v0 = vadd.f32 %v1575_v1, %v4762_v46 }
 0x240   :  { %vm1655_vm14 = vcmp.ge.f32.partialorder %v1602_v14, 0.0  ;;  %v1696_v13 = vmul.f32 %v4776_v3, %v1602_v14  ;;  %vm1656_vm15 = vcmp.ge.f32.partialorder %v1631_v56, 0.0  ;;  %v1697_v26 = vmul.f32 %v4778_v51, %v1631_v56  ;;  %2070 = vmatmul.bf16.vlgmr.msra.gmra.mxu0 %v1786_v53  ;;  %2099 = vmatmul.bf16.vlgmr.msra.gmra.mxu1 %v1787_v54 }
 0x241   :  { %v1698_v20 = vmul.f32 %v4765_v37, %v1547_v10  ;;  %v1699_v21 = vmul.f32 %v4768_v24, %v1576_v0  ;;  %vm1657_vm0 = vcmp.ge.f32.partialorder %v1547_v10, 0.0  ;;  %vm1658_vm1 = vcmp.ge.f32.partialorder %v1576_v0, 0.0 }
 0x242   :  { %v1728_v32 = vsel %vm1655_vm14, %v1602_v14, %v1696_v13  ;;  %v1729_v18 = vsel %vm1656_vm15, %v1631_v56, %v1697_v26 }
 0x243   :  { %v1760_v25 = vadd.f32 %v1728_v32, %v4499_v5  ;;  %v1761_v58 = vadd.f32 %v1729_v18, %v4599_v31  ;;  %v1730_v52 = vsel %vm1657_vm0, %v1547_v10, %v1698_v20  ;;  %v1731_v60 = vsel %vm1658_vm1, %v1576_v0, %v1699_v21 }
 0x244   :  { %v1762_v53 = vadd.f32 %v1730_v52, %v4461_v30  ;;  %v1763_v54 = vadd.f32 %v1731_v60, %v4543_v61 }
 0x245   :  { %v1788_v12 = vpack.c.bf16 %v1760_v25, %v1756_v50  ;;  %v1789_v19 = vpack.c.bf16 %v1761_v58, %v1757_v55  ;;  %v1604_v27 = vpop.f32.mrf.mxu2  ;;  %v1633_v45 = vpop.f32.mrf.mxu3 }
 0x246   :  { %v1605_v23 = vadd.f32 %v1604_v27, %v4770_v42  ;;  %v1548_v35 = vpop.f32.mrf.mxu0  ;;  %v1577_v36 = vpop.f32.mrf.mxu1  ;;  %v1634_v38 = vadd.f32 %v1633_v45, %v4772_v22 }
 0x247   :  { %v1549_v63 = vadd.f32 %v1548_v35, %v4760_v28  ;;  %v1578_v5 = vadd.f32 %v1577_v36, %v4762_v46  ;;  %2128 = vmatmul.bf16.vlgmr.msrb.gmra.mxu2 %v1788_v12  ;;  %2157 = vmatmul.bf16.vlgmr.msrb.gmra.mxu3 %v1789_v19 }
 0x248   :  { %v1700_v14 = vmul.f32 %v4776_v3, %v1605_v23  ;;  %v1701_v56 = vmul.f32 %v4778_v51, %v1634_v38  ;;  %vm1659_vm4 = vcmp.ge.f32.partialorder %v1605_v23, 0.0  ;;  %vm1660_vm5 = vcmp.ge.f32.partialorder %v1634_v38, 0.0 }
 0x249   :  { %vm1661_vm2 = vcmp.ge.f32.partialorder %v1549_v63, 0.0  ;;  %v1702_v31 = vmul.f32 %v4765_v37, %v1549_v63  ;;  %vm1662_vm3 = vcmp.ge.f32.partialorder %v1578_v5, 0.0  ;;  %v1703_v7 = vmul.f32 %v4768_v24, %v1578_v5 }
 0x24a   :  { %v1732_v20 = vsel %vm1659_vm4, %v1605_v23, %v1700_v14  ;;  %v1733_v21 = vsel %vm1660_vm5, %v1634_v38, %v1701_v56 }
 0x24b   :  { %v1734_v62 = vsel %vm1661_vm2, %v1549_v63, %v1702_v31  ;;  %v1735_v1 = vsel %vm1662_vm3, %v1578_v5, %v1703_v7  ;;  %v1764_v27 = vadd.f32 %v1732_v20, %v4528_v44  ;;  %v1765_v52 = vadd.f32 %v1733_v21, %v4603_v57 }
 0x24c   :  { %v1766_v10 = vadd.f32 %v1734_v62, %v4466_v34  ;;  %v1767_v0 = vadd.f32 %v1735_v1, %v4545_v8 }
 0x24d   :  { %v1606_v13 = vpop.f32.mrf.mxu2  ;;  %v1635_v26 = vpop.f32.mrf.mxu3 }
 0x24e   :  { %v1607_v50 = vadd.f32 %v1606_v13, %v4770_v42  ;;  %v1636_v30 = vadd.f32 %v1635_v26, %v4772_v22  ;;  %v1551_v55 = vpop.f32.mrf.mxu0  ;;  %v1580_v61 = vpop.f32.mrf.mxu1  ;;  %v1790_v32 = vpack.c.bf16 %v1766_v10, %v1762_v53  ;;  %v1791_v18 = vpack.c.bf16 %v1767_v0, %v1763_v54  ;;  %v4049_v53 = vld [vmem:[%s4828_s27 + $0x38] sm:$0xff]  ;;  %v4048_v0 = vld [vmem:[%s4828_s27 + $0x30] sm:$0xff] }
 0x24f   :  { %v1552_v25 = vadd.f32 %v1551_v55, %v4760_v28  ;;  %v1581_v58 = vadd.f32 %v1580_v61, %v4762_v46  ;;  %2278 = vmatpush.bf16.msrb.mxu0 %v4049_v53 }
 0x250   :  { %vm1663_vm6 = vcmp.ge.f32.partialorder %v1607_v50, 0.0  ;;  %v1704_v34 = vmul.f32 %v4776_v3, %v1607_v50  ;;  %vm1664_vm7 = vcmp.ge.f32.partialorder %v1636_v30, 0.0  ;;  %v1705_v8 = vmul.f32 %v4778_v51, %v1636_v30  ;;  %2075 = vmatmul.bf16.gmra.mxu0 %v1790_v32  ;;  %2104 = vmatmul.bf16.gmra.mxu1 %v1791_v18 }
 0x251   :  { %v1706_v23 = vmul.f32 %v4765_v37, %v1552_v25  ;;  %v1707_v35 = vmul.f32 %v4768_v24, %v1581_v58  ;;  %vm1665_vm8 = vcmp.ge.f32.partialorder %v1552_v25, 0.0  ;;  %vm1666_vm9 = vcmp.ge.f32.partialorder %v1581_v58, 0.0 }
 0x252   :  { %v1736_v12 = vsel %vm1663_vm6, %v1607_v50, %v1704_v34  ;;  %v1737_v19 = vsel %vm1664_vm7, %v1636_v30, %v1705_v8 }
 0x253   :  { %v1768_v45 = vadd.f32 %v1736_v12, %v4535_v48  ;;  %v1769_v60 = vadd.f32 %v1737_v19, %v4605_v49  ;;  %v1738_v54 = vsel %vm1665_vm8, %v1552_v25, %v1706_v23  ;;  %v1739_v14 = vsel %vm1666_vm9, %v1581_v58, %v1707_v35  ;;  %2279 = vmatpush.bf16.msrb.mxu0 %v4048_v0  ;;  %v4047_v25 = vld [vmem:[%s4828_s27 + $0x28] sm:$0xff] }
 0x254   :  { %v1770_v50 = vadd.f32 %v1738_v54, %v4497_v2  ;;  %v1771_v55 = vadd.f32 %v1739_v14, %v4565_v39 }
 0x255   :  { %v1609_v36 = vpop.f32.mrf.mxu2  ;;  %v1638_v38 = vpop.f32.mrf.mxu3  ;;  %v1792_v63 = vpack.c.bf16 %v1768_v45, %v1764_v27  ;;  %v1793_v5 = vpack.c.bf16 %v1769_v60, %v1765_v52  ;;  %v4046_v60 = vld [vmem:[%s4828_s27 + $0x20] sm:$0xff] }
 0x256   :  { %v1610_v31 = vadd.f32 %v1609_v36, %v4770_v42  ;;  %v1639_v44 = vadd.f32 %v1638_v38, %v4772_v22  ;;  %v1553_v48 = vpop.f32.mrf.mxu0  ;;  %v1582_v57 = vpop.f32.mrf.mxu1 }
 0x257   :  { %v1554_v49 = vadd.f32 %v1553_v48, %v4760_v28  ;;  %v1583_v7 = vadd.f32 %v1582_v57, %v4762_v46  ;;  %2133 = vmatmul.bf16.gmra.mxu2 %v1792_v63  ;;  %2162 = vmatmul.bf16.gmra.mxu3 %v1793_v5 }
 0x258   :  { %v1708_v56 = vmul.f32 %v4776_v3, %v1610_v31  ;;  %v1709_v62 = vmul.f32 %v4778_v51, %v1639_v44  ;;  %vm1667_vm12 = vcmp.ge.f32.partialorder %v1610_v31, 0.0  ;;  %vm1668_vm13 = vcmp.ge.f32.partialorder %v1639_v44, 0.0  ;;  %2280 = vmatpush.bf16.msrb.mxu0 %v4047_v25 }
 0x259   :  { %vm1669_vm10 = vcmp.ge.f32.partialorder %v1554_v49, 0.0  ;;  %v1710_v1 = vmul.f32 %v4765_v37, %v1554_v49  ;;  %vm1670_vm11 = vcmp.ge.f32.partialorder %v1583_v7, 0.0  ;;  %v1711_v10 = vmul.f32 %v4768_v24, %v1583_v7 }
 0x25a   :  { %v1740_v32 = vsel %vm1667_vm12, %v1610_v31, %v1708_v56  ;;  %v1741_v18 = vsel %vm1668_vm13, %v1639_v44, %v1709_v62 }
 0x25b   :  { %v1742_v13 = vsel %vm1669_vm10, %v1554_v49, %v1710_v1  ;;  %v1743_v26 = vsel %vm1670_vm11, %v1583_v7, %v1711_v10  ;;  %v1772_v45 = vadd.f32 %v1740_v32, %v4554_v6  ;;  %v1773_v52 = vadd.f32 %v1741_v18, %v4609_v15  ;;  %v4045_v15 = vld [vmem:[%s4828_s27 + $0x18] sm:$0xff] }
 0x25c   :  { %v1774_v30 = vadd.f32 %v1742_v13, %v4491_v4  ;;  %v1775_v61 = vadd.f32 %v1743_v26, %v4567_v40  ;;  %2281 = vmatpush.bf16.msrb.mxu0 %v4046_v60 }
 0x25d   :  { %v1611_v20 = vpop.f32.mrf.mxu2  ;;  %v1640_v21 = vpop.f32.mrf.mxu3 }
 0x25e   :  { %v1612_v58 = vadd.f32 %v1611_v20, %v4770_v42  ;;  %v1641_v34 = vadd.f32 %v1640_v21, %v4772_v22  ;;  %v1556_v8 = vpop.f32.mrf.mxu0  ;;  %v1585_v12 = vpop.f32.mrf.mxu1  ;;  %v1794_v2 = vpack.c.bf16 %v1774_v30, %v1770_v50  ;;  %v1795_v19 = vpack.c.bf16 %v1775_v61, %v1771_v55 }
 0x25f   :  { %v1557_v4 = vadd.f32 %v1556_v8, %v4760_v28  ;;  %v1586_v39 = vadd.f32 %v1585_v12, %v4762_v46 }
 0x260   :  { %vm1671_vm14 = vcmp.ge.f32.partialorder %v1612_v58, 0.0  ;;  %v1712_v40 = vmul.f32 %v4776_v3, %v1612_v58  ;;  %vm1672_vm15 = vcmp.ge.f32.partialorder %v1641_v34, 0.0  ;;  %v1713_v27 = vmul.f32 %v4778_v51, %v1641_v34  ;;  %2080 = vmatmul.bf16.gmra.mxu0 %v1794_v2  ;;  %2109 = vmatmul.bf16.gmra.mxu1 %v1795_v19 }
 0x261   :  { %v1714_v36 = vmul.f32 %v4765_v37, %v1557_v4  ;;  %v1715_v38 = vmul.f32 %v4768_v24, %v1586_v39  ;;  %vm1673_vm0 = vcmp.ge.f32.partialorder %v1557_v4, 0.0  ;;  %vm1674_vm1 = vcmp.ge.f32.partialorder %v1586_v39, 0.0  ;;  %2282 = vmatpush.bf16.msrb.mxu0 %v4045_v15 }
 0x262   :  { %v1744_v23 = vsel %vm1671_vm14, %v1612_v58, %v1712_v40  ;;  %v1745_v35 = vsel %vm1672_vm15, %v1641_v34, %v1713_v27  ;;  %v4901_v34 = vld [vmem:[%s4740_s11] ss:$0 sm:$0xff]  ;;  %s5043_s11 = sld [smem:[%s5130_s0 + %s4174_s8]]  }
 0x263   :  { %v1776_v63 = vadd.f32 %v1744_v23, %v4557_v29  ;;  %v1777_v5 = vadd.f32 %v1745_v35, %v4611_v43  ;;  %v1746_v57 = vsel %vm1673_vm0, %v1557_v4, %v1714_v36  ;;  %v1747_v49 = vsel %vm1674_vm1, %v1586_v39, %v1715_v38  ;;  %v4906_v35 = vld [vmem:[%s4811_s23] ss:$0 sm:$0xff]  ;;  %s5092_s23 = sld [smem:[%s5130_s0 + %s4177_s20]]  }
 0x264   :  { %v1778_v1 = vadd.f32 %v1746_v57, %v4531_v47  ;;  %v1779_v10 = vadd.f32 %v1747_v49, %v4585_v16 }
 0x265   :  { %v1614_v31 = vpop.f32.mrf.mxu2  ;;  %v1643_v44 = vpop.f32.mrf.mxu3  ;;  %v1796_v6 = vpack.c.bf16 %v1776_v63, %v1772_v45  ;;  %v1797_v48 = vpack.c.bf16 %v1777_v5, %v1773_v52 }
 0x266   :  { %v1615_v7 = vadd.f32 %v1614_v31, %v4770_v42  ;;  %v1558_v53 = vpop.f32.mrf.mxu0  ;;  %v1587_v54 = vpop.f32.mrf.mxu1  ;;  %v1644_v14 = vadd.f32 %v1643_v44, %v4772_v22 }
 0x267   :  { %v1559_v56 = vadd.f32 %v1558_v53, %v4760_v28  ;;  %v1588_v29 = vadd.f32 %v1587_v54, %v4762_v46  ;;  %2138 = vmatmul.bf16.gmra.mxu2 %v1796_v6  ;;  %2167 = vmatmul.bf16.gmra.mxu3 %v1797_v48 }
 0x268   :  { %v1716_v0 = vmul.f32 %v4776_v3, %v1615_v7  ;;  %v1717_v13 = vmul.f32 %v4778_v51, %v1644_v14  ;;  %vm1675_vm4 = vcmp.ge.f32.partialorder %v1615_v7, 0.0  ;;  %vm1676_vm5 = vcmp.ge.f32.partialorder %v1644_v14, 0.0 }
 0x269   :  { %vm1677_vm2 = vcmp.ge.f32.partialorder %v1559_v56, 0.0  ;;  %v1718_v43 = vmul.f32 %v4765_v37, %v1559_v56  ;;  %vm1678_vm3 = vcmp.ge.f32.partialorder %v1588_v29, 0.0  ;;  %v1719_v62 = vmul.f32 %v4768_v24, %v1588_v29 }
 0x26a   :  { %v1748_v61 = vsel %vm1675_vm4, %v1615_v7, %v1716_v0  ;;  %v1749_v32 = vsel %vm1676_vm5, %v1644_v14, %v1717_v13 }
 0x26b   :  { %v1750_v28 = vsel %vm1677_vm2, %v1559_v56, %v1718_v43  ;;  %v1751_v26 = vsel %vm1678_vm3, %v1588_v29, %v1719_v62  ;;  %v1781_v21 = vadd.f32 %v1749_v32, %v4620_v9  ;;  %v4042_v9 = vld [vmem:[%s4828_s27] sm:$0xff] }
 0x26c   :  { %v1782_v46 = vadd.f32 %v1750_v28, %v4525_v41  ;;  %v1783_v37 = vadd.f32 %v1751_v26, %v4587_v17 }
 0x26d   :  { %v1616_v50 = vpop.f32.mrf.mxu2  ;;  %v1645_v30 = vpop.f32.mrf.mxu3 }
 0x26e   :  { %v1617_v24 = vadd.f32 %v1616_v50, %v4770_v42  ;;  %v1646_v47 = vadd.f32 %v1645_v30, %v4772_v22  ;;  %v1798_v55 = vpack.c.bf16 %v1782_v46, %v1778_v1  ;;  %v1799_v16 = vpack.c.bf16 %v1783_v37, %v1779_v10 }
 0x26f   :  { %v1780_v42 = vadd.f32 %v1748_v61, %v4575_v59  ;;  %v4044_v59 = vld [vmem:[%s4828_s27 + $0x10] sm:$0xff] }
 0x270   :  { %vm1679_vm6 = vcmp.ge.f32.partialorder %v1617_v24, 0.0  ;;  %v1720_v18 = vmul.f32 %v4776_v3, %v1617_v24  ;;  %vm1680_vm7 = vcmp.ge.f32.partialorder %v1646_v47, 0.0  ;;  %v1721_v20 = vmul.f32 %v4778_v51, %v1646_v47  ;;  %2085 = vmatmul.bf16.gmra.mxu0 %v1798_v55  ;;  %2114 = vmatmul.bf16.gmra.mxu1 %v1799_v16 }
 0x271   :  { %2283 = vmatpush.bf16.msrb.mxu0 %v4044_v59  ;;  %v4055_v59 = vld [vmem:[%s4921_s9 + $0x28] sm:$0xff] }
 0x272   :  { %v1752_v41 = vsel %vm1679_vm6, %v1617_v24, %v1720_v18  ;;  %v1753_v17 = vsel %vm1680_vm7, %v1646_v47, %v1721_v20  ;;  %v4057_v20 = vld [vmem:[%s4921_s9 + $0x38] sm:$0xff] }
 0x273   :  { %v1784_v22 = vadd.f32 %v1752_v41, %v4578_v11  ;;  %v1785_v25 = vadd.f32 %v1753_v17, %v4622_v33  ;;  %v4043_v11 = vld [vmem:[%s4828_s27 + $0x8] sm:$0xff]  ;;  %2407 = vmatpush.bf16.msrb.mxu1 %v4057_v20  ;;  %s5101_s27 = sld [smem:[%s5130_s0 + %s4178_s24]]  }
 0x275   :  { %v1800_v58 = vpack.c.bf16 %v1784_v22, %v1780_v42  ;;  %v1801_v3 = vpack.c.bf16 %v1785_v25, %v1781_v21  ;;  %2284 = vmatpush.bf16.msrb.mxu0 %v4043_v11  ;;  %v4056_v42 = vld [vmem:[%s4921_s9 + $0x30] sm:$0xff] }
 0x277   :  { %2143 = vmatmul.bf16.gmra.mxu2 %v1800_v58  ;;  %2172 = vmatmul.bf16.gmra.mxu3 %v1801_v3 }
 0x278   :  { %2408 = vmatpush.bf16.msrb.mxu1 %v4056_v42  ;;  %v4065_v42 = vld [vmem:[%s4974_s21 + $0x38] sm:$0xff] }
 0x279   :  { %2285 = vmatpush.bf16.msrb.mxu0 %v4042_v9  ;;  %2544 = vmatpush.bf16.msra.mxu2 %v4065_v42 }
 0x27c   :  { %2409 = vmatpush.bf16.msrb.mxu1 %v4055_v59 }
 0x2bd   :  { %v2071_v33 = vpop.f32.mrf.mxu0  ;;  %v2100_v51 = vpop.f32.mrf.mxu1 }
 0x2be   :  { %v2072_v2 = vadd.f32 %v4901_v34, %v2071_v33 }
 0x2c0   :  { %v2101_v39 = vadd.f32 %v2100_v51, %v2072_v2 }
 0x2c5   :  { %v2073_v8 = vpop.f32.mrf.mxu0  ;;  %v2102_v12 = vpop.f32.mrf.mxu1 }
 0x2c6   :  { %v2074_v40 = vadd.f32 %v4901_v34, %v2073_v8  ;;  %v4054_v8 = vld [vmem:[%s4921_s9 + $0x20] sm:$0xff] }
 0x2c7   :  { %2410 = vmatpush.bf16.msrb.mxu1 %v4054_v8 }
 0x2c8   :  { %v2103_v60 = vadd.f32 %v2102_v12, %v2074_v40 }
 0x2ca   :  { %v2129_v19 = vpop.f32.mrf.mxu2  ;;  %v2158_v4 = vpop.f32.mrf.mxu3 }
 0x2cb   :  { %v2130_v27 = vadd.f32 %v2129_v19, %v2101_v39 }
 0x2cd   :  { %v2076_v45 = vpop.f32.mrf.mxu0  ;;  %v2105_v52 = vpop.f32.mrf.mxu1  ;;  %v2159_v23 = vadd.f32 %v2158_v4, %v2130_v27 }
 0x2ce   :  { %v2077_v6 = vadd.f32 %v4901_v34, %v2076_v45 }
 0x2cf   :  { %v2190_v5 = vmul.f32 %v4906_v35, %v2159_v23  ;;  %vm2179_vm8 = vcmp.ge.f32.partialorder %v2159_v23, 0.0 }
 0x2d0   :  { %v2106_v14 = vadd.f32 %v2105_v52, %v2077_v6  ;;  %v4053_v52 = vld [vmem:[%s4921_s9 + $0x18] sm:$0xff] }
 0x2d1   :  { %v4911_v57 = vsel %vm2179_vm8, %v2159_v23, %v2190_v5  ;;  %2411 = vmatpush.bf16.msrb.mxu1 %v4053_v52 }
 0x2d2   :  { %v2131_v36 = vpop.f32.mrf.mxu2  ;;  %v2160_v38 = vpop.f32.mrf.mxu3 }
 0x2d3   :  { %v2132_v63 = vadd.f32 %v2131_v36, %v2103_v60 }
 0x2d5   :  { %v2161_v31 = vadd.f32 %v2160_v38, %v2132_v63  ;;  %v2078_v44 = vpop.f32.mrf.mxu0  ;;  %v2107_v15 = vpop.f32.mrf.mxu1  ;;  %v4052_v38 = vld [vmem:[%s4921_s9 + $0x10] sm:$0xff] }
 0x2d6   :  { %v2079_v56 = vadd.f32 %v4901_v34, %v2078_v44  ;;  %2412 = vmatpush.bf16.msrb.mxu1 %v4052_v38 }
 0x2d7   :  { %vm2180_vm9 = vcmp.ge.f32.partialorder %v2161_v31, 0.0  ;;  %v2191_v48 = vmul.f32 %v4906_v35, %v2161_v31 }
 0x2d8   :  { %v2108_v62 = vadd.f32 %v2107_v15, %v2079_v56  ;;  %v4050_v56 = vld [vmem:[%s4921_s9] sm:$0xff] }
 0x2d9   :  { %v4913_v49 = vsel %vm2180_vm9, %v2161_v31, %v2191_v48 }
 0x2da   :  { %v2206_v7 = vpack.c.bf16 %v4913_v49, %v4911_v57  ;;  %v2134_v53 = vpop.f32.mrf.mxu2  ;;  %v2163_v54 = vpop.f32.mrf.mxu3 }
 0x2db   :  { %v2135_v29 = vadd.f32 %v2134_v53, %v2106_v14 }
 0x2dc   :  { %2286 = vmatmul.bf16.vlgmr.msrb.gmra.mxu0 %v2206_v7 }
 0x2dd   :  { %v2081_v43 = vpop.f32.mrf.mxu0  ;;  %v2164_v1 = vadd.f32 %v2163_v54, %v2135_v29  ;;  %v2110_v10 = vpop.f32.mrf.mxu1 }
 0x2de   :  { %v2082_v50 = vadd.f32 %v4901_v34, %v2081_v43  ;;  %v4140_v43 = vld [vmem:[%s4890_s1] ss:$0 sm:$0xff]  ;;  %s5112_s1 = sld [smem:[%s5130_s0 + %s4179_s28]]  }
 0x2df   :  { %v2192_v26 = vmul.f32 %v4906_v35, %v2164_v1  ;;  %vm2181_vm10 = vcmp.ge.f32.partialorder %v2164_v1, 0.0 }
 0x2e0   :  { %v2111_v32 = vadd.f32 %v2110_v10, %v2082_v50 }
 0x2e1   :  { %v4926_v24 = vsel %vm2181_vm10, %v2164_v1, %v2192_v26  ;;  %v4141_v1 = vld [vmem:[%s4895_s5] ss:$0 sm:$0xff]  ;;  %s3009_s5 = sld [smem:[%s5130_s0 + %s4180_s2]]  }
 0x2e2   :  { %v2136_v0 = vpop.f32.mrf.mxu2  ;;  %v2165_v13 = vpop.f32.mrf.mxu3 }
 0x2e3   :  { %v2137_v28 = vadd.f32 %v2136_v0, %v2108_v62 }
 0x2e5   :  { %v2166_v46 = vadd.f32 %v2165_v13, %v2137_v28  ;;  %v2083_v37 = vpop.f32.mrf.mxu0  ;;  %v2112_v18 = vpop.f32.mrf.mxu1 }
 0x2e6   :  { %v2084_v41 = vadd.f32 %v4901_v34, %v2083_v37 }
 0x2e7   :  { %vm2182_vm11 = vcmp.ge.f32.partialorder %v2166_v46, 0.0  ;;  %v2193_v30 = vmul.f32 %v4906_v35, %v2166_v46 }
 0x2e8   :  { %v2113_v21 = vadd.f32 %v2112_v18, %v2084_v41 }
 0x2e9   :  { %v4928_v47 = vsel %vm2182_vm11, %v2166_v46, %v2193_v30 }
 0x2ea   :  { %v2139_v55 = vpop.f32.mrf.mxu2  ;;  %v2168_v16 = vpop.f32.mrf.mxu3  ;;  %v2207_v61 = vpack.c.bf16 %v4928_v47, %v4926_v24 }
 0x2eb   :  { %v2140_v17 = vadd.f32 %v2139_v55, %v2111_v32 }
 0x2ec   :  { %2291 = vmatmul.bf16.gmra.mxu0 %v2207_v61 }
 0x2ed   :  { %v2086_v22 = vpop.f32.mrf.mxu0  ;;  %v2169_v25 = vadd.f32 %v2168_v16, %v2140_v17  ;;  %v2115_v51 = vpop.f32.mrf.mxu1 }
 0x2ee   :  { %v2087_v12 = vadd.f32 %v4901_v34, %v2086_v22  ;;  %v4064_v22 = vld [vmem:[%s4974_s21 + $0x30] sm:$0xff] }
 0x2ef   :  { %v2194_v9 = vmul.f32 %v4906_v35, %v2169_v25  ;;  %vm2183_vm12 = vcmp.ge.f32.partialorder %v2169_v25, 0.0  ;;  %2545 = vmatpush.bf16.msra.mxu2 %v4064_v22 }
 0x2f0   :  { %v2116_v60 = vadd.f32 %v2115_v51, %v2087_v12  ;;  %v4061_v12 = vld [vmem:[%s4974_s21 + $0x18] sm:$0xff] }
 0x2f1   :  { %v4940_v4 = vsel %vm2183_vm12, %v2169_v25, %v2194_v9  ;;  %v4063_v25 = vld [vmem:[%s4974_s21 + $0x28] sm:$0xff] }
 0x2f2   :  { %v2141_v58 = vpop.f32.mrf.mxu2  ;;  %v2170_v3 = vpop.f32.mrf.mxu3 }
 0x2f3   :  { %v2142_v11 = vadd.f32 %v2141_v58, %v2113_v21  ;;  %2546 = vmatpush.bf16.msra.mxu2 %v4063_v25 }
 0x2f5   :  { %v2171_v33 = vadd.f32 %v2170_v3, %v2142_v11  ;;  %v2088_v19 = vpop.f32.mrf.mxu0  ;;  %v2117_v63 = vpop.f32.mrf.mxu1  ;;  %v4062_v11 = vld [vmem:[%s4974_s21 + $0x20] sm:$0xff] }
 0x2f6   :  { %v2089_v23 = vadd.f32 %v4901_v34, %v2088_v19  ;;  %v4060_v19 = vld [vmem:[%s4974_s21 + $0x10] sm:$0xff] }
 0x2f7   :  { %vm2184_vm13 = vcmp.ge.f32.partialorder %v2171_v33, 0.0  ;;  %v2195_v2 = vmul.f32 %v4906_v35, %v2171_v33  ;;  %2547 = vmatpush.bf16.msra.mxu2 %v4062_v11  ;;  %v4068_v11 = vld [vmem:[%s5012_s3 + $0x10] sm:$0xff] }
 0x2f8   :  { %v2118_v5 = vadd.f32 %v2117_v63, %v2089_v23  ;;  %v4059_v63 = vld [vmem:[%s4974_s21 + $0x8] sm:$0xff] }
 0x2f9   :  { %v4942_v39 = vsel %vm2184_vm13, %v2171_v33, %v2195_v2 }
 0x2fa   :  { %v2144_v40 = vpop.f32.mrf.mxu2  ;;  %v2173_v27 = vpop.f32.mrf.mxu3  ;;  %v2208_v45 = vpack.c.bf16 %v4942_v39, %v4940_v4 }
 0x2fb   :  { %v2145_v36 = vadd.f32 %v2144_v40, %v2116_v60  ;;  %2548 = vmatpush.bf16.msra.mxu2 %v4061_v12 }
 0x2fc   :  { %2296 = vmatmul.bf16.gmra.mxu0 %v2208_v45 }
 0x2fd   :  { %v2174_v31 = vadd.f32 %v2173_v27, %v2145_v36 }
 0x2ff   :  { %v2196_v15 = vmul.f32 %v4906_v35, %v2174_v31  ;;  %vm2185_vm14 = vcmp.ge.f32.partialorder %v2174_v31, 0.0  ;;  %2549 = vmatpush.bf16.msra.mxu2 %v4060_v19 }
 0x301   :  { %v4951_v53 = vsel %vm2185_vm14, %v2174_v31, %v2196_v15  ;;  %v4995_v31 = vld [vmem:[%s4960_s13] ss:$0 sm:$0xff] }
 0x302   :  { %v2146_v44 = vpop.f32.mrf.mxu2  ;;  %v2175_v48 = vpop.f32.mrf.mxu3 }
 0x303   :  { %v2147_v6 = vadd.f32 %v2146_v44, %v2118_v5  ;;  %2550 = vmatpush.bf16.msra.mxu2 %v4059_v63  ;;  %v4058_v5 = vld [vmem:[%s4974_s21] sm:$0xff] }
 0x305   :  { %v2176_v7 = vadd.f32 %v2175_v48, %v2147_v6  ;;  %v4999_v48 = vld [vmem:[%s4965_s17] ss:$0 sm:$0xff] }
 0x307   :  { %vm2186_vm15 = vcmp.ge.f32.partialorder %v2176_v7, 0.0  ;;  %v2197_v34 = vmul.f32 %v4906_v35, %v2176_v7  ;;  %v4051_v35 = vld [vmem:[%s4921_s9 + $0x8] sm:$0xff]  ;;  %2551 = vmatpush.bf16.msra.mxu2 %v4058_v5 }
 0x308   :  { %2413 = vmatpush.bf16.msrb.mxu1 %v4051_v35 }
 0x309   :  { %v4953_v54 = vsel %vm2186_vm15, %v2176_v7, %v2197_v34 }
 0x30a   :  { %v2209_v14 = vpack.c.bf16 %v4953_v54, %v4951_v53 }
 0x30c   :  { %2301 = vmatmul.bf16.gmra.mxu0 %v2209_v14  ;;  %2414 = vmatpush.bf16.msrb.mxu1 %v4050_v56 }
 0x359   :  { %v2287_v29 = vpop.f32.mrf.mxu0 }
 0x35a   :  { %v2288_v62 = vadd.f32 %v4140_v43, %v2287_v29 }
 0x35c   :  { %v2319_v0 = vmul.f32 %v4141_v1, %v2288_v62  ;;  %vm2308_vm0 = vcmp.ge.f32.partialorder %v2288_v62, 0.0 }
 0x35e   :  { %v2327_v26 = vsel %vm2308_vm0, %v2288_v62, %v2319_v0 }
 0x361   :  { %v2289_v10 = vpop.f32.mrf.mxu0 }
 0x362   :  { %v2290_v13 = vadd.f32 %v4140_v43, %v2289_v10 }
 0x364   :  { %vm2309_vm1 = vcmp.ge.f32.partialorder %v2290_v13, 0.0  ;;  %v2320_v28 = vmul.f32 %v4141_v1, %v2290_v13 }
 0x366   :  { %v2328_v46 = vsel %vm2309_vm1, %v2290_v13, %v2320_v28 }
 0x367   :  { %v2335_v37 = vpack.c.bf16 %v2328_v46, %v2327_v26 }
 0x369   :  { %v2292_v50 = vpop.f32.mrf.mxu0  ;;  %2415 = vmatmul.bf16.vlgmr.msrb.gmra.mxu1 %v2335_v37 }
 0x36a   :  { %v2293_v30 = vadd.f32 %v4140_v43, %v2292_v50 }
 0x36c   :  { %v2321_v16 = vmul.f32 %v4141_v1, %v2293_v30  ;;  %vm2310_vm2 = vcmp.ge.f32.partialorder %v2293_v30, 0.0 }
 0x36e   :  { %v2329_v18 = vsel %vm2310_vm2, %v2293_v30, %v2321_v16 }
 0x371   :  { %v2294_v55 = vpop.f32.mrf.mxu0 }
 0x372   :  { %v2295_v61 = vadd.f32 %v4140_v43, %v2294_v55  ;;  %v4073_v55 = vld [vmem:[%s5012_s3 + $0x38] sm:$0xff] }
 0x373   :  { %2673 = vmatpush.bf16.msra.mxu3 %v4073_v55  ;;  %v4076_v55 = vld [vmem:[%s5058_s15 + $0x10] sm:$0xff] }
 0x374   :  { %vm2311_vm3 = vcmp.ge.f32.partialorder %v2295_v61, 0.0  ;;  %v2322_v32 = vmul.f32 %v4141_v1, %v2295_v61 }
 0x376   :  { %v2330_v20 = vsel %vm2311_vm3, %v2295_v61, %v2322_v32  ;;  %v4072_v61 = vld [vmem:[%s5012_s3 + $0x30] sm:$0xff] }
 0x377   :  { %v2336_v41 = vpack.c.bf16 %v2330_v20, %v2329_v18  ;;  %2674 = vmatpush.bf16.msra.mxu3 %v4072_v61  ;;  %v4071_v20 = vld [vmem:[%s5012_s3 + $0x28] sm:$0xff] }
 0x379   :  { %v2297_v17 = vpop.f32.mrf.mxu0  ;;  %2420 = vmatmul.bf16.gmra.mxu1 %v2336_v41 }
 0x37a   :  { %v2298_v21 = vadd.f32 %v4140_v43, %v2297_v17  ;;  %v4070_v17 = vld [vmem:[%s5012_s3 + $0x20] sm:$0xff] }
 0x37b   :  { %2675 = vmatpush.bf16.msra.mxu3 %v4071_v20 }
 0x37c   :  { %v2323_v3 = vmul.f32 %v4141_v1, %v2298_v21  ;;  %vm2312_vm4 = vcmp.ge.f32.partialorder %v2298_v21, 0.0 }
 0x37e   :  { %v2331_v33 = vsel %vm2312_vm4, %v2298_v21, %v2323_v3  ;;  %v4069_v3 = vld [vmem:[%s5012_s3 + $0x18] sm:$0xff] }
 0x37f   :  { %2676 = vmatpush.bf16.msra.mxu3 %v4070_v17  ;;  %v4075_v17 = vld [vmem:[%s5058_s15 + $0x8] sm:$0xff] }
 0x381   :  { %v2299_v58 = vpop.f32.mrf.mxu0 }
 0x382   :  { %v2300_v59 = vadd.f32 %v4140_v43, %v2299_v58 }
 0x383   :  { %2677 = vmatpush.bf16.msra.mxu3 %v4069_v3 }
 0x384   :  { %vm2313_vm5 = vcmp.ge.f32.partialorder %v2300_v59, 0.0  ;;  %v2324_v9 = vmul.f32 %v4141_v1, %v2300_v59 }
 0x386   :  { %v2332_v51 = vsel %vm2313_vm5, %v2300_v59, %v2324_v9 }
 0x387   :  { %v2337_v8 = vpack.c.bf16 %v2332_v51, %v2331_v33  ;;  %2678 = vmatpush.bf16.msra.mxu3 %v4068_v11 }
 0x389   :  { %v2302_v2 = vpop.f32.mrf.mxu0  ;;  %2425 = vmatmul.bf16.gmra.mxu1 %v2337_v8 }
 0x38a   :  { %v2303_v40 = vadd.f32 %v4140_v43, %v2302_v2 }
 0x38c   :  { %v2325_v45 = vmul.f32 %v4141_v1, %v2303_v40  ;;  %vm2314_vm6 = vcmp.ge.f32.partialorder %v2303_v40, 0.0 }
 0x38e   :  { %v2333_v23 = vsel %vm2314_vm6, %v2303_v40, %v2325_v45  ;;  %v4067_v40 = vld [vmem:[%s5012_s3 + $0x8] sm:$0xff] }
 0x38f   :  { %2679 = vmatpush.bf16.msra.mxu3 %v4067_v40 }
 0x391   :  { %v2304_v27 = vpop.f32.mrf.mxu0 }
 0x392   :  { %v2305_v52 = vadd.f32 %v4140_v43, %v2304_v27  ;;  %v4066_v27 = vld [vmem:[%s5012_s3] sm:$0xff] }
 0x393   :  { %2680 = vmatpush.bf16.msra.mxu3 %v4066_v27 }
 0x394   :  { %vm2315_vm7 = vcmp.ge.f32.partialorder %v2305_v52, 0.0  ;;  %v2326_v60 = vmul.f32 %v4141_v1, %v2305_v52 }
 0x396   :  { %v2334_v36 = vsel %vm2315_vm7, %v2305_v52, %v2326_v60  ;;  %v4145_v52 = vld [vmem:[%s4990_s29] ss:$0 sm:$0xff] }
 0x397   :  { %v2338_v38 = vpack.c.bf16 %v2334_v36, %v2333_v23 }
 0x399   :  { %2430 = vmatmul.bf16.gmra.mxu1 %v2338_v38 }
 0x3e6   :  { %v2416_v44 = vpop.f32.mrf.mxu1 }
 0x3e7   :  { %v2417_v6 = vadd.f32 %v4995_v31, %v2416_v44 }
 0x3e9   :  { %v2448_v15 = vmul.f32 %v4999_v48, %v2417_v6  ;;  %vm2437_vm8 = vcmp.ge.f32.partialorder %v2417_v6, 0.0 }
 0x3eb   :  { %v2456_v14 = vsel %vm2437_vm8, %v2417_v6, %v2448_v15 }
 0x3ec   :  { %v2464_v29 = vadd.f32 %v2456_v14, %v4911_v57 }
 0x3ee   :  { %v2418_v7 = vpop.f32.mrf.mxu1 }
 0x3ef   :  { %v2419_v34 = vadd.f32 %v4995_v31, %v2418_v7 }
 0x3f1   :  { %vm2438_vm9 = vcmp.ge.f32.partialorder %v2419_v34, 0.0  ;;  %v2449_v35 = vmul.f32 %v4999_v48, %v2419_v34 }
 0x3f3   :  { %v2457_v56 = vsel %vm2438_vm9, %v2419_v34, %v2449_v35 }
 0x3f4   :  { %v2465_v43 = vadd.f32 %v2457_v56, %v4913_v49 }
 0x3f6   :  { %v2472_v62 = vpack.c.bf16 %v2465_v43, %v2464_v29  ;;  %v2421_v1 = vpop.f32.mrf.mxu1  ;;  %v4081_v43 = vld [vmem:[%s5058_s15 + $0x38] sm:$0xff] }
 0x3f7   :  { %v2422_v10 = vadd.f32 %v4995_v31, %v2421_v1  ;;  %2802 = vmatpush.bf16.msra.mxu0 %v4081_v43  ;;  %v4084_v43 = vld [vmem:[%s5101_s27 + $0x10] sm:$0xff] }
 0x3f8   :  { %2552 = vmatmul.bf16.vlgmr.msra.gmra.mxu2 %v2472_v62  ;;  %v4080_v62 = vld [vmem:[%s5058_s15 + $0x30] sm:$0xff] }
 0x3f9   :  { %v2450_v0 = vmul.f32 %v4999_v48, %v2422_v10  ;;  %vm2439_vm10 = vcmp.ge.f32.partialorder %v2422_v10, 0.0 }
 0x3fb   :  { %v2458_v57 = vsel %vm2439_vm10, %v2422_v10, %v2450_v0  ;;  %2803 = vmatpush.bf16.msra.mxu0 %v4080_v62  ;;  %v4079_v10 = vld [vmem:[%s5058_s15 + $0x28] sm:$0xff] }
 0x3fc   :  { %v2466_v46 = vadd.f32 %v2458_v57, %v4926_v24  ;;  %v4078_v57 = vld [vmem:[%s5058_s15 + $0x20] sm:$0xff] }
 0x3fe   :  { %v2423_v13 = vpop.f32.mrf.mxu1 }
 0x3ff   :  { %v2424_v28 = vadd.f32 %v4995_v31, %v2423_v13  ;;  %2804 = vmatpush.bf16.msra.mxu0 %v4079_v10 }
 0x401   :  { %vm2440_vm11 = vcmp.ge.f32.partialorder %v2424_v28, 0.0  ;;  %v2451_v49 = vmul.f32 %v4999_v48, %v2424_v28 }
 0x403   :  { %v2459_v26 = vsel %vm2440_vm11, %v2424_v28, %v2451_v49  ;;  %2805 = vmatpush.bf16.msra.mxu0 %v4078_v57 }
 0x404   :  { %v2467_v37 = vadd.f32 %v2459_v26, %v4928_v47 }
 0x406   :  { %v2426_v50 = vpop.f32.mrf.mxu1  ;;  %v2473_v30 = vpack.c.bf16 %v2467_v37, %v2466_v46 }
 0x407   :  { %v2427_v16 = vadd.f32 %v4995_v31, %v2426_v50  ;;  %v4077_v50 = vld [vmem:[%s5058_s15 + $0x18] sm:$0xff] }
 0x408   :  { %2557 = vmatmul.bf16.gmra.mxu2 %v2473_v30  ;;  %2806 = vmatpush.bf16.msra.mxu0 %v4077_v50  ;;  %v4082_v50 = vld [vmem:[%s5101_s27] sm:$0xff] }
 0x409   :  { %v2452_v32 = vmul.f32 %v4999_v48, %v2427_v16  ;;  %vm2441_vm12 = vcmp.ge.f32.partialorder %v2427_v16, 0.0 }
 0x40b   :  { %v2460_v47 = vsel %vm2441_vm12, %v2427_v16, %v2452_v32 }
 0x40c   :  { %v2468_v22 = vadd.f32 %v2460_v47, %v4940_v4  ;;  %2807 = vmatpush.bf16.msra.mxu0 %v4076_v55 }
 0x40e   :  { %v2428_v18 = vpop.f32.mrf.mxu1 }
 0x40f   :  { %v2429_v24 = vadd.f32 %v4995_v31, %v2428_v18 }
 0x410   :  { %2808 = vmatpush.bf16.msra.mxu0 %v4075_v17 }
 0x411   :  { %vm2442_vm13 = vcmp.ge.f32.partialorder %v2429_v24, 0.0  ;;  %v2453_v41 = vmul.f32 %v4999_v48, %v2429_v24 }
 0x413   :  { %v2461_v42 = vsel %vm2442_vm13, %v2429_v24, %v2453_v41 }
 0x414   :  { %v2469_v21 = vadd.f32 %v2461_v42, %v4942_v39  ;;  %v4074_v42 = vld [vmem:[%s5058_s15] sm:$0xff] }
 0x415   :  { %2809 = vmatpush.bf16.msra.mxu0 %v4074_v42 }
 0x416   :  { %v2431_v25 = vpop.f32.mrf.mxu1  ;;  %v2474_v58 = vpack.c.bf16 %v2469_v21, %v2468_v22  ;;  %v4146_v21 = vld [vmem:[%s5038_s7] ss:$0 sm:$0xff] }
 0x417   :  { %v2432_v59 = vadd.f32 %v4995_v31, %v2431_v25 }
 0x418   :  { %2562 = vmatmul.bf16.gmra.mxu2 %v2474_v58  ;;  %v4147_v58 = vld [vmem:[%s5043_s11] ss:$0 sm:$0xff] }
 0x419   :  { %v2454_v9 = vmul.f32 %v4999_v48, %v2432_v59  ;;  %vm2443_vm14 = vcmp.ge.f32.partialorder %v2432_v59, 0.0 }
 0x41b   :  { %v2462_v51 = vsel %vm2443_vm14, %v2432_v59, %v2454_v9 }
 0x41c   :  { %v2470_v12 = vadd.f32 %v2462_v51, %v4951_v53 }
 0x41e   :  { %v2433_v33 = vpop.f32.mrf.mxu1 }
 0x41f   :  { %v2434_v4 = vadd.f32 %v4995_v31, %v2433_v33 }
 0x421   :  { %vm2444_vm15 = vcmp.ge.f32.partialorder %v2434_v4, 0.0  ;;  %v2455_v39 = vmul.f32 %v4999_v48, %v2434_v4 }
 0x423   :  { %v2463_v8 = vsel %vm2444_vm15, %v2434_v4, %v2455_v39 }
 0x424   :  { %v2471_v2 = vadd.f32 %v2463_v8, %v4953_v54  ;;  %v4144_v54 = vld [vmem:[%s4985_s25] ss:$0 sm:$0xff] }
 0x426   :  { %v2475_v19 = vpack.c.bf16 %v2471_v2, %v2470_v12 }
 0x428   :  { %2567 = vmatmul.bf16.gmra.mxu2 %v2475_v19 }
 0x47b   :  { %v2553_v53 = vpop.f32.mrf.mxu2 }
 0x47c   :  { %v2554_v45 = vadd.f32 %v4144_v54, %v2553_v53 }
 0x47e   :  { %v2585_v23 = vmul.f32 %v4145_v52, %v2554_v45  ;;  %vm2574_vm0 = vcmp.ge.f32.partialorder %v2554_v45, 0.0 }
 0x480   :  { %v5049_v63 = vsel %vm2574_vm0, %v2554_v45, %v2585_v23 }
 0x483   :  { %v2555_v60 = vpop.f32.mrf.mxu2 }
 0x484   :  { %v2556_v36 = vadd.f32 %v4144_v54, %v2555_v60  ;;  %v4088_v60 = vld [vmem:[%s5101_s27 + $0x30] sm:$0xff] }
 0x486   :  { %vm2575_vm1 = vcmp.ge.f32.partialorder %v2556_v36, 0.0  ;;  %v2586_v38 = vmul.f32 %v4145_v52, %v2556_v36 }
 0x488   :  { %v5051_v5 = vsel %vm2575_vm1, %v2556_v36, %v2586_v38  ;;  %v4087_v36 = vld [vmem:[%s5101_s27 + $0x28] sm:$0xff] }
 0x489   :  { %v2601_v31 = vpack.c.bf16 %v5051_v5, %v5049_v63 }
 0x48b   :  { %v2558_v44 = vpop.f32.mrf.mxu2  ;;  %2681 = vmatmul.bf16.vlgmr.msra.gmra.mxu3 %v2601_v31 }
 0x48c   :  { %v2559_v6 = vadd.f32 %v4144_v54, %v2558_v44 }
 0x48e   :  { %v2587_v15 = vmul.f32 %v4145_v52, %v2559_v6  ;;  %vm2576_vm2 = vcmp.ge.f32.partialorder %v2559_v6, 0.0 }
 0x490   :  { %v5060_v14 = vsel %vm2576_vm2, %v2559_v6, %v2587_v15  ;;  %v4086_v6 = vld [vmem:[%s5101_s27 + $0x20] sm:$0xff] }
 0x493   :  { %v2560_v48 = vpop.f32.mrf.mxu2 }
 0x494   :  { %v2561_v7 = vadd.f32 %v4144_v54, %v2560_v48 }
 0x496   :  { %vm2577_vm3 = vcmp.ge.f32.partialorder %v2561_v7, 0.0  ;;  %v2588_v34 = vmul.f32 %v4145_v52, %v2561_v7 }
 0x498   :  { %v5062_v35 = vsel %vm2577_vm3, %v2561_v7, %v2588_v34 }
 0x499   :  { %v2602_v56 = vpack.c.bf16 %v5062_v35, %v5060_v14 }
 0x49b   :  { %v2563_v29 = vpop.f32.mrf.mxu2  ;;  %2686 = vmatmul.bf16.gmra.mxu3 %v2602_v56  ;;  %v4085_v56 = vld [vmem:[%s5101_s27 + $0x18] sm:$0xff] }
 0x49c   :  { %v2564_v1 = vadd.f32 %v4144_v54, %v2563_v29 }
 0x49e   :  { %v2589_v13 = vmul.f32 %v4145_v52, %v2564_v1  ;;  %vm2578_vm4 = vcmp.ge.f32.partialorder %v2564_v1, 0.0 }
 0x4a0   :  { %v5070_v26 = vsel %vm2578_vm4, %v2564_v1, %v2589_v13 }
 0x4a3   :  { %v2565_v0 = vpop.f32.mrf.mxu2 }
 0x4a4   :  { %v2566_v28 = vadd.f32 %v4144_v54, %v2565_v0 }
 0x4a6   :  { %vm2579_vm5 = vcmp.ge.f32.partialorder %v2566_v28, 0.0  ;;  %v2590_v49 = vmul.f32 %v4145_v52, %v2566_v28 }
 0x4a8   :  { %v5072_v46 = vsel %vm2579_vm5, %v2566_v28, %v2590_v49 }
 0x4a9   :  { %v2603_v37 = vpack.c.bf16 %v5072_v46, %v5070_v26 }
 0x4ab   :  { %v2568_v30 = vpop.f32.mrf.mxu2  ;;  %2691 = vmatmul.bf16.gmra.mxu3 %v2603_v37  ;;  %v4083_v37 = vld [vmem:[%s5101_s27 + $0x8] sm:$0xff] }
 0x4ac   :  { %v2569_v16 = vadd.f32 %v4144_v54, %v2568_v30  ;;  %v4148_v30 = vld [vmem:[%s5087_s19] ss:$0 sm:$0xff] }
 0x4ae   :  { %v2591_v32 = vmul.f32 %v4145_v52, %v2569_v16  ;;  %vm2580_vm6 = vcmp.ge.f32.partialorder %v2569_v16, 0.0 }
 0x4b0   :  { %v5078_v24 = vsel %vm2580_vm6, %v2569_v16, %v2591_v32 }
 0x4b3   :  { %v2570_v61 = vpop.f32.mrf.mxu2 }
 0x4b4   :  { %v2571_v18 = vadd.f32 %v4144_v54, %v2570_v61  ;;  %v4149_v61 = vld [vmem:[%s5092_s23] ss:$0 sm:$0xff] }
 0x4b6   :  { %vm2581_vm7 = vcmp.ge.f32.partialorder %v2571_v18, 0.0  ;;  %v2592_v20 = vmul.f32 %v4145_v52, %v2571_v18  ;;  %v4089_v52 = vld [vmem:[%s5101_s27 + $0x38] sm:$0xff] }
 0x4b7   :  { %2939 = vmatpush.bf16.msra.mxu1 %v4089_v52 }
 0x4b8   :  { %v5080_v47 = vsel %vm2581_vm7, %v2571_v18, %v2592_v20 }
 0x4b9   :  { %v2604_v41 = vpack.c.bf16 %v5080_v47, %v5078_v24 }
 0x4bb   :  { %2696 = vmatmul.bf16.gmra.mxu3 %v2604_v41  ;;  %2940 = vmatpush.bf16.msra.mxu1 %v4088_v60 }
 0x4bf   :  { %2941 = vmatpush.bf16.msra.mxu1 %v4087_v36 }
 0x4c3   :  { %2942 = vmatpush.bf16.msra.mxu1 %v4086_v6 }
 0x4c7   :  { %2943 = vmatpush.bf16.msra.mxu1 %v4085_v56 }
 0x4cb   :  { %2944 = vmatpush.bf16.msra.mxu1 %v4084_v43 }
 0x4cf   :  { %2945 = vmatpush.bf16.msra.mxu1 %v4083_v37 }
 0x4d3   :  { %2946 = vmatpush.bf16.msra.mxu1 %v4082_v50 }
 0x50e   :  { %v2682_v22 = vpop.f32.mrf.mxu3 }
 0x50f   :  { %v2683_v25 = vadd.f32 %v4146_v21, %v2682_v22 }
 0x511   :  { %v2714_v59 = vmul.f32 %v4147_v58, %v2683_v25  ;;  %vm2703_vm8 = vcmp.ge.f32.partialorder %v2683_v25, 0.0 }
 0x513   :  { %v2722_v33 = vsel %vm2703_vm8, %v2683_v25, %v2714_v59 }
 0x516   :  { %v2684_v3 = vpop.f32.mrf.mxu3 }
 0x517   :  { %v2685_v11 = vadd.f32 %v4146_v21, %v2684_v3 }
 0x519   :  { %vm2704_vm9 = vcmp.ge.f32.partialorder %v2685_v11, 0.0  ;;  %v2715_v9 = vmul.f32 %v4147_v58, %v2685_v11 }
 0x51b   :  { %v2723_v4 = vsel %vm2704_vm9, %v2685_v11, %v2715_v9 }
 0x51c   :  { %v2730_v51 = vpack.c.bf16 %v2723_v4, %v2722_v33 }
 0x51e   :  { %v2687_v39 = vpop.f32.mrf.mxu3  ;;  %2810 = vmatmul.bf16.vlgmr.msra.gmra.mxu0 %v2730_v51 }
 0x51f   :  { %v2688_v8 = vadd.f32 %v4146_v21, %v2687_v39 }
 0x521   :  { %v2716_v2 = vmul.f32 %v4147_v58, %v2688_v8  ;;  %vm2705_vm10 = vcmp.ge.f32.partialorder %v2688_v8, 0.0 }
 0x523   :  { %v2724_v27 = vsel %vm2705_vm10, %v2688_v8, %v2716_v2 }
 0x526   :  { %v2689_v12 = vpop.f32.mrf.mxu3 }
 0x527   :  { %v2690_v19 = vadd.f32 %v4146_v21, %v2689_v12 }
 0x529   :  { %vm2706_vm11 = vcmp.ge.f32.partialorder %v2690_v19, 0.0  ;;  %v2717_v40 = vmul.f32 %v4147_v58, %v2690_v19 }
 0x52b   :  { %v2725_v53 = vsel %vm2706_vm11, %v2690_v19, %v2717_v40 }
 0x52c   :  { %v2731_v54 = vpack.c.bf16 %v2725_v53, %v2724_v27 }
 0x52e   :  { %v2692_v45 = vpop.f32.mrf.mxu3  ;;  %2815 = vmatmul.bf16.gmra.mxu0 %v2731_v54 }
 0x52f   :  { %v2693_v23 = vadd.f32 %v4146_v21, %v2692_v45 }
 0x531   :  { %v2718_v31 = vmul.f32 %v4147_v58, %v2693_v23  ;;  %vm2707_vm12 = vcmp.ge.f32.partialorder %v2693_v23, 0.0 }
 0x533   :  { %v2726_v15 = vsel %vm2707_vm12, %v2693_v23, %v2718_v31 }
 0x536   :  { %v2694_v38 = vpop.f32.mrf.mxu3 }
 0x537   :  { %v2695_v44 = vadd.f32 %v4146_v21, %v2694_v38 }
 0x539   :  { %vm2708_vm13 = vcmp.ge.f32.partialorder %v2695_v44, 0.0  ;;  %v2719_v48 = vmul.f32 %v4147_v58, %v2695_v44 }
 0x53b   :  { %v2727_v7 = vsel %vm2708_vm13, %v2695_v44, %v2719_v48 }
 0x53c   :  { %v2732_v34 = vpack.c.bf16 %v2727_v7, %v2726_v15 }
 0x53e   :  { %v2697_v29 = vpop.f32.mrf.mxu3  ;;  %2820 = vmatmul.bf16.gmra.mxu0 %v2732_v34 }
 0x53f   :  { %v2698_v62 = vadd.f32 %v4146_v21, %v2697_v29 }
 0x541   :  { %v2720_v10 = vmul.f32 %v4147_v58, %v2698_v62  ;;  %vm2709_vm14 = vcmp.ge.f32.partialorder %v2698_v62, 0.0 }
 0x543   :  { %v2728_v28 = vsel %vm2709_vm14, %v2698_v62, %v2720_v10 }
 0x546   :  { %v2699_v1 = vpop.f32.mrf.mxu3 }
 0x547   :  { %v2700_v0 = vadd.f32 %v4146_v21, %v2699_v1 }
 0x549   :  { %vm2710_vm15 = vcmp.ge.f32.partialorder %v2700_v0, 0.0  ;;  %v2721_v13 = vmul.f32 %v4147_v58, %v2700_v0 }
 0x54b   :  { %v2729_v57 = vsel %vm2710_vm15, %v2700_v0, %v2721_v13 }
 0x54c   :  { %v2733_v49 = vpack.c.bf16 %v2729_v57, %v2728_v28 }
 0x54e   :  { %2825 = vmatmul.bf16.gmra.mxu0 %v2733_v49 }
 0x59b   :  { %v2811_v55 = vpop.f32.mrf.mxu0 }
 0x59c   :  { %v2812_v16 = vadd.f32 %v4148_v30, %v2811_v55 }
 0x59e   :  { %v2843_v32 = vmul.f32 %v4149_v61, %v2812_v16  ;;  %vm2832_vm0 = vcmp.ge.f32.partialorder %v2812_v16, 0.0 }
 0x5a0   :  { %v2851_v41 = vsel %vm2832_vm0, %v2812_v16, %v2843_v32 }
 0x5a1   :  { %v2859_v22 = vadd.f32 %v2851_v41, %v5049_v63 }
 0x5a3   :  { %v2813_v18 = vpop.f32.mrf.mxu0 }
 0x5a4   :  { %v2814_v20 = vadd.f32 %v4148_v30, %v2813_v18 }
 0x5a6   :  { %vm2833_vm1 = vcmp.ge.f32.partialorder %v2814_v20, 0.0  ;;  %v2844_v17 = vmul.f32 %v4149_v61, %v2814_v20 }
 0x5a8   :  { %v2852_v42 = vsel %vm2833_vm1, %v2814_v20, %v2844_v17 }
 0x5a9   :  { %v2860_v21 = vadd.f32 %v2852_v42, %v5051_v5 }
 0x5ab   :  { %v2867_v25 = vpack.c.bf16 %v2860_v21, %v2859_v22  ;;  %v2816_v58 = vpop.f32.mrf.mxu0 }
 0x5ac   :  { %v2817_v3 = vadd.f32 %v4148_v30, %v2816_v58 }
 0x5ad   :  { %2947 = vmatmul.bf16.vlgmr.msra.gmra.mxu1 %v2867_v25 }
 0x5ae   :  { %v2845_v59 = vmul.f32 %v4149_v61, %v2817_v3  ;;  %vm2834_vm2 = vcmp.ge.f32.partialorder %v2817_v3, 0.0 }
 0x5b0   :  { %v2853_v33 = vsel %vm2834_vm2, %v2817_v3, %v2845_v59 }
 0x5b1   :  { %v2861_v39 = vadd.f32 %v2853_v33, %v5060_v14 }
 0x5b3   :  { %v2818_v11 = vpop.f32.mrf.mxu0 }
 0x5b4   :  { %v2819_v9 = vadd.f32 %v4148_v30, %v2818_v11 }
 0x5b6   :  { %vm2835_vm3 = vcmp.ge.f32.partialorder %v2819_v9, 0.0  ;;  %v2846_v4 = vmul.f32 %v4149_v61, %v2819_v9 }
 0x5b8   :  { %v2854_v51 = vsel %vm2835_vm3, %v2819_v9, %v2846_v4 }
 0x5b9   :  { %v2862_v8 = vadd.f32 %v2854_v51, %v5062_v35 }
 0x5bb   :  { %v2821_v12 = vpop.f32.mrf.mxu0  ;;  %v2868_v63 = vpack.c.bf16 %v2862_v8, %v2861_v39 }
 0x5bc   :  { %v2822_v5 = vadd.f32 %v4148_v30, %v2821_v12 }
 0x5bd   :  { %2952 = vmatmul.bf16.gmra.mxu1 %v2868_v63 }
 0x5be   :  { %v2847_v2 = vmul.f32 %v4149_v61, %v2822_v5  ;;  %vm2836_vm4 = vcmp.ge.f32.partialorder %v2822_v5, 0.0 }
 0x5c0   :  { %v2855_v27 = vsel %vm2836_vm4, %v2822_v5, %v2847_v2 }
 0x5c1   :  { %v2863_v45 = vadd.f32 %v2855_v27, %v5070_v26 }
 0x5c3   :  { %v2823_v19 = vpop.f32.mrf.mxu0 }
 0x5c4   :  { %v2824_v40 = vadd.f32 %v4148_v30, %v2823_v19 }
 0x5c6   :  { %vm2837_vm5 = vcmp.ge.f32.partialorder %v2824_v40, 0.0  ;;  %v2848_v53 = vmul.f32 %v4149_v61, %v2824_v40 }
 0x5c8   :  { %v2856_v54 = vsel %vm2837_vm5, %v2824_v40, %v2848_v53 }
 0x5c9   :  { %v2864_v52 = vadd.f32 %v2856_v54, %v5072_v46  ;;  %v4150_v46 = vld [vmem:[%s5112_s1] ss:$0 sm:$0xff] }
 0x5cb   :  { %v2826_v60 = vpop.f32.mrf.mxu0  ;;  %v2869_v14 = vpack.c.bf16 %v2864_v52, %v2863_v45 }
 0x5cc   :  { %v2827_v35 = vadd.f32 %v4148_v30, %v2826_v60 }
 0x5cd   :  { %2957 = vmatmul.bf16.gmra.mxu1 %v2869_v14 }
 0x5ce   :  { %v2849_v23 = vmul.f32 %v4149_v61, %v2827_v35  ;;  %vm2838_vm6 = vcmp.ge.f32.partialorder %v2827_v35, 0.0 }
 0x5d0   :  { %v2857_v31 = vsel %vm2838_vm6, %v2827_v35, %v2849_v23 }
 0x5d1   :  { %v2865_v48 = vadd.f32 %v2857_v31, %v5078_v24 }
 0x5d3   :  { %v2828_v36 = vpop.f32.mrf.mxu0 }
 0x5d4   :  { %v2829_v38 = vadd.f32 %v4148_v30, %v2828_v36 }
 0x5d6   :  { %vm2839_vm7 = vcmp.ge.f32.partialorder %v2829_v38, 0.0  ;;  %v2850_v44 = vmul.f32 %v4149_v61, %v2829_v38 }
 0x5d8   :  { %v2858_v6 = vsel %vm2839_vm7, %v2829_v38, %v2850_v44 }
 0x5d9   :  { %v2866_v15 = vadd.f32 %v2858_v6, %v5080_v47 }
 0x5db   :  { %v2870_v26 = vpack.c.bf16 %v2866_v15, %v2865_v48 }
 0x5dd   :  { %2962 = vmatmul.bf16.gmra.mxu1 %v2870_v26 }
 0x62a   :  { %v2948_v7 = vpop.f32.mrf.mxu1 }
 0x62b   :  { %v2949_v34 = vadd.f32 %v4150_v46, %v2948_v7 }
 0x62d   :  { %2968 = vst [vmem:[%s3009_s5] sm:$0xff] %v2949_v34 }
 0x632   :  { %v2950_v56 = vpop.f32.mrf.mxu1 }
 0x633   :  { %v2951_v29 = vadd.f32 %v4150_v46, %v2950_v56 }
 0x635   :  { %2969 = vst [vmem:[%s3009_s5 + $0x8] sm:$0xff] %v2951_v29 }
 0x63a   :  { %v2953_v43 = vpop.f32.mrf.mxu1 }
 0x63b   :  { %v2954_v62 = vadd.f32 %v4150_v46, %v2953_v43 }
 0x63d   :  { %2970 = vst [vmem:[%s3009_s5 + $0x10] sm:$0xff] %v2954_v62 }
 0x642   :  { %v2955_v24 = vpop.f32.mrf.mxu1 }
 0x643   :  { %v2956_v1 = vadd.f32 %v4150_v46, %v2955_v24 }
 0x645   :  { %2971 = vst [vmem:[%s3009_s5 + $0x18] sm:$0xff] %v2956_v1 }
 0x64a   :  { %v2958_v47 = vpop.f32.mrf.mxu1 }
 0x64b   :  { %v2959_v10 = vadd.f32 %v4150_v46, %v2958_v47 }
 0x64d   :  { %2972 = vst [vmem:[%s3009_s5 + $0x20] sm:$0xff] %v2959_v10 }
 0x652   :  { %v2960_v0 = vpop.f32.mrf.mxu1 }
 0x653   :  { %v2961_v13 = vadd.f32 %v4150_v46, %v2960_v0 }
 0x655   :  { %2973 = vst [vmem:[%s3009_s5 + $0x28] sm:$0xff] %v2961_v13 }
 0x65a   :  { %v2963_v28 = vpop.f32.mrf.mxu1 }
 0x65b   :  { %v2964_v57 = vadd.f32 %v4150_v46, %v2963_v28 }
 0x65d   :  { %2974 = vst [vmem:[%s3009_s5 + $0x30] sm:$0xff] %v2964_v57 }
 0x662   :  { %v2965_v49 = vpop.f32.mrf.mxu1 }
 0x663   :  { %v2966_v37 = vadd.f32 %v4150_v46, %v2965_v49 }
 0x665   :  { %2975 = vst [vmem:[%s3009_s5 + $0x38] sm:$0xff] %v2966_v37 }

</bundles_post_ra>
